<compile_context>
chip_gen: v6e
topology: v6e:2x2x1
jax: 0.10.0
libtpu: 0.0.40
codegen_flags: <defaults>
</compile_context>

<pallas_src>
import functools

import jax
import jax.numpy as jnp
from jax.experimental import pallas as pl
from jax.experimental.pallas import tpu as pltpu


_VMEM_LIMIT = 32 * 1024 * 1024  # safe default on v5e/v6e/v7x


def _round_up_lanes(m):
    """Round M up to a multiple of 128 (min 128) for lane-dense stores."""
    return max(128, ((m + 127) // 128) * 128)


def _pick_tile(m):
    """Largest lane tile (<=512, multiple of 128) that divides m."""
    for t in (512, 256, 128):
        if m % t == 0:
            return t
    return m  # unreachable for padded M, kept for safety


def _pad_lanes(a, mp):
    """Zero-pad the last (lane) dim of `a` up to mp columns."""
    m = a.shape[-1]
    if m == mp:
        return a
    pad = [(0, 0)] * (a.ndim - 1) + [(0, mp - m)]
    return jnp.pad(a, pad)


# ----------------------------- Pallas kernels ------------------------------

def _conv_bn_kernel(w_ref, p_ref, b_ref, *rest, use_res, use_relu):
    """out^T tile = W_folded (Cout,K) @ patches^T (K,TM) + bias (+res) (+ReLU)."""
    if use_res:
        r_ref, o_ref = rest
    else:
        (o_ref,) = rest
    acc = jnp.dot(w_ref[...], p_ref[...], preferred_element_type=jnp.float32)
    acc = acc + b_ref[...]                       # (Cout,1) lane-broadcast
    if use_res:
        acc = acc + r_ref[...].astype(jnp.float32)
    if use_relu:
        acc = jnp.maximum(acc, 0.0)
    o_ref[...] = acc.astype(o_ref.dtype)


def _maxpool_kernel(p_ref, o_ref):
    # p_ref: (k*k, C, TM) window-stacked slabs -> max over window positions.
    o_ref[...] = jnp.max(p_ref[...], axis=0)


def _avgpool_kernel(x_ref, o_ref):
    # x_ref: (C, N, H*W) -> global spatial mean, fp32 output.
    o_ref[...] = jnp.mean(x_ref[...].astype(jnp.float32), axis=2)


# ------------------------------ Pallas wrappers -----------------------------

def _fused_matmul(wmat, pmat, bias, residual=None, relu=True):
    """wmat (Cout,K) bf16, pmat (K,Mp) bf16, bias (Cout,) f32 -> (Cout,Mp) bf16.

    Mp (the lane dim) must be a multiple of 128.
    """
    cout, k = wmat.shape
    mp = pmat.shape[1]
    tm = _pick_tile(mp)
    use_res = residual is not None
    kernel = functools.partial(_conv_bn_kernel, use_res=use_res, use_relu=relu)
    in_specs = [
        pl.BlockSpec((cout, k), lambda i: (0, 0)),   # weight: resident in VMEM
        pl.BlockSpec((k, tm), lambda i: (0, i)),     # patches: streamed over M
        pl.BlockSpec((cout, 1), lambda i: (0, 0)),   # bias: resident
    ]
    args = [wmat, pmat, bias.reshape(cout, 1)]
    io_alias = {}
    if use_res:
        in_specs.append(pl.BlockSpec((cout, tm), lambda i: (0, i)))
        args.append(residual)
        io_alias = {3: 0}                            # residual buffer -> output
    return pl.pallas_call(
        kernel,
        out_shape=jax.ShapeDtypeStruct((cout, mp), jnp.bfloat16),
        grid=(mp // tm,),
        in_specs=in_specs,
        out_specs=pl.BlockSpec((cout, tm), lambda i: (0, i)),
        input_output_aliases=io_alias,
        compiler_params=pltpu.CompilerParams(
            dimension_semantics=("parallel",),
            vmem_limit_bytes=_VMEM_LIMIT,
        ),
    )(*args)


def _window_slabs(x, kh, kw, stride, pad, pad_value):
    """x: (C, N, H, W) -> (kh*kw, C, N, Ho, Wo) shifted window slabs."""
    xp = jnp.pad(x, ((0, 0), (0, 0), (pad, pad), (pad, pad)),
                 constant_values=pad_value)
    _, _, hp, wp = xp.shape
    ho = (hp - kh) // stride + 1
    wo = (wp - kw) // stride + 1
    cols = []
    for i in range(kh):
        for j in range(kw):
            cols.append(xp[:, :, i:i + stride * (ho - 1) + 1:stride,
                           j:j + stride * (wo - 1) + 1:stride])
    return jnp.stack(cols, axis=0), ho, wo


def conv_bn(x, w, scale, bias, *, stride, pad, residual=None, relu=True):
    """Conv (no bias) + folded BN (+residual) (+ReLU).

    x: (Cin, N, H, W) bf16.  w: (Cout, Cin, kh, kw) fp32 (PyTorch layout).
    Returns (Cout, N, Ho, Wo) bf16.
    """
    cout, cin, kh, kw = w.shape
    n = x.shape[1]
    # Fold BN scale into weights; reorder to (Cout, K) with K order (kh,kw,Cin)
    # to match the contiguous slab stacking order below.
    wmat = (jnp.transpose(w, (0, 2, 3, 1)).reshape(cout, kh * kw * cin)
            * scale[:, None]).astype(jnp.bfloat16)
    slabs, ho, wo = _window_slabs(x, kh, kw, stride, pad, 0.0)
    m = n * ho * wo
    mp = _round_up_lanes(m)
    pmat = _pad_lanes(slabs.reshape(kh * kw * cin, m), mp)   # (K, Mp) bf16
    res = None
    if residual is not None:
        res = _pad_lanes(residual.reshape(cout, m), mp)
    out = _fused_matmul(wmat, pmat, bias.astype(jnp.float32),
                        residual=res, relu=relu)
    if mp != m:
        out = out[:, :m]
    return out.reshape(cout, n, ho, wo)


def maxpool(x, *, k, stride, pad):
    """x: (C, N, H, W) bf16 -> (C, N, Ho, Wo) bf16."""
    c, n = x.shape[0], x.shape[1]
    neg = float(jnp.finfo(jnp.bfloat16).min)
    slabs, ho, wo = _window_slabs(x, k, k, stride, pad, neg)
    m = n * ho * wo
    mp = _round_up_lanes(m)
    tm = _pick_tile(mp)
    p = _pad_lanes(slabs.reshape(k * k, c, m), mp)
    out = pl.pallas_call(
        _maxpool_kernel,
        out_shape=jax.ShapeDtypeStruct((c, mp), jnp.bfloat16),
        grid=(mp // tm,),
        in_specs=[pl.BlockSpec((k * k, c, tm), lambda i: (0, 0, i))],
        out_specs=pl.BlockSpec((c, tm), lambda i: (0, i)),
        compiler_params=pltpu.CompilerParams(
            dimension_semantics=("parallel",),
            vmem_limit_bytes=_VMEM_LIMIT,
        ),
    )(p)
    if mp != m:
        out = out[:, :m]
    return out.reshape(c, n, ho, wo)


def global_avgpool(x):
    """x: (C, N, H, W) bf16 -> (C, N) fp32 global spatial mean."""
    c, n, h, w = x.shape
    return pl.pallas_call(
        _avgpool_kernel,
        out_shape=jax.ShapeDtypeStruct((c, n), jnp.float32),
        grid=(1,),
        in_specs=[pl.BlockSpec((c, n, h * w), lambda i: (0, 0, 0))],
        out_specs=pl.BlockSpec((c, n), lambda i: (0, 0)),
        compiler_params=pltpu.CompilerParams(
            dimension_semantics=("arbitrary",)),
    )(x.reshape(c, n, h * w))


# ------------------------------- Model forward ------------------------------

def basic_block(x, bp, stride):
    identity = x
    out = conv_bn(x, bp['conv1_w'], bp['bn1_scale'], bp['bn1_bias'],
                  stride=stride, pad=1, relu=True)
    if 'ds_w' in bp:  # downsample: conv1x1(stride) + BN
        identity = conv_bn(x, bp['ds_w'], bp['ds_scale'], bp['ds_bias'],
                           stride=stride, pad=0, relu=False)
    out = conv_bn(out, bp['conv2_w'], bp['bn2_scale'], bp['bn2_bias'],
                  stride=1, pad=1, residual=identity, relu=True)
    return out


def forward(x_nchw, params, arch):
    # NCHW -> channel-major (C, N, H, W); bf16 activations between layers.
    x = jnp.transpose(x_nchw, (1, 0, 2, 3)).astype(jnp.bfloat16)
    pi = params['init']
    # VisInitStage: conv7x7 s2 p3 -> BN -> ReLU -> maxpool3x3 s2 p1
    x = conv_bn(x, pi['w'], pi['scale'], pi['bias'], stride=2, pad=3, relu=True)
    x = maxpool(x, k=3, stride=2, pad=1)
    for blocks, stride in zip(params['layers'], arch):
        for bi, bp in enumerate(blocks):
            x = basic_block(x, bp, stride if bi == 0 else 1)
    # TODO(synk): AdaptiveAvgPool2d with out_spatial != (1, 1) not implemented;
    # only the default (1, 1) global average is supported.
    pooled = global_avgpool(x)                     # (C, N) fp32
    return jnp.transpose(pooled, (1, 0))[:, :, None, None]   # (N, C, 1, 1)


# ------------------------------ Parameter init -------------------------------

def build_params(key, in_channels, channels, layers):
    keys = iter(jax.random.split(key, 512))

    def nk():
        return next(keys)

    def conv_w(cout, cin, kh, kw):          # PyTorch layout (Cout, Cin, kh, kw)
        fan_in = kh * kw * cin
        w = jax.random.normal(nk(), (cout, cin, kh, kw), jnp.float32)
        return w * (2.0 / fan_in) ** 0.5

    def bn_params(c):                        # inference-mode folded BN
        gamma = 1.0 + 0.1 * jax.random.normal(nk(), (c,), jnp.float32)
        beta = 0.1 * jax.random.normal(nk(), (c,), jnp.float32)
        mean = 0.1 * jax.random.normal(nk(), (c,), jnp.float32)
        var = 1.0 + jax.random.uniform(nk(), (c,), jnp.float32)
        scale = gamma / jnp.sqrt(var + 1e-5)
        bias = beta - mean * scale
        return scale, bias

    params = {}
    s0, b0 = bn_params(channels[0])
    params['init'] = {'w': conv_w(channels[0], in_channels, 7, 7),
                      'scale': s0, 'bias': b0}

    arch = []
    layer_params = []
    inplanes = channels[0]
    for li, (planes, nblocks) in enumerate(zip(channels, layers)):
        stride = 1 if li == 0 else 2
        blocks = []
        for bi in range(nblocks):
            s_blk = stride if bi == 0 else 1
            blk = {
                'conv1_w': conv_w(planes, inplanes, 3, 3),
                'conv2_w': conv_w(planes, planes, 3, 3),
            }
            blk['bn1_scale'], blk['bn1_bias'] = bn_params(planes)
            blk['bn2_scale'], blk['bn2_bias'] = bn_params(planes)
            if s_blk != 1 or inplanes != planes:
                blk['ds_w'] = conv_w(planes, inplanes, 1, 1)
                blk['ds_scale'], blk['ds_bias'] = bn_params(planes)
            inplanes = planes
            blocks.append(blk)
        layer_params.append(blocks)
        arch.append(stride)
    params['layers'] = layer_params
    return params, arch


# ----------------------------------- main ------------------------------------

if __name__ == "__main__":
    key = jax.random.PRNGKey(0)
    x_key, p_key = jax.random.split(key)

    # Small, module-consistent shapes: batch=2, in_channels=3, 32x32 images,
    # channels=[8,16,32,64], layers=[2,2,2,2].
    in_channels = 3
    channels = [8, 16, 32, 64]
    layers = [2, 2, 2, 2]

    x = jax.random.normal(x_key, (2, in_channels, 32, 32), jnp.float32)
    params, arch = build_params(p_key, in_channels, channels, layers)

    fwd = jax.jit(functools.partial(forward, arch=arch))
    out = fwd(x, params)
    out = jax.block_until_ready(out)

    assert out.shape == (2, channels[-1], 1, 1), out.shape
    assert jnp.all(jnp.isfinite(out))
    print("KERNEL_OK")
</pallas_src>

<mosaic_0001>
module attributes {stable_mosaic.version = 11 : i64} {
  func.func @_conv_bn_kernel(%arg0: i32, %arg1: memref<8x147xbf16, #tpu.memory_space<vmem>>, %arg2: memref<147x512xbf16, #tpu.memory_space<vmem>>, %arg3: memref<8x1xf32, #tpu.memory_space<vmem>>, %arg4: memref<8x512xbf16, #tpu.memory_space<vmem>>) attributes {dimension_semantics = [#tpu.dimension_semantics<parallel>], iteration_bounds = array<i64: 1>, scalar_prefetch = 0 : i64, scratch_operands = 0 : i64, tpu.core_type = #tpu.core_type<tc>, window_params = [{pipeline_mode = #tpu.pipeline_mode<synchronous>, transform_indices = @transform_0, window_bounds = array<i64: 8, 147>}, {transform_indices = @transform_1, window_bounds = array<i64: 147, 512>}, {pipeline_mode = #tpu.pipeline_mode<synchronous>, transform_indices = @transform_2, window_bounds = array<i64: 8, 1>}, {transform_indices = @transform_3, window_bounds = array<i64: 8, 512>}]} {
    %c0 = arith.constant 0 : index
    %c0_0 = arith.constant 0 : index
    %0 = vector.load %arg1[%c0, %c0_0] : memref<8x147xbf16, #tpu.memory_space<vmem>>, vector<8x147xbf16>
    %c0_1 = arith.constant 0 : index
    %c0_2 = arith.constant 0 : index
    %1 = vector.load %arg2[%c0_1, %c0_2] : memref<147x512xbf16, #tpu.memory_space<vmem>>, vector<147x512xbf16>
    %cst = arith.constant dense<0.000000e+00> : vector<8x512xf32>
    %2 = tpu.matmul %0, %1, %cst {dimension_numbers = #tpu.dot_dimension_numbers<[1], [0], [0], [1], [0, 0, 1, 1], [], []>} : vector<8x147xbf16>, vector<147x512xbf16>, vector<8x512xf32> -> vector<8x512xf32>
    %c0_3 = arith.constant 0 : index
    %c0_4 = arith.constant 0 : index
    %3 = vector.load %arg3[%c0_3, %c0_4] : memref<8x1xf32, #tpu.memory_space<vmem>>, vector<8x1xf32>
    %4 = vector.broadcast %3 : vector<8x1xf32> to vector<8x512xf32>
    %5 = arith.addf %2, %4 : vector<8x512xf32>
    %cst_5 = arith.constant 0.000000e+00 : f32
    %6 = vector.broadcast %cst_5 : f32 to vector<8x512xf32>
    %7 = arith.maximumf %5, %6 : vector<8x512xf32>
    %8 = arith.truncf %7 : vector<8x512xf32> to vector<8x512xbf16>
    %c0_6 = arith.constant 0 : index
    %c0_7 = arith.constant 0 : index
    %9 = vector.load %arg4[%c0_6, %c0_7] : memref<8x512xbf16, #tpu.memory_space<vmem>>, vector<8x512xbf16>
    tpu.vector_store %arg4[%c0_6, %c0_7], %8 {strides = array<i32>} : memref<8x512xbf16, #tpu.memory_space<vmem>>, vector<8x512xbf16>,
    return
  }
  func.func @transform_0(%arg0: i32) -> (i32, i32) {
    %c0_i32 = arith.constant 0 : i32
    %c0_i32_0 = arith.constant 0 : i32
    %c0_i32_1 = arith.constant 0 : i32
    return %c0_i32, %c0_i32_0 : i32, i32
  }
  func.func @transform_1(%arg0: i32) -> (i32, i32) {
    %c0_i32 = arith.constant 0 : i32
    %c0_i32_0 = arith.constant 0 : i32
    return %c0_i32, %arg0 : i32, i32
  }
  func.func @transform_2(%arg0: i32) -> (i32, i32) {
    %c0_i32 = arith.constant 0 : i32
    %c0_i32_0 = arith.constant 0 : i32
    %c0_i32_1 = arith.constant 0 : i32
    return %c0_i32, %c0_i32_0 : i32, i32
  }
  func.func @transform_3(%arg0: i32) -> (i32, i32) {
    %c0_i32 = arith.constant 0 : i32
    %c0_i32_0 = arith.constant 0 : i32
    return %c0_i32, %arg0 : i32, i32
  }
}

module attributes {stable_mosaic.version = 11 : i64} {
  func.func @_maxpool_kernel(%arg0: i32, %arg1: memref<9x8x128xbf16, #tpu.memory_space<vmem>>, %arg2: memref<8x128xbf16, #tpu.memory_space<vmem>>) attributes {dimension_semantics = [#tpu.dimension_semantics<parallel>], iteration_bounds = array<i64: 1>, scalar_prefetch = 0 : i64, scratch_operands = 0 : i64, tpu.core_type = #tpu.core_type<tc>, window_params = [{transform_indices = @transform_0, window_bounds = array<i64: 9, 8, 128>}, {transform_indices = @transform_1, window_bounds = array<i64: 8, 128>}]} {
    %c0 = arith.constant 0 : index
    %c0_0 = arith.constant 0 : index
    %c0_1 = arith.constant 0 : index
    %0 = vector.load %arg1[%c0, %c0_0, %c0_1] : memref<9x8x128xbf16, #tpu.memory_space<vmem>>, vector<9x8x128xbf16>
    %cst = arith.constant dense<0xFF80> : vector<8x128xbf16>
    %1 = vector.multi_reduction <maximumf>, %0, %cst [0] : vector<9x8x128xbf16> to vector<8x128xbf16>
    %c0_2 = arith.constant 0 : index
    %c0_3 = arith.constant 0 : index
    %2 = vector.load %arg2[%c0_2, %c0_3] : memref<8x128xbf16, #tpu.memory_space<vmem>>, vector<8x128xbf16>
    tpu.vector_store %arg2[%c0_2, %c0_3], %1 {strides = array<i32>} : memref<8x128xbf16, #tpu.memory_space<vmem>>, vector<8x128xbf16>,
    return
  }
  func.func @transform_0(%arg0: i32) -> (i32, i32, i32) {
    %c0_i32 = arith.constant 0 : i32
    %c0_i32_0 = arith.constant 0 : i32
    %c0_i32_1 = arith.constant 0 : i32
    return %c0_i32, %c0_i32_0, %arg0 : i32, i32, i32
  }
  func.func @transform_1(%arg0: i32) -> (i32, i32) {
    %c0_i32 = arith.constant 0 : i32
    %c0_i32_0 = arith.constant 0 : i32
    return %c0_i32, %arg0 : i32, i32
  }
}

module attributes {stable_mosaic.version = 11 : i64} {
  func.func @_conv_bn_kernel(%arg0: i32, %arg1: memref<8x72xbf16, #tpu.memory_space<vmem>>, %arg2: memref<72x128xbf16, #tpu.memory_space<vmem>>, %arg3: memref<8x1xf32, #tpu.memory_space<vmem>>, %arg4: memref<8x128xbf16, #tpu.memory_space<vmem>>) attributes {dimension_semantics = [#tpu.dimension_semantics<parallel>], iteration_bounds = array<i64: 1>, scalar_prefetch = 0 : i64, scratch_operands = 0 : i64, tpu.core_type = #tpu.core_type<tc>, window_params = [{pipeline_mode = #tpu.pipeline_mode<synchronous>, transform_indices = @transform_0, window_bounds = array<i64: 8, 72>}, {transform_indices = @transform_1, window_bounds = array<i64: 72, 128>}, {pipeline_mode = #tpu.pipeline_mode<synchronous>, transform_indices = @transform_2, window_bounds = array<i64: 8, 1>}, {transform_indices = @transform_3, window_bounds = array<i64: 8, 128>}]} {
    %c0 = arith.constant 0 : index
    %c0_0 = arith.constant 0 : index
    %0 = vector.load %arg1[%c0, %c0_0] : memref<8x72xbf16, #tpu.memory_space<vmem>>, vector<8x72xbf16>
    %c0_1 = arith.constant 0 : index
    %c0_2 = arith.constant 0 : index
    %1 = vector.load %arg2[%c0_1, %c0_2] : memref<72x128xbf16, #tpu.memory_space<vmem>>, vector<72x128xbf16>
    %cst = arith.constant dense<0.000000e+00> : vector<8x128xf32>
    %2 = tpu.matmul %0, %1, %cst {dimension_numbers = #tpu.dot_dimension_numbers<[1], [0], [0], [1], [0, 0, 1, 1], [], []>} : vector<8x72xbf16>, vector<72x128xbf16>, vector<8x128xf32> -> vector<8x128xf32>
    %c0_3 = arith.constant 0 : index
    %c0_4 = arith.constant 0 : index
    %3 = vector.load %arg3[%c0_3, %c0_4] : memref<8x1xf32, #tpu.memory_space<vmem>>, vector<8x1xf32>
    %4 = vector.broadcast %3 : vector<8x1xf32> to vector<8x128xf32>
    %5 = arith.addf %2, %4 : vector<8x128xf32>
    %cst_5 = arith.constant 0.000000e+00 : f32
    %6 = vector.broadcast %cst_5 : f32 to vector<8x128xf32>
    %7 = arith.maximumf %5, %6 : vector<8x128xf32>
    %8 = arith.truncf %7 : vector<8x128xf32> to vector<8x128xbf16>
    %c0_6 = arith.constant 0 : index
    %c0_7 = arith.constant 0 : index
    %9 = vector.load %arg4[%c0_6, %c0_7] : memref<8x128xbf16, #tpu.memory_space<vmem>>, vector<8x128xbf16>
    tpu.vector_store %arg4[%c0_6, %c0_7], %8 {strides = array<i32>} : memref<8x128xbf16, #tpu.memory_space<vmem>>, vector<8x128xbf16>,
    return
  }
  func.func @transform_0(%arg0: i32) -> (i32, i32) {
    %c0_i32 = arith.constant 0 : i32
    %c0_i32_0 = arith.constant 0 : i32
    %c0_i32_1 = arith.constant 0 : i32
    return %c0_i32, %c0_i32_0 : i32, i32
  }
  func.func @transform_1(%arg0: i32) -> (i32, i32) {
    %c0_i32 = arith.constant 0 : i32
    %c0_i32_0 = arith.constant 0 : i32
    return %c0_i32, %arg0 : i32, i32
  }
  func.func @transform_2(%arg0: i32) -> (i32, i32) {
    %c0_i32 = arith.constant 0 : i32
    %c0_i32_0 = arith.constant 0 : i32
    %c0_i32_1 = arith.constant 0 : i32
    return %c0_i32, %c0_i32_0 : i32, i32
  }
  func.func @transform_3(%arg0: i32) -> (i32, i32) {
    %c0_i32 = arith.constant 0 : i32
    %c0_i32_0 = arith.constant 0 : i32
    return %c0_i32, %arg0 : i32, i32
  }
}

module attributes {stable_mosaic.version = 11 : i64} {
  func.func @_conv_bn_kernel(%arg0: i32, %arg1: memref<8x72xbf16, #tpu.memory_space<vmem>>, %arg2: memref<72x128xbf16, #tpu.memory_space<vmem>>, %arg3: memref<8x1xf32, #tpu.memory_space<vmem>>, %arg4: memref<8x128xbf16, #tpu.memory_space<vmem>>, %arg5: memref<8x128xbf16, #tpu.memory_space<vmem>>) attributes {dimension_semantics = [#tpu.dimension_semantics<parallel>], iteration_bounds = array<i64: 1>, scalar_prefetch = 0 : i64, scratch_operands = 0 : i64, tpu.core_type = #tpu.core_type<tc>, window_params = [{pipeline_mode = #tpu.pipeline_mode<synchronous>, transform_indices = @transform_0, window_bounds = array<i64: 8, 72>}, {transform_indices = @transform_1, window_bounds = array<i64: 72, 128>}, {pipeline_mode = #tpu.pipeline_mode<synchronous>, transform_indices = @transform_2, window_bounds = array<i64: 8, 1>}, {transform_indices = @transform_3, window_bounds = array<i64: 8, 128>}, {transform_indices = @transform_4, window_bounds = array<i64: 8, 128>}]} {
    %c0 = arith.constant 0 : index
    %c0_0 = arith.constant 0 : index
    %0 = vector.load %arg1[%c0, %c0_0] : memref<8x72xbf16, #tpu.memory_space<vmem>>, vector<8x72xbf16>
    %c0_1 = arith.constant 0 : index
    %c0_2 = arith.constant 0 : index
    %1 = vector.load %arg2[%c0_1, %c0_2] : memref<72x128xbf16, #tpu.memory_space<vmem>>, vector<72x128xbf16>
    %cst = arith.constant dense<0.000000e+00> : vector<8x128xf32>
    %2 = tpu.matmul %0, %1, %cst {dimension_numbers = #tpu.dot_dimension_numbers<[1], [0], [0], [1], [0, 0, 1, 1], [], []>} : vector<8x72xbf16>, vector<72x128xbf16>, vector<8x128xf32> -> vector<8x128xf32>
    %c0_3 = arith.constant 0 : index
    %c0_4 = arith.constant 0 : index
    %3 = vector.load %arg3[%c0_3, %c0_4] : memref<8x1xf32, #tpu.memory_space<vmem>>, vector<8x1xf32>
    %4 = vector.broadcast %3 : vector<8x1xf32> to vector<8x128xf32>
    %5 = arith.addf %2, %4 : vector<8x128xf32>
    %c0_5 = arith.constant 0 : index
    %c0_6 = arith.constant 0 : index
    %6 = vector.load %arg4[%c0_5, %c0_6] : memref<8x128xbf16, #tpu.memory_space<vmem>>, vector<8x128xbf16>
    %7 = arith.extf %6 : vector<8x128xbf16> to vector<8x128xf32>
    %8 = arith.addf %5, %7 : vector<8x128xf32>
    %cst_7 = arith.constant 0.000000e+00 : f32
    %9 = vector.broadcast %cst_7 : f32 to vector<8x128xf32>
    %10 = arith.maximumf %8, %9 : vector<8x128xf32>
    %11 = arith.truncf %10 : vector<8x128xf32> to vector<8x128xbf16>
    %c0_8 = arith.constant 0 : index
    %c0_9 = arith.constant 0 : index
    %12 = vector.load %arg5[%c0_8, %c0_9] : memref<8x128xbf16, #tpu.memory_space<vmem>>, vector<8x128xbf16>
    tpu.vector_store %arg5[%c0_8, %c0_9], %11 {strides = array<i32>} : memref<8x128xbf16, #tpu.memory_space<vmem>>, vector<8x128xbf16>,
    return
  }
  func.func @transform_0(%arg0: i32) -> (i32, i32) {
    %c0_i32 = arith.constant 0 : i32
    %c0_i32_0 = arith.constant 0 : i32
    %c0_i32_1 = arith.constant 0 : i32
    return %c0_i32, %c0_i32_0 : i32, i32
  }
  func.func @transform_1(%arg0: i32) -> (i32, i32) {
    %c0_i32 = arith.constant 0 : i32
    %c0_i32_0 = arith.constant 0 : i32
    return %c0_i32, %arg0 : i32, i32
  }
  func.func @transform_2(%arg0: i32) -> (i32, i32) {
    %c0_i32 = arith.constant 0 : i32
    %c0_i32_0 = arith.constant 0 : i32
    %c0_i32_1 = arith.constant 0 : i32
    return %c0_i32, %c0_i32_0 : i32, i32
  }
  func.func @transform_3(%arg0: i32) -> (i32, i32) {
    %c0_i32 = arith.constant 0 : i32
    %c0_i32_0 = arith.constant 0 : i32
    return %c0_i32, %arg0 : i32, i32
  }
  func.func @transform_4(%arg0: i32) -> (i32, i32) {
    %c0_i32 = arith.constant 0 : i32
    %c0_i32_0 = arith.constant 0 : i32
    return %c0_i32, %arg0 : i32, i32
  }
}

module attributes {stable_mosaic.version = 11 : i64} {
  func.func @_conv_bn_kernel(%arg0: i32, %arg1: memref<16x72xbf16, #tpu.memory_space<vmem>>, %arg2: memref<72x128xbf16, #tpu.memory_space<vmem>>, %arg3: memref<16x1xf32, #tpu.memory_space<vmem>>, %arg4: memref<16x128xbf16, #tpu.memory_space<vmem>>) attributes {dimension_semantics = [#tpu.dimension_semantics<parallel>], iteration_bounds = array<i64: 1>, scalar_prefetch = 0 : i64, scratch_operands = 0 : i64, tpu.core_type = #tpu.core_type<tc>, window_params = [{pipeline_mode = #tpu.pipeline_mode<synchronous>, transform_indices = @transform_0, window_bounds = array<i64: 16, 72>}, {transform_indices = @transform_1, window_bounds = array<i64: 72, 128>}, {pipeline_mode = #tpu.pipeline_mode<synchronous>, transform_indices = @transform_2, window_bounds = array<i64: 16, 1>}, {transform_indices = @transform_3, window_bounds = array<i64: 16, 128>}]} {
    %c0 = arith.constant 0 : index
    %c0_0 = arith.constant 0 : index
    %0 = vector.load %arg1[%c0, %c0_0] : memref<16x72xbf16, #tpu.memory_space<vmem>>, vector<16x72xbf16>
    %c0_1 = arith.constant 0 : index
    %c0_2 = arith.constant 0 : index
    %1 = vector.load %arg2[%c0_1, %c0_2] : memref<72x128xbf16, #tpu.memory_space<vmem>>, vector<72x128xbf16>
    %cst = arith.constant dense<0.000000e+00> : vector<16x128xf32>
    %2 = tpu.matmul %0, %1, %cst {dimension_numbers = #tpu.dot_dimension_numbers<[1], [0], [0], [1], [0, 0, 1, 1], [], []>} : vector<16x72xbf16>, vector<72x128xbf16>, vector<16x128xf32> -> vector<16x128xf32>
    %c0_3 = arith.constant 0 : index
    %c0_4 = arith.constant 0 : index
    %3 = vector.load %arg3[%c0_3, %c0_4] : memref<16x1xf32, #tpu.memory_space<vmem>>, vector<16x1xf32>
    %4 = vector.broadcast %3 : vector<16x1xf32> to vector<16x128xf32>
    %5 = arith.addf %2, %4 : vector<16x128xf32>
    %cst_5 = arith.constant 0.000000e+00 : f32
    %6 = vector.broadcast %cst_5 : f32 to vector<16x128xf32>
    %7 = arith.maximumf %5, %6 : vector<16x128xf32>
    %8 = arith.truncf %7 : vector<16x128xf32> to vector<16x128xbf16>
    %c0_6 = arith.constant 0 : index
    %c0_7 = arith.constant 0 : index
    %9 = vector.load %arg4[%c0_6, %c0_7] : memref<16x128xbf16, #tpu.memory_space<vmem>>, vector<16x128xbf16>
    tpu.vector_store %arg4[%c0_6, %c0_7], %8 {strides = array<i32>} : memref<16x128xbf16, #tpu.memory_space<vmem>>, vector<16x128xbf16>,
    return
  }
  func.func @transform_0(%arg0: i32) -> (i32, i32) {
    %c0_i32 = arith.constant 0 : i32
    %c0_i32_0 = arith.constant 0 : i32
    %c0_i32_1 = arith.constant 0 : i32
    return %c0_i32, %c0_i32_0 : i32, i32
  }
  func.func @transform_1(%arg0: i32) -> (i32, i32) {
    %c0_i32 = arith.constant 0 : i32
    %c0_i32_0 = arith.constant 0 : i32
    return %c0_i32, %arg0 : i32, i32
  }
  func.func @transform_2(%arg0: i32) -> (i32, i32) {
    %c0_i32 = arith.constant 0 : i32
    %c0_i32_0 = arith.constant 0 : i32
    %c0_i32_1 = arith.constant 0 : i32
    return %c0_i32, %c0_i32_0 : i32, i32
  }
  func.func @transform_3(%arg0: i32) -> (i32, i32) {
    %c0_i32 = arith.constant 0 : i32
    %c0_i32_0 = arith.constant 0 : i32
    return %c0_i32, %arg0 : i32, i32
  }
}

module attributes {stable_mosaic.version = 11 : i64} {
  func.func @_conv_bn_kernel(%arg0: i32, %arg1: memref<16x8xbf16, #tpu.memory_space<vmem>>, %arg2: memref<8x128xbf16, #tpu.memory_space<vmem>>, %arg3: memref<16x1xf32, #tpu.memory_space<vmem>>, %arg4: memref<16x128xbf16, #tpu.memory_space<vmem>>) attributes {dimension_semantics = [#tpu.dimension_semantics<parallel>], iteration_bounds = array<i64: 1>, scalar_prefetch = 0 : i64, scratch_operands = 0 : i64, tpu.core_type = #tpu.core_type<tc>, window_params = [{pipeline_mode = #tpu.pipeline_mode<synchronous>, transform_indices = @transform_0, window_bounds = array<i64: 16, 8>}, {transform_indices = @transform_1, window_bounds = array<i64: 8, 128>}, {pipeline_mode = #tpu.pipeline_mode<synchronous>, transform_indices = @transform_2, window_bounds = array<i64: 16, 1>}, {transform_indices = @transform_3, window_bounds = array<i64: 16, 128>}]} {
    %c0 = arith.constant 0 : index
    %c0_0 = arith.constant 0 : index
    %0 = vector.load %arg1[%c0, %c0_0] : memref<16x8xbf16, #tpu.memory_space<vmem>>, vector<16x8xbf16>
    %c0_1 = arith.constant 0 : index
    %c0_2 = arith.constant 0 : index
    %1 = vector.load %arg2[%c0_1, %c0_2] : memref<8x128xbf16, #tpu.memory_space<vmem>>, vector<8x128xbf16>
    %cst = arith.constant dense<0.000000e+00> : vector<16x128xf32>
    %2 = tpu.matmul %0, %1, %cst {dimension_numbers = #tpu.dot_dimension_numbers<[1], [0], [0], [1], [0, 0, 1, 1], [], []>} : vector<16x8xbf16>, vector<8x128xbf16>, vector<16x128xf32> -> vector<16x128xf32>
    %c0_3 = arith.constant 0 : index
    %c0_4 = arith.constant 0 : index
    %3 = vector.load %arg3[%c0_3, %c0_4] : memref<16x1xf32, #tpu.memory_space<vmem>>, vector<16x1xf32>
    %4 = vector.broadcast %3 : vector<16x1xf32> to vector<16x128xf32>
    %5 = arith.addf %2, %4 : vector<16x128xf32>
    %6 = arith.truncf %5 : vector<16x128xf32> to vector<16x128xbf16>
    %c0_5 = arith.constant 0 : index
    %c0_6 = arith.constant 0 : index
    %7 = vector.load %arg4[%c0_5, %c0_6] : memref<16x128xbf16, #tpu.memory_space<vmem>>, vector<16x128xbf16>
    tpu.vector_store %arg4[%c0_5, %c0_6], %6 {strides = array<i32>} : memref<16x128xbf16, #tpu.memory_space<vmem>>, vector<16x128xbf16>,
    return
  }
  func.func @transform_0(%arg0: i32) -> (i32, i32) {
    %c0_i32 = arith.constant 0 : i32
    %c0_i32_0 = arith.constant 0 : i32
    %c0_i32_1 = arith.constant 0 : i32
    return %c0_i32, %c0_i32_0 : i32, i32
  }
  func.func @transform_1(%arg0: i32) -> (i32, i32) {
    %c0_i32 = arith.constant 0 : i32
    %c0_i32_0 = arith.constant 0 : i32
    return %c0_i32, %arg0 : i32, i32
  }
  func.func @transform_2(%arg0: i32) -> (i32, i32) {
    %c0_i32 = arith.constant 0 : i32
    %c0_i32_0 = arith.constant 0 : i32
    %c0_i32_1 = arith.constant 0 : i32
    return %c0_i32, %c0_i32_0 : i32, i32
  }
  func.func @transform_3(%arg0: i32) -> (i32, i32) {
    %c0_i32 = arith.constant 0 : i32
    %c0_i32_0 = arith.constant 0 : i32
    return %c0_i32, %arg0 : i32, i32
  }
}

module attributes {stable_mosaic.version = 11 : i64} {
  func.func @_conv_bn_kernel(%arg0: i32, %arg1: memref<16x144xbf16, #tpu.memory_space<vmem>>, %arg2: memref<144x128xbf16, #tpu.memory_space<vmem>>, %arg3: memref<16x1xf32, #tpu.memory_space<vmem>>, %arg4: memref<16x128xbf16, #tpu.memory_space<vmem>>, %arg5: memref<16x128xbf16, #tpu.memory_space<vmem>>) attributes {dimension_semantics = [#tpu.dimension_semantics<parallel>], iteration_bounds = array<i64: 1>, scalar_prefetch = 0 : i64, scratch_operands = 0 : i64, tpu.core_type = #tpu.core_type<tc>, window_params = [{pipeline_mode = #tpu.pipeline_mode<synchronous>, transform_indices = @transform_0, window_bounds = array<i64: 16, 144>}, {transform_indices = @transform_1, window_bounds = array<i64: 144, 128>}, {pipeline_mode = #tpu.pipeline_mode<synchronous>, transform_indices = @transform_2, window_bounds = array<i64: 16, 1>}, {transform_indices = @transform_3, window_bounds = array<i64: 16, 128>}, {transform_indices = @transform_4, window_bounds = array<i64: 16, 128>}]} {
    %c0 = arith.constant 0 : index
    %c0_0 = arith.constant 0 : index
    %0 = vector.load %arg1[%c0, %c0_0] : memref<16x144xbf16, #tpu.memory_space<vmem>>, vector<16x144xbf16>
    %c0_1 = arith.constant 0 : index
    %c0_2 = arith.constant 0 : index
    %1 = vector.load %arg2[%c0_1, %c0_2] : memref<144x128xbf16, #tpu.memory_space<vmem>>, vector<144x128xbf16>
    %cst = arith.constant dense<0.000000e+00> : vector<16x128xf32>
    %2 = tpu.matmul %0, %1, %cst {dimension_numbers = #tpu.dot_dimension_numbers<[1], [0], [0], [1], [0, 0, 1, 1], [], []>} : vector<16x144xbf16>, vector<144x128xbf16>, vector<16x128xf32> -> vector<16x128xf32>
    %c0_3 = arith.constant 0 : index
    %c0_4 = arith.constant 0 : index
    %3 = vector.load %arg3[%c0_3, %c0_4] : memref<16x1xf32, #tpu.memory_space<vmem>>, vector<16x1xf32>
    %4 = vector.broadcast %3 : vector<16x1xf32> to vector<16x128xf32>
    %5 = arith.addf %2, %4 : vector<16x128xf32>
    %c0_5 = arith.constant 0 : index
    %c0_6 = arith.constant 0 : index
    %6 = vector.load %arg4[%c0_5, %c0_6] : memref<16x128xbf16, #tpu.memory_space<vmem>>, vector<16x128xbf16>
    %7 = arith.extf %6 : vector<16x128xbf16> to vector<16x128xf32>
    %8 = arith.addf %5, %7 : vector<16x128xf32>
    %cst_7 = arith.constant 0.000000e+00 : f32
    %9 = vector.broadcast %cst_7 : f32 to vector<16x128xf32>
    %10 = arith.maximumf %8, %9 : vector<16x128xf32>
    %11 = arith.truncf %10 : vector<16x128xf32> to vector<16x128xbf16>
    %c0_8 = arith.constant 0 : index
    %c0_9 = arith.constant 0 : index
    %12 = vector.load %arg5[%c0_8, %c0_9] : memref<16x128xbf16, #tpu.memory_space<vmem>>, vector<16x128xbf16>
    tpu.vector_store %arg5[%c0_8, %c0_9], %11 {strides = array<i32>} : memref<16x128xbf16, #tpu.memory_space<vmem>>, vector<16x128xbf16>,
    return
  }
  func.func @transform_0(%arg0: i32) -> (i32, i32) {
    %c0_i32 = arith.constant 0 : i32
    %c0_i32_0 = arith.constant 0 : i32
    %c0_i32_1 = arith.constant 0 : i32
    return %c0_i32, %c0_i32_0 : i32, i32
  }
  func.func @transform_1(%arg0: i32) -> (i32, i32) {
    %c0_i32 = arith.constant 0 : i32
    %c0_i32_0 = arith.constant 0 : i32
    return %c0_i32, %arg0 : i32, i32
  }
  func.func @transform_2(%arg0: i32) -> (i32, i32) {
    %c0_i32 = arith.constant 0 : i32
    %c0_i32_0 = arith.constant 0 : i32
    %c0_i32_1 = arith.constant 0 : i32
    return %c0_i32, %c0_i32_0 : i32, i32
  }
  func.func @transform_3(%arg0: i32) -> (i32, i32) {
    %c0_i32 = arith.constant 0 : i32
    %c0_i32_0 = arith.constant 0 : i32
    return %c0_i32, %arg0 : i32, i32
  }
  func.func @transform_4(%arg0: i32) -> (i32, i32) {
    %c0_i32 = arith.constant 0 : i32
    %c0_i32_0 = arith.constant 0 : i32
    return %c0_i32, %arg0 : i32, i32
  }
}

module attributes {stable_mosaic.version = 11 : i64} {
  func.func @_conv_bn_kernel(%arg0: i32, %arg1: memref<16x144xbf16, #tpu.memory_space<vmem>>, %arg2: memref<144x128xbf16, #tpu.memory_space<vmem>>, %arg3: memref<16x1xf32, #tpu.memory_space<vmem>>, %arg4: memref<16x128xbf16, #tpu.memory_space<vmem>>) attributes {dimension_semantics = [#tpu.dimension_semantics<parallel>], iteration_bounds = array<i64: 1>, scalar_prefetch = 0 : i64, scratch_operands = 0 : i64, tpu.core_type = #tpu.core_type<tc>, window_params = [{pipeline_mode = #tpu.pipeline_mode<synchronous>, transform_indices = @transform_0, window_bounds = array<i64: 16, 144>}, {transform_indices = @transform_1, window_bounds = array<i64: 144, 128>}, {pipeline_mode = #tpu.pipeline_mode<synchronous>, transform_indices = @transform_2, window_bounds = array<i64: 16, 1>}, {transform_indices = @transform_3, window_bounds = array<i64: 16, 128>}]} {
    %c0 = arith.constant 0 : index
    %c0_0 = arith.constant 0 : index
    %0 = vector.load %arg1[%c0, %c0_0] : memref<16x144xbf16, #tpu.memory_space<vmem>>, vector<16x144xbf16>
    %c0_1 = arith.constant 0 : index
    %c0_2 = arith.constant 0 : index
    %1 = vector.load %arg2[%c0_1, %c0_2] : memref<144x128xbf16, #tpu.memory_space<vmem>>, vector<144x128xbf16>
    %cst = arith.constant dense<0.000000e+00> : vector<16x128xf32>
    %2 = tpu.matmul %0, %1, %cst {dimension_numbers = #tpu.dot_dimension_numbers<[1], [0], [0], [1], [0, 0, 1, 1], [], []>} : vector<16x144xbf16>, vector<144x128xbf16>, vector<16x128xf32> -> vector<16x128xf32>
    %c0_3 = arith.constant 0 : index
    %c0_4 = arith.constant 0 : index
    %3 = vector.load %arg3[%c0_3, %c0_4] : memref<16x1xf32, #tpu.memory_space<vmem>>, vector<16x1xf32>
    %4 = vector.broadcast %3 : vector<16x1xf32> to vector<16x128xf32>
    %5 = arith.addf %2, %4 : vector<16x128xf32>
    %cst_5 = arith.constant 0.000000e+00 : f32
    %6 = vector.broadcast %cst_5 : f32 to vector<16x128xf32>
    %7 = arith.maximumf %5, %6 : vector<16x128xf32>
    %8 = arith.truncf %7 : vector<16x128xf32> to vector<16x128xbf16>
    %c0_6 = arith.constant 0 : index
    %c0_7 = arith.constant 0 : index
    %9 = vector.load %arg4[%c0_6, %c0_7] : memref<16x128xbf16, #tpu.memory_space<vmem>>, vector<16x128xbf16>
    tpu.vector_store %arg4[%c0_6, %c0_7], %8 {strides = array<i32>} : memref<16x128xbf16, #tpu.memory_space<vmem>>, vector<16x128xbf16>,
    return
  }
  func.func @transform_0(%arg0: i32) -> (i32, i32) {
    %c0_i32 = arith.constant 0 : i32
    %c0_i32_0 = arith.constant 0 : i32
    %c0_i32_1 = arith.constant 0 : i32
    return %c0_i32, %c0_i32_0 : i32, i32
  }
  func.func @transform_1(%arg0: i32) -> (i32, i32) {
    %c0_i32 = arith.constant 0 : i32
    %c0_i32_0 = arith.constant 0 : i32
    return %c0_i32, %arg0 : i32, i32
  }
  func.func @transform_2(%arg0: i32) -> (i32, i32) {
    %c0_i32 = arith.constant 0 : i32
    %c0_i32_0 = arith.constant 0 : i32
    %c0_i32_1 = arith.constant 0 : i32
    return %c0_i32, %c0_i32_0 : i32, i32
  }
  func.func @transform_3(%arg0: i32) -> (i32, i32) {
    %c0_i32 = arith.constant 0 : i32
    %c0_i32_0 = arith.constant 0 : i32
    return %c0_i32, %arg0 : i32, i32
  }
}

module attributes {stable_mosaic.version = 11 : i64} {
  func.func @_conv_bn_kernel(%arg0: i32, %arg1: memref<32x144xbf16, #tpu.memory_space<vmem>>, %arg2: memref<144x128xbf16, #tpu.memory_space<vmem>>, %arg3: memref<32x1xf32, #tpu.memory_space<vmem>>, %arg4: memref<32x128xbf16, #tpu.memory_space<vmem>>) attributes {dimension_semantics = [#tpu.dimension_semantics<parallel>], iteration_bounds = array<i64: 1>, scalar_prefetch = 0 : i64, scratch_operands = 0 : i64, tpu.core_type = #tpu.core_type<tc>, window_params = [{pipeline_mode = #tpu.pipeline_mode<synchronous>, transform_indices = @transform_0, window_bounds = array<i64: 32, 144>}, {transform_indices = @transform_1, window_bounds = array<i64: 144, 128>}, {pipeline_mode = #tpu.pipeline_mode<synchronous>, transform_indices = @transform_2, window_bounds = array<i64: 32, 1>}, {transform_indices = @transform_3, window_bounds = array<i64: 32, 128>}]} {
    %c0 = arith.constant 0 : index
    %c0_0 = arith.constant 0 : index
    %0 = vector.load %arg1[%c0, %c0_0] : memref<32x144xbf16, #tpu.memory_space<vmem>>, vector<32x144xbf16>
    %c0_1 = arith.constant 0 : index
    %c0_2 = arith.constant 0 : index
    %1 = vector.load %arg2[%c0_1, %c0_2] : memref<144x128xbf16, #tpu.memory_space<vmem>>, vector<144x128xbf16>
    %cst = arith.constant dense<0.000000e+00> : vector<32x128xf32>
    %2 = tpu.matmul %0, %1, %cst {dimension_numbers = #tpu.dot_dimension_numbers<[1], [0], [0], [1], [0, 0, 1, 1], [], []>} : vector<32x144xbf16>, vector<144x128xbf16>, vector<32x128xf32> -> vector<32x128xf32>
    %c0_3 = arith.constant 0 : index
    %c0_4 = arith.constant 0 : index
    %3 = vector.load %arg3[%c0_3, %c0_4] : memref<32x1xf32, #tpu.memory_space<vmem>>, vector<32x1xf32>
    %4 = vector.broadcast %3 : vector<32x1xf32> to vector<32x128xf32>
    %5 = arith.addf %2, %4 : vector<32x128xf32>
    %cst_5 = arith.constant 0.000000e+00 : f32
    %6 = vector.broadcast %cst_5 : f32 to vector<32x128xf32>
    %7 = arith.maximumf %5, %6 : vector<32x128xf32>
    %8 = arith.truncf %7 : vector<32x128xf32> to vector<32x128xbf16>
    %c0_6 = arith.constant 0 : index
    %c0_7 = arith.constant 0 : index
    %9 = vector.load %arg4[%c0_6, %c0_7] : memref<32x128xbf16, #tpu.memory_space<vmem>>, vector<32x128xbf16>
    tpu.vector_store %arg4[%c0_6, %c0_7], %8 {strides = array<i32>} : memref<32x128xbf16, #tpu.memory_space<vmem>>, vector<32x128xbf16>,
    return
  }
  func.func @transform_0(%arg0: i32) -> (i32, i32) {
    %c0_i32 = arith.constant 0 : i32
    %c0_i32_0 = arith.constant 0 : i32
    %c0_i32_1 = arith.constant 0 : i32
    return %c0_i32, %c0_i32_0 : i32, i32
  }
  func.func @transform_1(%arg0: i32) -> (i32, i32) {
    %c0_i32 = arith.constant 0 : i32
    %c0_i32_0 = arith.constant 0 : i32
    return %c0_i32, %arg0 : i32, i32
  }
  func.func @transform_2(%arg0: i32) -> (i32, i32) {
    %c0_i32 = arith.constant 0 : i32
    %c0_i32_0 = arith.constant 0 : i32
    %c0_i32_1 = arith.constant 0 : i32
    return %c0_i32, %c0_i32_0 : i32, i32
  }
  func.func @transform_3(%arg0: i32) -> (i32, i32) {
    %c0_i32 = arith.constant 0 : i32
    %c0_i32_0 = arith.constant 0 : i32
    return %c0_i32, %arg0 : i32, i32
  }
}

module attributes {stable_mosaic.version = 11 : i64} {
  func.func @_conv_bn_kernel(%arg0: i32, %arg1: memref<32x16xbf16, #tpu.memory_space<vmem>>, %arg2: memref<16x128xbf16, #tpu.memory_space<vmem>>, %arg3: memref<32x1xf32, #tpu.memory_space<vmem>>, %arg4: memref<32x128xbf16, #tpu.memory_space<vmem>>) attributes {dimension_semantics = [#tpu.dimension_semantics<parallel>], iteration_bounds = array<i64: 1>, scalar_prefetch = 0 : i64, scratch_operands = 0 : i64, tpu.core_type = #tpu.core_type<tc>, window_params = [{pipeline_mode = #tpu.pipeline_mode<synchronous>, transform_indices = @transform_0, window_bounds = array<i64: 32, 16>}, {transform_indices = @transform_1, window_bounds = array<i64: 16, 128>}, {pipeline_mode = #tpu.pipeline_mode<synchronous>, transform_indices = @transform_2, window_bounds = array<i64: 32, 1>}, {transform_indices = @transform_3, window_bounds = array<i64: 32, 128>}]} {
    %c0 = arith.constant 0 : index
    %c0_0 = arith.constant 0 : index
    %0 = vector.load %arg1[%c0, %c0_0] : memref<32x16xbf16, #tpu.memory_space<vmem>>, vector<32x16xbf16>
    %c0_1 = arith.constant 0 : index
    %c0_2 = arith.constant 0 : index
    %1 = vector.load %arg2[%c0_1, %c0_2] : memref<16x128xbf16, #tpu.memory_space<vmem>>, vector<16x128xbf16>
    %cst = arith.constant dense<0.000000e+00> : vector<32x128xf32>
    %2 = tpu.matmul %0, %1, %cst {dimension_numbers = #tpu.dot_dimension_numbers<[1], [0], [0], [1], [0, 0, 1, 1], [], []>} : vector<32x16xbf16>, vector<16x128xbf16>, vector<32x128xf32> -> vector<32x128xf32>
    %c0_3 = arith.constant 0 : index
    %c0_4 = arith.constant 0 : index
    %3 = vector.load %arg3[%c0_3, %c0_4] : memref<32x1xf32, #tpu.memory_space<vmem>>, vector<32x1xf32>
    %4 = vector.broadcast %3 : vector<32x1xf32> to vector<32x128xf32>
    %5 = arith.addf %2, %4 : vector<32x128xf32>
    %6 = arith.truncf %5 : vector<32x128xf32> to vector<32x128xbf16>
    %c0_5 = arith.constant 0 : index
    %c0_6 = arith.constant 0 : index
    %7 = vector.load %arg4[%c0_5, %c0_6] : memref<32x128xbf16, #tpu.memory_space<vmem>>, vector<32x128xbf16>
    tpu.vector_store %arg4[%c0_5, %c0_6], %6 {strides = array<i32>} : memref<32x128xbf16, #tpu.memory_space<vmem>>, vector<32x128xbf16>,
    return
  }
  func.func @transform_0(%arg0: i32) -> (i32, i32) {
    %c0_i32 = arith.constant 0 : i32
    %c0_i32_0 = arith.constant 0 : i32
    %c0_i32_1 = arith.constant 0 : i32
    return %c0_i32, %c0_i32_0 : i32, i32
  }
  func.func @transform_1(%arg0: i32) -> (i32, i32) {
    %c0_i32 = arith.constant 0 : i32
    %c0_i32_0 = arith.constant 0 : i32
    return %c0_i32, %arg0 : i32, i32
  }
  func.func @transform_2(%arg0: i32) -> (i32, i32) {
    %c0_i32 = arith.constant 0 : i32
    %c0_i32_0 = arith.constant 0 : i32
    %c0_i32_1 = arith.constant 0 : i32
    return %c0_i32, %c0_i32_0 : i32, i32
  }
  func.func @transform_3(%arg0: i32) -> (i32, i32) {
    %c0_i32 = arith.constant 0 : i32
    %c0_i32_0 = arith.constant 0 : i32
    return %c0_i32, %arg0 : i32, i32
  }
}

module attributes {stable_mosaic.version = 11 : i64} {
  func.func @_conv_bn_kernel(%arg0: i32, %arg1: memref<32x288xbf16, #tpu.memory_space<vmem>>, %arg2: memref<288x128xbf16, #tpu.memory_space<vmem>>, %arg3: memref<32x1xf32, #tpu.memory_space<vmem>>, %arg4: memref<32x128xbf16, #tpu.memory_space<vmem>>, %arg5: memref<32x128xbf16, #tpu.memory_space<vmem>>) attributes {dimension_semantics = [#tpu.dimension_semantics<parallel>], iteration_bounds = array<i64: 1>, scalar_prefetch = 0 : i64, scratch_operands = 0 : i64, tpu.core_type = #tpu.core_type<tc>, window_params = [{pipeline_mode = #tpu.pipeline_mode<synchronous>, transform_indices = @transform_0, window_bounds = array<i64: 32, 288>}, {transform_indices = @transform_1, window_bounds = array<i64: 288, 128>}, {pipeline_mode = #tpu.pipeline_mode<synchronous>, transform_indices = @transform_2, window_bounds = array<i64: 32, 1>}, {transform_indices = @transform_3, window_bounds = array<i64: 32, 128>}, {transform_indices = @transform_4, window_bounds = array<i64: 32, 128>}]} {
    %c0 = arith.constant 0 : index
    %c0_0 = arith.constant 0 : index
    %0 = vector.load %arg1[%c0, %c0_0] : memref<32x288xbf16, #tpu.memory_space<vmem>>, vector<32x288xbf16>
    %c0_1 = arith.constant 0 : index
    %c0_2 = arith.constant 0 : index
    %1 = vector.load %arg2[%c0_1, %c0_2] : memref<288x128xbf16, #tpu.memory_space<vmem>>, vector<288x128xbf16>
    %cst = arith.constant dense<0.000000e+00> : vector<32x128xf32>
    %2 = tpu.matmul %0, %1, %cst {dimension_numbers = #tpu.dot_dimension_numbers<[1], [0], [0], [1], [0, 0, 1, 1], [], []>} : vector<32x288xbf16>, vector<288x128xbf16>, vector<32x128xf32> -> vector<32x128xf32>
    %c0_3 = arith.constant 0 : index
    %c0_4 = arith.constant 0 : index
    %3 = vector.load %arg3[%c0_3, %c0_4] : memref<32x1xf32, #tpu.memory_space<vmem>>, vector<32x1xf32>
    %4 = vector.broadcast %3 : vector<32x1xf32> to vector<32x128xf32>
    %5 = arith.addf %2, %4 : vector<32x128xf32>
    %c0_5 = arith.constant 0 : index
    %c0_6 = arith.constant 0 : index
    %6 = vector.load %arg4[%c0_5, %c0_6] : memref<32x128xbf16, #tpu.memory_space<vmem>>, vector<32x128xbf16>
    %7 = arith.extf %6 : vector<32x128xbf16> to vector<32x128xf32>
    %8 = arith.addf %5, %7 : vector<32x128xf32>
    %cst_7 = arith.constant 0.000000e+00 : f32
    %9 = vector.broadcast %cst_7 : f32 to vector<32x128xf32>
    %10 = arith.maximumf %8, %9 : vector<32x128xf32>
    %11 = arith.truncf %10 : vector<32x128xf32> to vector<32x128xbf16>
    %c0_8 = arith.constant 0 : index
    %c0_9 = arith.constant 0 : index
    %12 = vector.load %arg5[%c0_8, %c0_9] : memref<32x128xbf16, #tpu.memory_space<vmem>>, vector<32x128xbf16>
    tpu.vector_store %arg5[%c0_8, %c0_9], %11 {strides = array<i32>} : memref<32x128xbf16, #tpu.memory_space<vmem>>, vector<32x128xbf16>,
    return
  }
  func.func @transform_0(%arg0: i32) -> (i32, i32) {
    %c0_i32 = arith.constant 0 : i32
    %c0_i32_0 = arith.constant 0 : i32
    %c0_i32_1 = arith.constant 0 : i32
    return %c0_i32, %c0_i32_0 : i32, i32
  }
  func.func @transform_1(%arg0: i32) -> (i32, i32) {
    %c0_i32 = arith.constant 0 : i32
    %c0_i32_0 = arith.constant 0 : i32
    return %c0_i32, %arg0 : i32, i32
  }
  func.func @transform_2(%arg0: i32) -> (i32, i32) {
    %c0_i32 = arith.constant 0 : i32
    %c0_i32_0 = arith.constant 0 : i32
    %c0_i32_1 = arith.constant 0 : i32
    return %c0_i32, %c0_i32_0 : i32, i32
  }
  func.func @transform_3(%arg0: i32) -> (i32, i32) {
    %c0_i32 = arith.constant 0 : i32
    %c0_i32_0 = arith.constant 0 : i32
    return %c0_i32, %arg0 : i32, i32
  }
  func.func @transform_4(%arg0: i32) -> (i32, i32) {
    %c0_i32 = arith.constant 0 : i32
    %c0_i32_0 = arith.constant 0 : i32
    return %c0_i32, %arg0 : i32, i32
  }
}

module attributes {stable_mosaic.version = 11 : i64} {
  func.func @_conv_bn_kernel(%arg0: i32, %arg1: memref<32x288xbf16, #tpu.memory_space<vmem>>, %arg2: memref<288x128xbf16, #tpu.memory_space<vmem>>, %arg3: memref<32x1xf32, #tpu.memory_space<vmem>>, %arg4: memref<32x128xbf16, #tpu.memory_space<vmem>>) attributes {dimension_semantics = [#tpu.dimension_semantics<parallel>], iteration_bounds = array<i64: 1>, scalar_prefetch = 0 : i64, scratch_operands = 0 : i64, tpu.core_type = #tpu.core_type<tc>, window_params = [{pipeline_mode = #tpu.pipeline_mode<synchronous>, transform_indices = @transform_0, window_bounds = array<i64: 32, 288>}, {transform_indices = @transform_1, window_bounds = array<i64: 288, 128>}, {pipeline_mode = #tpu.pipeline_mode<synchronous>, transform_indices = @transform_2, window_bounds = array<i64: 32, 1>}, {transform_indices = @transform_3, window_bounds = array<i64: 32, 128>}]} {
    %c0 = arith.constant 0 : index
    %c0_0 = arith.constant 0 : index
    %0 = vector.load %arg1[%c0, %c0_0] : memref<32x288xbf16, #tpu.memory_space<vmem>>, vector<32x288xbf16>
    %c0_1 = arith.constant 0 : index
    %c0_2 = arith.constant 0 : index
    %1 = vector.load %arg2[%c0_1, %c0_2] : memref<288x128xbf16, #tpu.memory_space<vmem>>, vector<288x128xbf16>
    %cst = arith.constant dense<0.000000e+00> : vector<32x128xf32>
    %2 = tpu.matmul %0, %1, %cst {dimension_numbers = #tpu.dot_dimension_numbers<[1], [0], [0], [1], [0, 0, 1, 1], [], []>} : vector<32x288xbf16>, vector<288x128xbf16>, vector<32x128xf32> -> vector<32x128xf32>
    %c0_3 = arith.constant 0 : index
    %c0_4 = arith.constant 0 : index
    %3 = vector.load %arg3[%c0_3, %c0_4] : memref<32x1xf32, #tpu.memory_space<vmem>>, vector<32x1xf32>
    %4 = vector.broadcast %3 : vector<32x1xf32> to vector<32x128xf32>
    %5 = arith.addf %2, %4 : vector<32x128xf32>
    %cst_5 = arith.constant 0.000000e+00 : f32
    %6 = vector.broadcast %cst_5 : f32 to vector<32x128xf32>
    %7 = arith.maximumf %5, %6 : vector<32x128xf32>
    %8 = arith.truncf %7 : vector<32x128xf32> to vector<32x128xbf16>
    %c0_6 = arith.constant 0 : index
    %c0_7 = arith.constant 0 : index
    %9 = vector.load %arg4[%c0_6, %c0_7] : memref<32x128xbf16, #tpu.memory_space<vmem>>, vector<32x128xbf16>
    tpu.vector_store %arg4[%c0_6, %c0_7], %8 {strides = array<i32>} : memref<32x128xbf16, #tpu.memory_space<vmem>>, vector<32x128xbf16>,
    return
  }
  func.func @transform_0(%arg0: i32) -> (i32, i32) {
    %c0_i32 = arith.constant 0 : i32
    %c0_i32_0 = arith.constant 0 : i32
    %c0_i32_1 = arith.constant 0 : i32
    return %c0_i32, %c0_i32_0 : i32, i32
  }
  func.func @transform_1(%arg0: i32) -> (i32, i32) {
    %c0_i32 = arith.constant 0 : i32
    %c0_i32_0 = arith.constant 0 : i32
    return %c0_i32, %arg0 : i32, i32
  }
  func.func @transform_2(%arg0: i32) -> (i32, i32) {
    %c0_i32 = arith.constant 0 : i32
    %c0_i32_0 = arith.constant 0 : i32
    %c0_i32_1 = arith.constant 0 : i32
    return %c0_i32, %c0_i32_0 : i32, i32
  }
  func.func @transform_3(%arg0: i32) -> (i32, i32) {
    %c0_i32 = arith.constant 0 : i32
    %c0_i32_0 = arith.constant 0 : i32
    return %c0_i32, %arg0 : i32, i32
  }
}

module attributes {stable_mosaic.version = 11 : i64} {
  func.func @_conv_bn_kernel(%arg0: i32, %arg1: memref<64x288xbf16, #tpu.memory_space<vmem>>, %arg2: memref<288x128xbf16, #tpu.memory_space<vmem>>, %arg3: memref<64x1xf32, #tpu.memory_space<vmem>>, %arg4: memref<64x128xbf16, #tpu.memory_space<vmem>>) attributes {dimension_semantics = [#tpu.dimension_semantics<parallel>], iteration_bounds = array<i64: 1>, scalar_prefetch = 0 : i64, scratch_operands = 0 : i64, tpu.core_type = #tpu.core_type<tc>, window_params = [{pipeline_mode = #tpu.pipeline_mode<synchronous>, transform_indices = @transform_0, window_bounds = array<i64: 64, 288>}, {transform_indices = @transform_1, window_bounds = array<i64: 288, 128>}, {pipeline_mode = #tpu.pipeline_mode<synchronous>, transform_indices = @transform_2, window_bounds = array<i64: 64, 1>}, {transform_indices = @transform_3, window_bounds = array<i64: 64, 128>}]} {
    %c0 = arith.constant 0 : index
    %c0_0 = arith.constant 0 : index
    %0 = vector.load %arg1[%c0, %c0_0] : memref<64x288xbf16, #tpu.memory_space<vmem>>, vector<64x288xbf16>
    %c0_1 = arith.constant 0 : index
    %c0_2 = arith.constant 0 : index
    %1 = vector.load %arg2[%c0_1, %c0_2] : memref<288x128xbf16, #tpu.memory_space<vmem>>, vector<288x128xbf16>
    %cst = arith.constant dense<0.000000e+00> : vector<64x128xf32>
    %2 = tpu.matmul %0, %1, %cst {dimension_numbers = #tpu.dot_dimension_numbers<[1], [0], [0], [1], [0, 0, 1, 1], [], []>} : vector<64x288xbf16>, vector<288x128xbf16>, vector<64x128xf32> -> vector<64x128xf32>
    %c0_3 = arith.constant 0 : index
    %c0_4 = arith.constant 0 : index
    %3 = vector.load %arg3[%c0_3, %c0_4] : memref<64x1xf32, #tpu.memory_space<vmem>>, vector<64x1xf32>
    %4 = vector.broadcast %3 : vector<64x1xf32> to vector<64x128xf32>
    %5 = arith.addf %2, %4 : vector<64x128xf32>
    %cst_5 = arith.constant 0.000000e+00 : f32
    %6 = vector.broadcast %cst_5 : f32 to vector<64x128xf32>
    %7 = arith.maximumf %5, %6 : vector<64x128xf32>
    %8 = arith.truncf %7 : vector<64x128xf32> to vector<64x128xbf16>
    %c0_6 = arith.constant 0 : index
    %c0_7 = arith.constant 0 : index
    %9 = vector.load %arg4[%c0_6, %c0_7] : memref<64x128xbf16, #tpu.memory_space<vmem>>, vector<64x128xbf16>
    tpu.vector_store %arg4[%c0_6, %c0_7], %8 {strides = array<i32>} : memref<64x128xbf16, #tpu.memory_space<vmem>>, vector<64x128xbf16>,
    return
  }
  func.func @transform_0(%arg0: i32) -> (i32, i32) {
    %c0_i32 = arith.constant 0 : i32
    %c0_i32_0 = arith.constant 0 : i32
    %c0_i32_1 = arith.constant 0 : i32
    return %c0_i32, %c0_i32_0 : i32, i32
  }
  func.func @transform_1(%arg0: i32) -> (i32, i32) {
    %c0_i32 = arith.constant 0 : i32
    %c0_i32_0 = arith.constant 0 : i32
    return %c0_i32, %arg0 : i32, i32
  }
  func.func @transform_2(%arg0: i32) -> (i32, i32) {
    %c0_i32 = arith.constant 0 : i32
    %c0_i32_0 = arith.constant 0 : i32
    %c0_i32_1 = arith.constant 0 : i32
    return %c0_i32, %c0_i32_0 : i32, i32
  }
  func.func @transform_3(%arg0: i32) -> (i32, i32) {
    %c0_i32 = arith.constant 0 : i32
    %c0_i32_0 = arith.constant 0 : i32
    return %c0_i32, %arg0 : i32, i32
  }
}

module attributes {stable_mosaic.version = 11 : i64} {
  func.func @_conv_bn_kernel(%arg0: i32, %arg1: memref<64x32xbf16, #tpu.memory_space<vmem>>, %arg2: memref<32x128xbf16, #tpu.memory_space<vmem>>, %arg3: memref<64x1xf32, #tpu.memory_space<vmem>>, %arg4: memref<64x128xbf16, #tpu.memory_space<vmem>>) attributes {dimension_semantics = [#tpu.dimension_semantics<parallel>], iteration_bounds = array<i64: 1>, scalar_prefetch = 0 : i64, scratch_operands = 0 : i64, tpu.core_type = #tpu.core_type<tc>, window_params = [{pipeline_mode = #tpu.pipeline_mode<synchronous>, transform_indices = @transform_0, window_bounds = array<i64: 64, 32>}, {transform_indices = @transform_1, window_bounds = array<i64: 32, 128>}, {pipeline_mode = #tpu.pipeline_mode<synchronous>, transform_indices = @transform_2, window_bounds = array<i64: 64, 1>}, {transform_indices = @transform_3, window_bounds = array<i64: 64, 128>}]} {
    %c0 = arith.constant 0 : index
    %c0_0 = arith.constant 0 : index
    %0 = vector.load %arg1[%c0, %c0_0] : memref<64x32xbf16, #tpu.memory_space<vmem>>, vector<64x32xbf16>
    %c0_1 = arith.constant 0 : index
    %c0_2 = arith.constant 0 : index
    %1 = vector.load %arg2[%c0_1, %c0_2] : memref<32x128xbf16, #tpu.memory_space<vmem>>, vector<32x128xbf16>
    %cst = arith.constant dense<0.000000e+00> : vector<64x128xf32>
    %2 = tpu.matmul %0, %1, %cst {dimension_numbers = #tpu.dot_dimension_numbers<[1], [0], [0], [1], [0, 0, 1, 1], [], []>} : vector<64x32xbf16>, vector<32x128xbf16>, vector<64x128xf32> -> vector<64x128xf32>
    %c0_3 = arith.constant 0 : index
    %c0_4 = arith.constant 0 : index
    %3 = vector.load %arg3[%c0_3, %c0_4] : memref<64x1xf32, #tpu.memory_space<vmem>>, vector<64x1xf32>
    %4 = vector.broadcast %3 : vector<64x1xf32> to vector<64x128xf32>
    %5 = arith.addf %2, %4 : vector<64x128xf32>
    %6 = arith.truncf %5 : vector<64x128xf32> to vector<64x128xbf16>
    %c0_5 = arith.constant 0 : index
    %c0_6 = arith.constant 0 : index
    %7 = vector.load %arg4[%c0_5, %c0_6] : memref<64x128xbf16, #tpu.memory_space<vmem>>, vector<64x128xbf16>
    tpu.vector_store %arg4[%c0_5, %c0_6], %6 {strides = array<i32>} : memref<64x128xbf16, #tpu.memory_space<vmem>>, vector<64x128xbf16>,
    return
  }
  func.func @transform_0(%arg0: i32) -> (i32, i32) {
    %c0_i32 = arith.constant 0 : i32
    %c0_i32_0 = arith.constant 0 : i32
    %c0_i32_1 = arith.constant 0 : i32
    return %c0_i32, %c0_i32_0 : i32, i32
  }
  func.func @transform_1(%arg0: i32) -> (i32, i32) {
    %c0_i32 = arith.constant 0 : i32
    %c0_i32_0 = arith.constant 0 : i32
    return %c0_i32, %arg0 : i32, i32
  }
  func.func @transform_2(%arg0: i32) -> (i32, i32) {
    %c0_i32 = arith.constant 0 : i32
    %c0_i32_0 = arith.constant 0 : i32
    %c0_i32_1 = arith.constant 0 : i32
    return %c0_i32, %c0_i32_0 : i32, i32
  }
  func.func @transform_3(%arg0: i32) -> (i32, i32) {
    %c0_i32 = arith.constant 0 : i32
    %c0_i32_0 = arith.constant 0 : i32
    return %c0_i32, %arg0 : i32, i32
  }
}

module attributes {stable_mosaic.version = 11 : i64} {
  func.func @_conv_bn_kernel(%arg0: i32, %arg1: memref<64x576xbf16, #tpu.memory_space<vmem>>, %arg2: memref<576x128xbf16, #tpu.memory_space<vmem>>, %arg3: memref<64x1xf32, #tpu.memory_space<vmem>>, %arg4: memref<64x128xbf16, #tpu.memory_space<vmem>>, %arg5: memref<64x128xbf16, #tpu.memory_space<vmem>>) attributes {dimension_semantics = [#tpu.dimension_semantics<parallel>], iteration_bounds = array<i64: 1>, scalar_prefetch = 0 : i64, scratch_operands = 0 : i64, tpu.core_type = #tpu.core_type<tc>, window_params = [{pipeline_mode = #tpu.pipeline_mode<synchronous>, transform_indices = @transform_0, window_bounds = array<i64: 64, 576>}, {transform_indices = @transform_1, window_bounds = array<i64: 576, 128>}, {pipeline_mode = #tpu.pipeline_mode<synchronous>, transform_indices = @transform_2, window_bounds = array<i64: 64, 1>}, {transform_indices = @transform_3, window_bounds = array<i64: 64, 128>}, {transform_indices = @transform_4, window_bounds = array<i64: 64, 128>}]} {
    %c0 = arith.constant 0 : index
    %c0_0 = arith.constant 0 : index
    %0 = vector.load %arg1[%c0, %c0_0] : memref<64x576xbf16, #tpu.memory_space<vmem>>, vector<64x576xbf16>
    %c0_1 = arith.constant 0 : index
    %c0_2 = arith.constant 0 : index
    %1 = vector.load %arg2[%c0_1, %c0_2] : memref<576x128xbf16, #tpu.memory_space<vmem>>, vector<576x128xbf16>
    %cst = arith.constant dense<0.000000e+00> : vector<64x128xf32>
    %2 = tpu.matmul %0, %1, %cst {dimension_numbers = #tpu.dot_dimension_numbers<[1], [0], [0], [1], [0, 0, 1, 1], [], []>} : vector<64x576xbf16>, vector<576x128xbf16>, vector<64x128xf32> -> vector<64x128xf32>
    %c0_3 = arith.constant 0 : index
    %c0_4 = arith.constant 0 : index
    %3 = vector.load %arg3[%c0_3, %c0_4] : memref<64x1xf32, #tpu.memory_space<vmem>>, vector<64x1xf32>
    %4 = vector.broadcast %3 : vector<64x1xf32> to vector<64x128xf32>
    %5 = arith.addf %2, %4 : vector<64x128xf32>
    %c0_5 = arith.constant 0 : index
    %c0_6 = arith.constant 0 : index
    %6 = vector.load %arg4[%c0_5, %c0_6] : memref<64x128xbf16, #tpu.memory_space<vmem>>, vector<64x128xbf16>
    %7 = arith.extf %6 : vector<64x128xbf16> to vector<64x128xf32>
    %8 = arith.addf %5, %7 : vector<64x128xf32>
    %cst_7 = arith.constant 0.000000e+00 : f32
    %9 = vector.broadcast %cst_7 : f32 to vector<64x128xf32>
    %10 = arith.maximumf %8, %9 : vector<64x128xf32>
    %11 = arith.truncf %10 : vector<64x128xf32> to vector<64x128xbf16>
    %c0_8 = arith.constant 0 : index
    %c0_9 = arith.constant 0 : index
    %12 = vector.load %arg5[%c0_8, %c0_9] : memref<64x128xbf16, #tpu.memory_space<vmem>>, vector<64x128xbf16>
    tpu.vector_store %arg5[%c0_8, %c0_9], %11 {strides = array<i32>} : memref<64x128xbf16, #tpu.memory_space<vmem>>, vector<64x128xbf16>,
    return
  }
  func.func @transform_0(%arg0: i32) -> (i32, i32) {
    %c0_i32 = arith.constant 0 : i32
    %c0_i32_0 = arith.constant 0 : i32
    %c0_i32_1 = arith.constant 0 : i32
    return %c0_i32, %c0_i32_0 : i32, i32
  }
  func.func @transform_1(%arg0: i32) -> (i32, i32) {
    %c0_i32 = arith.constant 0 : i32
    %c0_i32_0 = arith.constant 0 : i32
    return %c0_i32, %arg0 : i32, i32
  }
  func.func @transform_2(%arg0: i32) -> (i32, i32) {
    %c0_i32 = arith.constant 0 : i32
    %c0_i32_0 = arith.constant 0 : i32
    %c0_i32_1 = arith.constant 0 : i32
    return %c0_i32, %c0_i32_0 : i32, i32
  }
  func.func @transform_3(%arg0: i32) -> (i32, i32) {
    %c0_i32 = arith.constant 0 : i32
    %c0_i32_0 = arith.constant 0 : i32
    return %c0_i32, %arg0 : i32, i32
  }
  func.func @transform_4(%arg0: i32) -> (i32, i32) {
    %c0_i32 = arith.constant 0 : i32
    %c0_i32_0 = arith.constant 0 : i32
    return %c0_i32, %arg0 : i32, i32
  }
}

module attributes {stable_mosaic.version = 11 : i64} {
  func.func @_conv_bn_kernel(%arg0: i32, %arg1: memref<64x576xbf16, #tpu.memory_space<vmem>>, %arg2: memref<576x128xbf16, #tpu.memory_space<vmem>>, %arg3: memref<64x1xf32, #tpu.memory_space<vmem>>, %arg4: memref<64x128xbf16, #tpu.memory_space<vmem>>) attributes {dimension_semantics = [#tpu.dimension_semantics<parallel>], iteration_bounds = array<i64: 1>, scalar_prefetch = 0 : i64, scratch_operands = 0 : i64, tpu.core_type = #tpu.core_type<tc>, window_params = [{pipeline_mode = #tpu.pipeline_mode<synchronous>, transform_indices = @transform_0, window_bounds = array<i64: 64, 576>}, {transform_indices = @transform_1, window_bounds = array<i64: 576, 128>}, {pipeline_mode = #tpu.pipeline_mode<synchronous>, transform_indices = @transform_2, window_bounds = array<i64: 64, 1>}, {transform_indices = @transform_3, window_bounds = array<i64: 64, 128>}]} {
    %c0 = arith.constant 0 : index
    %c0_0 = arith.constant 0 : index
    %0 = vector.load %arg1[%c0, %c0_0] : memref<64x576xbf16, #tpu.memory_space<vmem>>, vector<64x576xbf16>
    %c0_1 = arith.constant 0 : index
    %c0_2 = arith.constant 0 : index
    %1 = vector.load %arg2[%c0_1, %c0_2] : memref<576x128xbf16, #tpu.memory_space<vmem>>, vector<576x128xbf16>
    %cst = arith.constant dense<0.000000e+00> : vector<64x128xf32>
    %2 = tpu.matmul %0, %1, %cst {dimension_numbers = #tpu.dot_dimension_numbers<[1], [0], [0], [1], [0, 0, 1, 1], [], []>} : vector<64x576xbf16>, vector<576x128xbf16>, vector<64x128xf32> -> vector<64x128xf32>
    %c0_3 = arith.constant 0 : index
    %c0_4 = arith.constant 0 : index
    %3 = vector.load %arg3[%c0_3, %c0_4] : memref<64x1xf32, #tpu.memory_space<vmem>>, vector<64x1xf32>
    %4 = vector.broadcast %3 : vector<64x1xf32> to vector<64x128xf32>
    %5 = arith.addf %2, %4 : vector<64x128xf32>
    %cst_5 = arith.constant 0.000000e+00 : f32
    %6 = vector.broadcast %cst_5 : f32 to vector<64x128xf32>
    %7 = arith.maximumf %5, %6 : vector<64x128xf32>
    %8 = arith.truncf %7 : vector<64x128xf32> to vector<64x128xbf16>
    %c0_6 = arith.constant 0 : index
    %c0_7 = arith.constant 0 : index
    %9 = vector.load %arg4[%c0_6, %c0_7] : memref<64x128xbf16, #tpu.memory_space<vmem>>, vector<64x128xbf16>
    tpu.vector_store %arg4[%c0_6, %c0_7], %8 {strides = array<i32>} : memref<64x128xbf16, #tpu.memory_space<vmem>>, vector<64x128xbf16>,
    return
  }
  func.func @transform_0(%arg0: i32) -> (i32, i32) {
    %c0_i32 = arith.constant 0 : i32
    %c0_i32_0 = arith.constant 0 : i32
    %c0_i32_1 = arith.constant 0 : i32
    return %c0_i32, %c0_i32_0 : i32, i32
  }
  func.func @transform_1(%arg0: i32) -> (i32, i32) {
    %c0_i32 = arith.constant 0 : i32
    %c0_i32_0 = arith.constant 0 : i32
    return %c0_i32, %arg0 : i32, i32
  }
  func.func @transform_2(%arg0: i32) -> (i32, i32) {
    %c0_i32 = arith.constant 0 : i32
    %c0_i32_0 = arith.constant 0 : i32
    %c0_i32_1 = arith.constant 0 : i32
    return %c0_i32, %c0_i32_0 : i32, i32
  }
  func.func @transform_3(%arg0: i32) -> (i32, i32) {
    %c0_i32 = arith.constant 0 : i32
    %c0_i32_0 = arith.constant 0 : i32
    return %c0_i32, %arg0 : i32, i32
  }
}

module attributes {stable_mosaic.version = 11 : i64} {
  func.func @_avgpool_kernel(%arg0: i32, %arg1: memref<64x2x1xbf16, #tpu.memory_space<vmem>>, %arg2: memref<64x2xf32, #tpu.memory_space<vmem>>) attributes {dimension_semantics = [#tpu.dimension_semantics<arbitrary>], iteration_bounds = array<i64: 1>, scalar_prefetch = 0 : i64, scratch_operands = 0 : i64, tpu.core_type = #tpu.core_type<tc>, window_params = [{pipeline_mode = #tpu.pipeline_mode<synchronous>, transform_indices = @transform_0, window_bounds = array<i64: 64, 2, 1>}, {pipeline_mode = #tpu.pipeline_mode<synchronous>, transform_indices = @transform_1, window_bounds = array<i64: 64, 2>}]} {
    %c0 = arith.constant 0 : index
    %c0_0 = arith.constant 0 : index
    %c0_1 = arith.constant 0 : index
    %0 = vector.load %arg1[%c0, %c0_0, %c0_1] : memref<64x2x1xbf16, #tpu.memory_space<vmem>>, vector<64x2x1xbf16>
    %1 = arith.extf %0 : vector<64x2x1xbf16> to vector<64x2x1xf32>
    %cst = arith.constant dense<0.000000e+00> : vector<64x2xf32>
    %2 = vector.multi_reduction <add>, %1, %cst [2] : vector<64x2x1xf32> to vector<64x2xf32>
    %cst_2 = arith.constant 1.000000e+00 : f32
    %3 = vector.broadcast %cst_2 : f32 to vector<64x2xf32>
    %4 = arith.divf %2, %3 : vector<64x2xf32>
    %c0_3 = arith.constant 0 : index
    %c0_4 = arith.constant 0 : index
    %5 = vector.load %arg2[%c0_3, %c0_4] : memref<64x2xf32, #tpu.memory_space<vmem>>, vector<64x2xf32>
    tpu.vector_store %arg2[%c0_3, %c0_4], %4 {strides = array<i32>} : memref<64x2xf32, #tpu.memory_space<vmem>>, vector<64x2xf32>,
    return
  }
  func.func @transform_0(%arg0: i32) -> (i32, i32, i32) {
    %c0_i32 = arith.constant 0 : i32
    %c0_i32_0 = arith.constant 0 : i32
    %c0_i32_1 = arith.constant 0 : i32
    %c0_i32_2 = arith.constant 0 : i32
    return %c0_i32, %c0_i32_0, %c0_i32_1 : i32, i32, i32
  }
  func.func @transform_1(%arg0: i32) -> (i32, i32) {
    %c0_i32 = arith.constant 0 : i32
    %c0_i32_0 = arith.constant 0 : i32
    %c0_i32_1 = arith.constant 0 : i32
    return %c0_i32, %c0_i32_0 : i32, i32
  }
}

</mosaic_0001>

<bundles_post_ra>
// kernel: forward.22
= control target key start
LH: loop header
LB: loop body
LE: loop exit
PB: predicated region body
PF: predicated region fallthrough
CT: control target
= control target key end

     0   :  { %v495_v2 = vmov 0   ;;  %vm260_vm0 = vcmask 1040384   ;;  %vm261_vm1 = vcmask 1041408   ;;  %v496_v29 = vmov 65535   ;;  %s644_s1 = inlined_call_operand.vmem [shape: bf16[147,512], index: 1, kind: input, shape index: {}]   ;;  %s645_s0 = inlined_call_operand.vmem [shape: bf16[8,147], index: 0, kind: input, shape index: {}]   ;;  %s646_s2 = inlined_call_operand.vmem [shape: f32[8,1], index: 2, kind: input, shape index: {}]   ;;  %s647_s3 = inlined_call_operand.vmem [shape: bf16[8,512], index: 3, kind: output, shape index: {}]  }
   0x1   :  { %v435_v0 = vld [vmem:[%s644_s1 + $0xe4] ss:$16 sps:$4 sm:$0xff]   ;;  %v437_v1 = vld [vmem:[%s644_s1 + $0xec] ss:$16 sps:$4 sm:$0xff]   ;;  %434 = vset.pattern.permute.xlu0 %v495_v2  ;;  %v439_v3 = vld [vmem:[%s644_s1 + $0xe0] ss:$16 sps:$4 sm:$0xff]  }
   0x2   :  { %276 = vmatprep.subr.bf16.mxu0 %v435_v0  ;;  %v440_v4 = vld [vmem:[%s644_s1 + $0xe8] ss:$16 sps:$4 sm:$0xff]   ;;  %317 = vmatprep.subr.bf16.mxu1 %v437_v1  ;;  %v441_v5 = vld [vmem:[%s644_s1 + $0xc4] ss:$16 sps:$4 sm:$0xff]   ;;  %v443_v6 = vld [vmem:[%s644_s1 + $0xcc] ss:$16 sps:$4 sm:$0xff]  }
   0x3   :  { %277 = vmatpush1.bf16.msra.mxu0 %v439_v3  ;;  %318 = vmatpush1.bf16.msra.mxu1 %v440_v4  ;;  %v445_v7 = vld [vmem:[%s644_s1 + $0xc0] ss:$16 sps:$4 sm:$0xff]   ;;  %v446_v8 = vld [vmem:[%s644_s1 + $0xc8] ss:$16 sps:$4 sm:$0xff]   ;;  %v447_v9 = vld [vmem:[%s644_s1 + $0xa4] ss:$16 sps:$4 sm:$0xff]  }
   0x4   :  { %278 = vmatprep.subr.bf16.mxu0 %v441_v5  ;;  %319 = vmatprep.subr.bf16.mxu1 %v443_v6  ;;  %v449_v10 = vld [vmem:[%s644_s1 + $0xac] ss:$16 sps:$4 sm:$0xff]   ;;  %v451_v11 = vld [vmem:[%s644_s1 + $0xa0] ss:$16 sps:$4 sm:$0xff]   ;;  %v452_v12 = vld [vmem:[%s644_s1 + $0xa8] ss:$16 sps:$4 sm:$0xff]  }
   0x5   :  { %v453_v13 = vld [vmem:[%s644_s1 + $0x84] ss:$16 sps:$4 sm:$0xff]   ;;  %v455_v14 = vld [vmem:[%s644_s1 + $0x8c] ss:$16 sps:$4 sm:$0xff]   ;;  %v457_v15 = vld [vmem:[%s644_s1 + $0x80] ss:$16 sps:$4 sm:$0xff]  }
   0x6   :  { %v458_v16 = vld [vmem:[%s644_s1 + $0x88] ss:$16 sps:$4 sm:$0xff]   ;;  %v459_v17 = vld [vmem:[%s644_s1 + $0x64] ss:$16 sps:$4 sm:$0xff]   ;;  %v461_v18 = vld [vmem:[%s644_s1 + $0x6c] ss:$16 sps:$4 sm:$0xff]  }
   0x7   :  { %279 = vmatpush1.bf16.msra.mxu0 %v445_v7  ;;  %320 = vmatpush1.bf16.msra.mxu1 %v446_v8  ;;  %v463_v19 = vld [vmem:[%s644_s1 + $0x60] ss:$16 sps:$4 sm:$0xff]   ;;  %v464_v20 = vld [vmem:[%s644_s1 + $0x68] ss:$16 sps:$4 sm:$0xff]   ;;  %v465_v21 = vld [vmem:[%s644_s1 + $0x44] ss:$16 sps:$4 sm:$0xff]  }
   0x8   :  { %280 = vmatprep.subr.bf16.mxu0 %v447_v9  ;;  %321 = vmatprep.subr.bf16.mxu1 %v449_v10  ;;  %v467_v22 = vld [vmem:[%s644_s1 + $0x4c] ss:$16 sps:$4 sm:$0xff]   ;;  %v469_v23 = vld [vmem:[%s644_s1 + $0x40] ss:$16 sps:$4 sm:$0xff]   ;;  %v470_v24 = vld [vmem:[%s644_s1 + $0x48] ss:$16 sps:$4 sm:$0xff]  }
   0x9   :  { %v471_v25 = vld [vmem:[%s644_s1 + $0x24] ss:$16 sps:$4 sm:$0xff]   ;;  %v473_v26 = vld [vmem:[%s644_s1 + $0x2c] ss:$16 sps:$4 sm:$0xff]   ;;  %v262_v30 = vsel %vm260_vm0, 4294967295, %v496_v29  ;;  %vm256_vm2 = vcmask 154624  }
   0xa   :  { %v52_v27 = vld [vmem:[%s644_s1 + $0x120] sm:$0x33]  ;;  %v53_v28 = vld [vmem:[%s644_s1 + $0x128] sm:$0x33]  ;;  %v263_v40 = vsel %vm261_vm1, %v262_v30, 0 }
   0xb   :  { %281 = vmatpush1.bf16.msra.mxu0 %v451_v11  ;;  %322 = vmatpush1.bf16.msra.mxu1 %v452_v12  ;;  %v475_v31 = vld [vmem:[%s644_s1 + $0x20] ss:$16 sps:$4 sm:$0xff]   ;;  %v476_v32 = vld [vmem:[%s644_s1 + $0x28] ss:$16 sps:$4 sm:$0xff]   ;;  %v477_v34 = vld [vmem:[%s644_s1 + $0x4] ss:$16 sps:$4 sm:$0xff]   ;;  %v423_v36 = vcombine.high %v52_v27, %v52_v27  ;;  %v425_v37 = vcombine.high %v53_v28, %v53_v28  ;;  %v422_v43 = vcombine.low %v52_v27, %v52_v27 }
   0xc   :  { %282 = vmatprep.subr.bf16.mxu0 %v453_v13  ;;  %323 = vmatprep.subr.bf16.mxu1 %v455_v14  ;;  %v15_v33 = vld [vmem:[%s645_s0] sm:$0xff]  ;;  %v479_v35 = vld [vmem:[%s644_s1 + $0xc] ss:$16 sps:$4 sm:$0xff]   ;;  %v482_v42 = vld [vmem:[%s644_s1 + $0x8] ss:$16 sps:$4 sm:$0xff]   ;;  %v424_v44 = vcombine.low %v53_v28, %v53_v28 }
   0xd   :  { %v385_v38 = vcombine.high %v15_v33, %v15_v33  ;;  %v54_v39 = vld [vmem:[%s646_s2] sm:$0xff]  ;;  %v268_v45 = vand.u32 %v423_v36, %v263_v40  ;;  %v274_v46 = vand.u32 %v425_v37, %v263_v40  ;;  %v265_v47 = vand.u32 %v422_v43, %v263_v40  ;;  %v489_v50 = vld [vmem:[%s644_s1 + $0x10c] ss:$16 sps:$4 sm:$0xff]   ;;  %v492_v52 = vld [vmem:[%s644_s1 + $0x108] ss:$16 sps:$4 sm:$0xff]  }
   0xe   :  { %57 = vperm.xlu0 %434, %v54_v39   ;;  %v481_v41 = vld [vmem:[%s644_s1] ss:$16 sps:$4 sm:$0xff]   ;;  %v271_v48 = vand.u32 %v424_v44, %v263_v40  ;;  %v487_v49 = vld [vmem:[%s644_s1 + $0x104] ss:$16 sps:$4 sm:$0xff]   ;;  %v384_v53 = vcombine.low %v15_v33, %v15_v33 }
   0xf   :  { %283 = vmatpush1.bf16.msra.mxu0 %v457_v15  ;;  %324 = vmatpush1.bf16.msra.mxu1 %v458_v16  ;;  %v491_v51 = vld [vmem:[%s644_s1 + $0x100] ss:$16 sps:$4 sm:$0xff]  }
  0x10   :  { %284 = vmatprep.subr.bf16.mxu0 %v459_v17  ;;  %325 = vmatprep.subr.bf16.mxu1 %v461_v18 }
  0x11   :  { %426 = vmatprep.mubr.msk.bf16.mxu0 %vm256_vm2, %v385_v38  ;;  %427 = vmatprep.mubr.msk.bf16.mxu1 %vm256_vm2, %v385_v38 }
  0x13   :  { %285 = vmatpush1.bf16.msra.mxu0 %v463_v19  ;;  %326 = vmatpush1.bf16.msra.mxu1 %v464_v20 }
  0x14   :  { %286 = vmatprep.subr.bf16.mxu0 %v465_v21  ;;  %327 = vmatprep.subr.bf16.mxu1 %v467_v22 }
  0x17   :  { %287 = vmatpush1.bf16.msra.mxu0 %v469_v23  ;;  %328 = vmatpush1.bf16.msra.mxu1 %v470_v24 }
  0x18   :  { %288 = vmatprep.subr.bf16.mxu0 %v471_v25  ;;  %329 = vmatprep.subr.bf16.mxu1 %v473_v26 }
  0x1b   :  { %289 = vmatpush1.bf16.msra.mxu0 %v475_v31  ;;  %330 = vmatpush1.bf16.msra.mxu1 %v476_v32 }
  0x1c   :  { %290 = vmatprep.subr.bf16.mxu0 %v477_v34  ;;  %331 = vmatprep.subr.bf16.mxu1 %v479_v35 }
  0x1f   :  { %291 = vmatpush1.bf16.msra.mxu0 %v481_v41  ;;  %332 = vmatpush1.bf16.msra.mxu1 %v482_v42 }
  0x20   :  { %304 = vmatprep.subr.bf16.mxu0 %v268_v45  ;;  %345 = vmatprep.subr.bf16.mxu1 %v274_v46 }
  0x23   :  { %305 = vmatpush2.bf16.msra.mxu0 %v265_v47  ;;  %346 = vmatpush2.bf16.msra.mxu1 %v271_v48 }
  0x24   :  { %306 = vmatprep.subr.bf16.mxu0 %v487_v49  ;;  %347 = vmatprep.subr.bf16.mxu1 %v489_v50 }
  0x27   :  { %307 = vmatpush2.bf16.msra.mxu0 %v491_v51  ;;  %348 = vmatpush2.bf16.msra.mxu1 %v492_v52 }
  0x2a   :  { %309 = vmatmul.mubr.bf16.vlgmr.msra.gmra.mxu0 %v384_v53  ;;  %350 = vmatmul.mubr.bf16.vlgmr.msra.gmra.mxu1 %v384_v53 }
  0x89   :  { %v58_v54 = vpop.permute.xlu0 %57 }
  0xea   :  { %v310_v55 = vpop.f32.mrf.mxu0  ;;  %v351_v56 = vpop.f32.mrf.mxu1 }
  0xeb   :  { %v311_v57 = vadd.f32 %v310_v55, %v58_v54  ;;  %v352_v58 = vadd.f32 %v351_v56, %v58_v54 }
  0xec   :  { %v312_v59 = vpop.f32.mrf.mxu0  ;;  %v353_v60 = vpop.f32.mrf.mxu1 }
  0xed   :  { %v313_v61 = vadd.f32 %v312_v59, %v58_v54  ;;  %v354_v62 = vadd.f32 %v353_v60, %v58_v54  ;;  %v358_v1 = vmax.f32 %v311_v57, 0.0  ;;  %v360_v2 = vmax.f32 %v352_v58, 0.0 }
  0xee   :  { %v314_v63 = vpop.f32.mrf.mxu0  ;;  %v355_v0 = vpop.f32.mrf.mxu1 }
  0xef   :  { %v359_v3 = vmax.f32 %v313_v61, 0.0  ;;  %v361_v4 = vmax.f32 %v354_v62, 0.0 }
  0xf0   :  { %v315_v5 = vpop.f32.mrf.mxu0  ;;  %v356_v6 = vpop.f32.mrf.mxu1 }
  0xf1   :  { %v430_v7 = vpack.c.bf16 %v359_v3, %v358_v1  ;;  %v431_v8 = vpack.c.bf16 %v361_v4, %v360_v2 }
  0xf3   :  { %378 = vst [vmem:[%s647_s3] sm:$0xff] %v430_v7  ;;  %379 = vst [vmem:[%s647_s3 + $0x8] sm:$0xff] %v431_v8 }

// kernel: forward.23
= control target key start
LH: loop header
LB: loop body
LE: loop exit
PB: predicated region body
PF: predicated region fallthrough
CT: control target
= control target key end

     0   :  { %vm18_vm0 = vcmask 1043456   ;;  %s109_s0 = inlined_call_operand.vmem [shape: bf16[9,8,128], index: 0, kind: input, shape index: {}]   ;;  %s110_s1 = inlined_call_operand.vmem [shape: bf16[8,128], index: 1, kind: output, shape index: {}]  }
   0x1   :  { %v9_v0 = vld [vmem:[%s109_s0] sm:$0xf]  ;;  %v10_v1 = vld [vmem:[%s109_s0 + $0x4] sm:$0xf]  ;;  %v11_v2 = vld [vmem:[%s109_s0 + $0x8] sm:$0xf] }
   0x2   :  { %v12_v3 = vld [vmem:[%s109_s0 + $0xc] sm:$0xf]  ;;  %v13_v4 = vld [vmem:[%s109_s0 + $0x10] sm:$0xf]  ;;  %v14_v5 = vld [vmem:[%s109_s0 + $0x14] sm:$0xf] }
   0x3   :  { %v15_v6 = vld [vmem:[%s109_s0 + $0x18] sm:$0xf]  ;;  %v16_v7 = vld [vmem:[%s109_s0 + $0x1c] sm:$0xf]  ;;  %v17_v8 = vld [vmem:[%s109_s0 + $0x20] sm:$0xf] }
   0x4   :  { %v21_v9 = vsel %vm18_vm0, %v9_v0, 4286644096  ;;  %v24_v10 = vsel %vm18_vm0, %v10_v1, 4286644096  ;;  %v27_v11 = vsel %vm18_vm0, %v11_v2, 4286644096 }
   0x5   :  { %v30_v12 = vsel %vm18_vm0, %v12_v3, 4286644096  ;;  %v33_v13 = vsel %vm18_vm0, %v13_v4, 4286644096  ;;  %v37_v14 = vsel %vm18_vm0, %v14_v5, 4286644096 }
   0x6   :  { %v35_v15 = vmax.bf16 %v33_v13, %v21_v9  ;;  %v39_v16 = vmax.bf16 %v37_v14, %v24_v10  ;;  %v41_v17 = vsel %vm18_vm0, %v15_v6, 4286644096  ;;  %v45_v18 = vsel %vm18_vm0, %v16_v7, 4286644096 }
   0x7   :  { %v43_v19 = vmax.bf16 %v41_v17, %v27_v11  ;;  %v47_v20 = vmax.bf16 %v45_v18, %v30_v12  ;;  %v49_v21 = vsel %vm18_vm0, %v17_v8, 4286644096 }
   0x8   :  { %v51_v22 = vmax.bf16 %v49_v21, %v35_v15 }
   0x9   :  { %v53_v23 = vmax.bf16 %v47_v20, %v43_v19 }
   0xa   :  { %v52_v24 = vmax.bf16 %v51_v22, %v39_v16 }
   0xc   :  { %v54_v25 = vmax.bf16 %v53_v23, %v52_v24 }
   0xe   :  { %55 = vst [vmem:[%s110_s1] sm:$0xf] %v54_v25 }

// kernel: forward.24
= control target key start
LH: loop header
LB: loop body
LE: loop exit
PB: predicated region body
PF: predicated region fallthrough
CT: control target
= control target key end

     0   :  { %vm62_vm0 = vcmask 1043456   ;;  %v148_v0 = vmov 0.0   ;;  %vm149_vm1 = vmmov 0   ;;  %v150_v3 = vmov 0   ;;  %s195_s1 = inlined_call_operand.vmem [shape: bf16[72,128], index: 1, kind: input, shape index: {}]   ;;  %s196_s2 = inlined_call_operand.vmem [shape: f32[8,1], index: 2, kind: input, shape index: {}]   ;;  %s197_s0 = inlined_call_operand.vmem [shape: bf16[8,72], index: 0, kind: input, shape index: {}]   ;;  %s198_s3 = inlined_call_operand.vmem [shape: bf16[8,128], index: 3, kind: output, shape index: {}]  }
   0x1   :  { %125 = vmatprep.subr.bf16.mxu0 %v148_v0  ;;  %v143_v1 = vld [vmem:[%s195_s1 + $0x20] ss:$0 sps:$4 sm:$0xff]   ;;  %135 = vmatprep.mubr.msk.bf16.mxu0 %vm149_vm1, %v148_v0  ;;  %v144_v4 = vld [vmem:[%s195_s1 + $0x18] sm:$0xff]   ;;  %v145_v6 = vld [vmem:[%s195_s1 + $0x10] sm:$0xff]   ;;  %vm58_vm2 = vcmask 588800  }
   0x2   :  { %v64_v2 = vsel %vm62_vm0, %v143_v1, 0  ;;  %142 = vset.pattern.permute.xlu0 %v150_v3  ;;  %v25_v5 = vld [vmem:[%s196_s2] sm:$0xff]  ;;  %v146_v7 = vld [vmem:[%s195_s1 + $0x8] sm:$0xff]  }
   0x3   :  { %126 = vmatpush3.bf16.msra.mxu0 %v64_v2  ;;  %28 = vperm.xlu0 %142, %v25_v5   ;;  %v147_v8 = vld [vmem:[%s195_s1] sm:$0xff]  }
   0x4   :  { %127 = vmatprep.subr.bf16.mxu0 %v148_v0  ;;  %v15_v9 = vld [vmem:[%s197_s0] sm:$0xf] }
   0x7   :  { %128 = vmatpush3.bf16.msra.mxu0 %v144_v4 }
   0x8   :  { %129 = vmatprep.subr.bf16.mxu0 %v148_v0 }
   0xb   :  { %130 = vmatpush3.bf16.msra.mxu0 %v145_v6 }
   0xc   :  { %131 = vmatprep.subr.bf16.mxu0 %v148_v0 }
   0xf   :  { %132 = vmatpush3.bf16.msra.mxu0 %v146_v7 }
  0x10   :  { %133 = vmatprep.subr.bf16.mxu0 %v148_v0 }
  0x13   :  { %134 = vmatpush3.bf16.msra.mxu0 %v147_v8 }
  0x16   :  { %136 = vmatmul.mubr.msk.bf16.vlgmr.msra.gmra.mxu0 %vm58_vm2, %v15_v9 }
  0x7e   :  { %v29_v10 = vpop.permute.xlu0 %28 }
  0xd6   :  { %v100_v11 = vpop.f32.mrf.mxu0 }
  0xd7   :  { %v101_v12 = vadd.f32 %v100_v11, %v29_v10 }
  0xd8   :  { %v137_v13 = vpop.f32.mrf.mxu0 }
  0xd9   :  { %v106_v14 = vmax.f32 %v101_v12, 0.0 }
  0xda   :  { %v103_v15 = vpop.f32.mrf.mxu0 }
  0xdb   :  { %v107_v16 = vpack.c.bf16 %v106_v14, %v106_v14 }
  0xdc   :  { %v138_v17 = vpop.f32.mrf.mxu0 }
  0xdd   :  { %108 = vst [vmem:[%s198_s3] sm:$0xf] %v107_v16 }

// kernel: forward.25
= control target key start
LH: loop header
LB: loop body
LE: loop exit
PB: predicated region body
PF: predicated region fallthrough
CT: control target
= control target key end

     0   :  { %vm65_vm0 = vcmask 1043456   ;;  %v154_v0 = vmov 0.0   ;;  %vm155_vm1 = vmmov 0   ;;  %v156_v3 = vmov 0   ;;  %s209_s1 = inlined_call_operand.vmem [shape: bf16[72,128], index: 1, kind: input, shape index: {}]   ;;  %s210_s2 = inlined_call_operand.vmem [shape: f32[8,1], index: 2, kind: input, shape index: {}]   ;;  %s211_s0 = inlined_call_operand.vmem [shape: bf16[8,72], index: 0, kind: input, shape index: {}]   ;;  %s212_s3 = inlined_call_operand.vmem [shape: bf16[8,128], index: 3, kind: input, shape index: {}, may-alias: {3,4}]   ;;  %s213_s4 = inlined_call_operand.vmem [shape: bf16[8,128], index: 4, kind: output, shape index: {}, may-alias: {3,4}]  }
   0x1   :  { %131 = vmatprep.subr.bf16.mxu0 %v154_v0  ;;  %v149_v1 = vld [vmem:[%s209_s1 + $0x20] ss:$0 sps:$4 sm:$0xff]   ;;  %141 = vmatprep.mubr.msk.bf16.mxu0 %vm155_vm1, %v154_v0  ;;  %v150_v4 = vld [vmem:[%s209_s1 + $0x18] sm:$0xff]   ;;  %v151_v6 = vld [vmem:[%s209_s1 + $0x10] sm:$0xff]   ;;  %vm61_vm2 = vcmask 588800  }
   0x2   :  { %v67_v2 = vsel %vm65_vm0, %v149_v1, 0  ;;  %148 = vset.pattern.permute.xlu0 %v156_v3  ;;  %v28_v5 = vld [vmem:[%s210_s2] sm:$0xff]  ;;  %v152_v7 = vld [vmem:[%s209_s1 + $0x8] sm:$0xff]  }
   0x3   :  { %132 = vmatpush3.bf16.msra.mxu0 %v67_v2  ;;  %31 = vperm.xlu0 %148, %v28_v5   ;;  %v153_v8 = vld [vmem:[%s209_s1] sm:$0xff]  }
   0x4   :  { %133 = vmatprep.subr.bf16.mxu0 %v154_v0  ;;  %v18_v9 = vld [vmem:[%s211_s0] sm:$0xf] }
   0x5   :  { %v109_v10 = vld [vmem:[%s212_s3] sm:$0xf] }
   0x6   :  { %v110_v12 = vunpack.c.l.bf16 %v109_v10 }
   0x7   :  { %134 = vmatpush3.bf16.msra.mxu0 %v150_v4 }
   0x8   :  { %135 = vmatprep.subr.bf16.mxu0 %v154_v0 }
   0xb   :  { %136 = vmatpush3.bf16.msra.mxu0 %v151_v6 }
   0xc   :  { %137 = vmatprep.subr.bf16.mxu0 %v154_v0 }
   0xf   :  { %138 = vmatpush3.bf16.msra.mxu0 %v152_v7 }
  0x10   :  { %139 = vmatprep.subr.bf16.mxu0 %v154_v0 }
  0x13   :  { %140 = vmatpush3.bf16.msra.mxu0 %v153_v8 }
  0x16   :  { %142 = vmatmul.mubr.msk.bf16.vlgmr.msra.gmra.mxu0 %vm61_vm2, %v18_v9 }
  0x7e   :  { %v32_v11 = vpop.permute.xlu0 %31 }
  0xd6   :  { %v103_v13 = vpop.f32.mrf.mxu0 }
  0xd7   :  { %v104_v14 = vadd.f32 %v103_v13, %v32_v11 }
  0xd8   :  { %v143_v15 = vpop.f32.mrf.mxu0 }
  0xd9   :  { %v111_v16 = vadd.f32 %v110_v12, %v104_v14 }
  0xda   :  { %v106_v17 = vpop.f32.mrf.mxu0 }
  0xdb   :  { %v112_v18 = vmax.f32 %v111_v16, 0.0 }
  0xdc   :  { %v144_v19 = vpop.f32.mrf.mxu0 }
  0xdd   :  { %v113_v20 = vpack.c.bf16 %v112_v18, %v112_v18 }
  0xdf   :  { %114 = vst [vmem:[%s213_s4] sm:$0xf] %v113_v20 }

// kernel: forward.28
= control target key start
LH: loop header
LB: loop body
LE: loop exit
PB: predicated region body
PF: predicated region fallthrough
CT: control target
= control target key end

     0   :  { %vm74_vm0 = vcmask 1043456   ;;  %v181_v0 = vmov 0.0   ;;  %vm182_vm1 = vmmov 0   ;;  %v183_v3 = vmov 0   ;;  %s231_s1 = inlined_call_operand.vmem [shape: bf16[72,128], index: 1, kind: input, shape index: {}]   ;;  %s232_s2 = inlined_call_operand.vmem [shape: f32[16,1], index: 2, kind: input, shape index: {}]   ;;  %s233_s0 = inlined_call_operand.vmem [shape: bf16[16,72], index: 0, kind: input, shape index: {}]   ;;  %s234_s3 = inlined_call_operand.vmem [shape: bf16[16,128], index: 3, kind: output, shape index: {}]  }
   0x1   :  { %157 = vmatprep.subr.bf16.mxu0 %v181_v0  ;;  %v175_v1 = vld [vmem:[%s231_s1 + $0x20] ss:$0 sps:$4 sm:$0xff]   ;;  %167 = vmatprep.mubr.msk.bf16.mxu0 %vm182_vm1, %v181_v0  ;;  %v176_v4 = vld [vmem:[%s231_s1 + $0x18] sm:$0xff]   ;;  %v177_v6 = vld [vmem:[%s231_s1 + $0x10] sm:$0xff]   ;;  %vm70_vm2 = vcmask 588800  }
   0x2   :  { %v76_v2 = vsel %vm74_vm0, %v175_v1, 0  ;;  %174 = vset.pattern.permute.xlu0 %v183_v3  ;;  %v26_v5 = vld [vmem:[%s232_s2] sm:$0xff]  ;;  %v27_v7 = vld [vmem:[%s232_s2 + $0x8] sm:$0xff] }
   0x3   :  { %158 = vmatpush3.bf16.msra.mxu0 %v76_v2  ;;  %30 = vperm.xlu0 %174, %v26_v5   ;;  %v178_v8 = vld [vmem:[%s231_s1 + $0x8] sm:$0xff]   ;;  %v179_v9 = vld [vmem:[%s231_s1] sm:$0xff]  }
   0x4   :  { %159 = vmatprep.subr.bf16.mxu0 %v181_v0  ;;  %v180_v10 = vld [vmem:[%s233_s0] sm:$0xff]  }
   0x7   :  { %160 = vmatpush3.bf16.msra.mxu0 %v176_v4  ;;  %35 = vperm.xlu0 %174, %v27_v7  }
   0x8   :  { %161 = vmatprep.subr.bf16.mxu0 %v181_v0 }
   0xb   :  { %162 = vmatpush3.bf16.msra.mxu0 %v177_v6 }
   0xc   :  { %163 = vmatprep.subr.bf16.mxu0 %v181_v0 }
   0xf   :  { %164 = vmatpush3.bf16.msra.mxu0 %v178_v8 }
  0x10   :  { %165 = vmatprep.subr.bf16.mxu0 %v181_v0 }
  0x13   :  { %166 = vmatpush3.bf16.msra.mxu0 %v179_v9 }
  0x16   :  { %168 = vmatmul.mubr.msk.bf16.vlgmr.msra.gmra.mxu0 %vm70_vm2, %v180_v10 }
  0x7e   :  { %v31_v11 = vpop.permute.xlu0 %30 }
  0x82   :  { %v36_v15 = vpop.permute.xlu0 %35 }
  0xd6   :  { %v112_v12 = vpop.f32.mrf.mxu0 }
  0xd7   :  { %v113_v14 = vadd.f32 %v112_v12, %v31_v11 }
  0xd8   :  { %v169_v13 = vpop.f32.mrf.mxu0 }
  0xd9   :  { %v119_v19 = vmax.f32 %v113_v14, 0.0 }
  0xda   :  { %v115_v16 = vpop.f32.mrf.mxu0 }
  0xdb   :  { %v116_v17 = vadd.f32 %v115_v16, %v36_v15 }
  0xdc   :  { %v170_v18 = vpop.f32.mrf.mxu0 }
  0xdd   :  { %v120_v20 = vmax.f32 %v116_v17, 0.0 }
  0xdf   :  { %v149_v21 = vpack.c.bf16 %v120_v20, %v119_v19 }
  0xe1   :  { %150 = vst [vmem:[%s234_s3] sm:$0xff] %v149_v21  }

// kernel: forward.29
= control target key start
LH: loop header
LB: loop body
LE: loop exit
PB: predicated region body
PF: predicated region fallthrough
CT: control target
= control target key end

     0   :  { %vm39_vm0 = vcmask 1043456   ;;  %v122_v0 = vmov 0.0   ;;  %vm123_vm1 = vmmov 0   ;;  %vm35_vm2 = vcmask 64512   ;;  %s160_s1 = inlined_call_operand.vmem [shape: bf16[8,128], index: 1, kind: input, shape index: {}]   ;;  %s161_s0 = inlined_call_operand.vmem [shape: bf16[16,8], index: 0, kind: input, shape index: {}]   ;;  %s162_s2 = inlined_call_operand.vmem [shape: f32[16,1], index: 2, kind: input, shape index: {}]   ;;  %s163_s3 = inlined_call_operand.vmem [shape: bf16[16,128], index: 3, kind: output, shape index: {}]  }
   0x1   :  { %111 = vmatprep.subr.bf16.mxu0 %v122_v0  ;;  %v17_v1 = vld [vmem:[%s160_s1] sm:$0xf]  ;;  %113 = vmatprep.mubr.msk.bf16.mxu0 %vm123_vm1, %v122_v0  ;;  %v124_v5 = vmov 0   ;;  %v19_v6 = vld [vmem:[%s162_s2 + $0x8] sm:$0xff] }
   0x2   :  { %v41_v2 = vsel %vm39_vm0, %v17_v1, 0  ;;  %v121_v3 = vld [vmem:[%s161_s0] sm:$0xff]   ;;  %120 = vset.pattern.permute.xlu0 %v124_v5 }
   0x3   :  { %v18_v4 = vld [vmem:[%s162_s2] sm:$0xff]  ;;  %112 = vmatpush3.bf16.msra.mxu0 %v41_v2 }
   0x4   :  { %22 = vperm.xlu0 %120, %v18_v4  }
   0x6   :  { %114 = vmatmul.mubr.msk.bf16.vlgmr.msra.gmra.mxu0 %vm35_vm2, %v121_v3 }
   0x8   :  { %27 = vperm.xlu0 %120, %v19_v6  }
  0x7f   :  { %v23_v7 = vpop.permute.xlu0 %22 }
  0x83   :  { %v28_v10 = vpop.permute.xlu0 %27 }
  0xc6   :  { %v77_v8 = vpop.f32.mrf.mxu0 }
  0xc7   :  { %v78_v12 = vadd.f32 %v77_v8, %v23_v7 }
  0xc8   :  { %v115_v9 = vpop.f32.mrf.mxu0 }
  0xca   :  { %v80_v11 = vpop.f32.mrf.mxu0 }
  0xcb   :  { %v81_v13 = vadd.f32 %v80_v11, %v28_v10 }
  0xcc   :  { %v116_v14 = vpop.f32.mrf.mxu0 }
  0xcd   :  { %v107_v15 = vpack.c.bf16 %v81_v13, %v78_v12 }
  0xcf   :  { %108 = vst [vmem:[%s163_s3] sm:$0xff] %v107_v15  }

// kernel: forward.30
= control target key start
LH: loop header
LB: loop body
LE: loop exit
PB: predicated region body
PF: predicated region fallthrough
CT: control target
= control target key end

     0   :  { %v219_v0 = vmov 0   ;;  %vm113_vm0 = vcmask 130048   ;;  %s290_s1 = inlined_call_operand.vmem [shape: bf16[144,128], index: 1, kind: input, shape index: {}]   ;;  %s291_s0 = inlined_call_operand.vmem [shape: bf16[16,144], index: 0, kind: input, shape index: {}]   ;;  %s292_s2 = inlined_call_operand.vmem [shape: f32[16,1], index: 2, kind: input, shape index: {}]   ;;  %s293_s3 = inlined_call_operand.vmem [shape: bf16[16,128], index: 3, kind: input, shape index: {}, may-alias: {3,4}]   ;;  %s294_s4 = inlined_call_operand.vmem [shape: bf16[16,128], index: 4, kind: output, shape index: {}, may-alias: {3,4}]  }
   0x1   :  { %117 = vmatprep.subr.bf16.mxu0 %v219_v0  ;;  %v207_v1 = vld [vmem:[%s290_s1 + $0x38] sm:$0xff]   ;;  %206 = vset.pattern.permute.xlu0 %v219_v0  ;;  %v208_v2 = vld [vmem:[%s290_s1 + $0x30] sm:$0xff]   ;;  %v209_v3 = vld [vmem:[%s290_s1 + $0x28] sm:$0xff]  }
   0x2   :  { %118 = vmatpush1.bf16.msra.mxu0 %v207_v1  ;;  %v210_v4 = vld [vmem:[%s290_s1 + $0x20] sm:$0xff]   ;;  %v39_v7 = vld [vmem:[%s292_s2 + $0x8] sm:$0xff]  ;;  %v211_v8 = vld [vmem:[%s290_s1 + $0x18] sm:$0xff]  }
   0x3   :  { %119 = vmatprep.subr.bf16.mxu0 %v219_v0  ;;  %v218_v5 = vld [vmem:[%s291_s0 + $0x4] ss:$8 sps:$4 sm:$0xff]   ;;  %v212_v9 = vld [vmem:[%s290_s1 + $0x10] sm:$0xff]   ;;  %v216_v13 = vld [vmem:[%s291_s0] ss:$8 sps:$4 sm:$0xff]  }
   0x4   :  { %v38_v6 = vld [vmem:[%s292_s2] sm:$0xff]  ;;  %191 = vmatprep.mubr.msk.bf16.mxu0 %vm113_vm0, %v218_v5  ;;  %v213_v10 = vld [vmem:[%s290_s1 + $0x8] sm:$0xff]  }
   0x5   :  { %42 = vperm.xlu0 %206, %v38_v6   ;;  %v214_v11 = vld [vmem:[%s290_s1] sm:$0xff]  }
   0x6   :  { %120 = vmatpush1.bf16.msra.mxu0 %v208_v2  ;;  %v215_v12 = vld [vmem:[%s290_s1 + $0x40] sm:$0xff]  }
   0x7   :  { %121 = vmatprep.subr.bf16.mxu0 %v219_v0  ;;  %v197_v15 = vld [vmem:[%s293_s3] sm:$0xff]  }
   0x8   :  { %v198_v18 = vunpack.c.l.bf16 %v197_v15  ;;  %v199_v20 = vunpack.c.h.bf16 %v197_v15 }
   0x9   :  { %47 = vperm.xlu0 %206, %v39_v7  }
   0xa   :  { %122 = vmatpush1.bf16.msra.mxu0 %v209_v3 }
   0xb   :  { %123 = vmatprep.subr.bf16.mxu0 %v219_v0 }
   0xe   :  { %124 = vmatpush1.bf16.msra.mxu0 %v210_v4 }
   0xf   :  { %125 = vmatprep.subr.bf16.mxu0 %v219_v0 }
  0x12   :  { %126 = vmatpush1.bf16.msra.mxu0 %v211_v8 }
  0x13   :  { %127 = vmatprep.subr.bf16.mxu0 %v219_v0 }
  0x16   :  { %128 = vmatpush1.bf16.msra.mxu0 %v212_v9 }
  0x17   :  { %129 = vmatprep.subr.bf16.mxu0 %v219_v0 }
  0x1a   :  { %130 = vmatpush1.bf16.msra.mxu0 %v213_v10 }
  0x1b   :  { %131 = vmatprep.subr.bf16.mxu0 %v219_v0 }
  0x1e   :  { %132 = vmatpush1.bf16.msra.mxu0 %v214_v11 }
  0x1f   :  { %147 = vmatprep.subr.bf16.mxu0 %v219_v0 }
  0x22   :  { %148 = vmatpush2.bf16.msra.mxu0 %v215_v12 }
  0x25   :  { %150 = vmatmul.mubr.bf16.vlgmr.msra.gmra.mxu0 %v216_v13 }
  0x80   :  { %v43_v14 = vpop.permute.xlu0 %42 }
  0x84   :  { %v48_v21 = vpop.permute.xlu0 %47 }
  0xe5   :  { %v151_v16 = vpop.f32.mrf.mxu0 }
  0xe6   :  { %v152_v17 = vadd.f32 %v151_v16, %v43_v14 }
  0xe7   :  { %v153_v19 = vpop.f32.mrf.mxu0 }
  0xe8   :  { %v162_v23 = vadd.f32 %v198_v18, %v152_v17 }
  0xe9   :  { %v154_v22 = vpop.f32.mrf.mxu0 }
  0xea   :  { %v155_v24 = vadd.f32 %v154_v22, %v48_v21  ;;  %v164_v27 = vmax.f32 %v162_v23, 0.0 }
  0xeb   :  { %v156_v25 = vpop.f32.mrf.mxu0 }
  0xec   :  { %v163_v26 = vadd.f32 %v199_v20, %v155_v24 }
  0xee   :  { %v165_v28 = vmax.f32 %v163_v26, 0.0 }
  0xf0   :  { %v203_v29 = vpack.c.bf16 %v165_v28, %v164_v27 }
  0xf2   :  { %204 = vst [vmem:[%s294_s4] sm:$0xff] %v203_v29  }

// kernel: forward.31
= control target key start
LH: loop header
LB: loop body
LE: loop exit
PB: predicated region body
PF: predicated region fallthrough
CT: control target
= control target key end

     0   :  { %v206_v0 = vmov 0   ;;  %vm110_vm0 = vcmask 130048   ;;  %s269_s1 = inlined_call_operand.vmem [shape: bf16[144,128], index: 1, kind: input, shape index: {}]   ;;  %s270_s0 = inlined_call_operand.vmem [shape: bf16[16,144], index: 0, kind: input, shape index: {}]   ;;  %s271_s2 = inlined_call_operand.vmem [shape: f32[16,1], index: 2, kind: input, shape index: {}]   ;;  %s272_s3 = inlined_call_operand.vmem [shape: bf16[16,128], index: 3, kind: output, shape index: {}]  }
   0x1   :  { %114 = vmatprep.subr.bf16.mxu0 %v206_v0  ;;  %v194_v1 = vld [vmem:[%s269_s1 + $0x38] sm:$0xff]   ;;  %193 = vset.pattern.permute.xlu0 %v206_v0  ;;  %v195_v2 = vld [vmem:[%s269_s1 + $0x30] sm:$0xff]   ;;  %v196_v3 = vld [vmem:[%s269_s1 + $0x28] sm:$0xff]  }
   0x2   :  { %115 = vmatpush1.bf16.msra.mxu0 %v194_v1  ;;  %v197_v4 = vld [vmem:[%s269_s1 + $0x20] sm:$0xff]   ;;  %v36_v7 = vld [vmem:[%s271_s2 + $0x8] sm:$0xff]  ;;  %v198_v8 = vld [vmem:[%s269_s1 + $0x18] sm:$0xff]  }
   0x3   :  { %116 = vmatprep.subr.bf16.mxu0 %v206_v0  ;;  %v205_v5 = vld [vmem:[%s270_s0 + $0x4] ss:$8 sps:$4 sm:$0xff]   ;;  %v199_v9 = vld [vmem:[%s269_s1 + $0x10] sm:$0xff]   ;;  %v203_v13 = vld [vmem:[%s270_s0] ss:$8 sps:$4 sm:$0xff]  }
   0x4   :  { %v35_v6 = vld [vmem:[%s271_s2] sm:$0xff]  ;;  %182 = vmatprep.mubr.msk.bf16.mxu0 %vm110_vm0, %v205_v5  ;;  %v200_v10 = vld [vmem:[%s269_s1 + $0x8] sm:$0xff]  }
   0x5   :  { %39 = vperm.xlu0 %193, %v35_v6   ;;  %v201_v11 = vld [vmem:[%s269_s1] sm:$0xff]  }
   0x6   :  { %117 = vmatpush1.bf16.msra.mxu0 %v195_v2  ;;  %v202_v12 = vld [vmem:[%s269_s1 + $0x40] sm:$0xff]  }
   0x7   :  { %118 = vmatprep.subr.bf16.mxu0 %v206_v0 }
   0x9   :  { %44 = vperm.xlu0 %193, %v36_v7  }
   0xa   :  { %119 = vmatpush1.bf16.msra.mxu0 %v196_v3 }
   0xb   :  { %120 = vmatprep.subr.bf16.mxu0 %v206_v0 }
   0xe   :  { %121 = vmatpush1.bf16.msra.mxu0 %v197_v4 }
   0xf   :  { %122 = vmatprep.subr.bf16.mxu0 %v206_v0 }
  0x12   :  { %123 = vmatpush1.bf16.msra.mxu0 %v198_v8 }
  0x13   :  { %124 = vmatprep.subr.bf16.mxu0 %v206_v0 }
  0x16   :  { %125 = vmatpush1.bf16.msra.mxu0 %v199_v9 }
  0x17   :  { %126 = vmatprep.subr.bf16.mxu0 %v206_v0 }
  0x1a   :  { %127 = vmatpush1.bf16.msra.mxu0 %v200_v10 }
  0x1b   :  { %128 = vmatprep.subr.bf16.mxu0 %v206_v0 }
  0x1e   :  { %129 = vmatpush1.bf16.msra.mxu0 %v201_v11 }
  0x1f   :  { %144 = vmatprep.subr.bf16.mxu0 %v206_v0 }
  0x22   :  { %145 = vmatpush2.bf16.msra.mxu0 %v202_v12 }
  0x25   :  { %147 = vmatmul.mubr.bf16.vlgmr.msra.gmra.mxu0 %v203_v13 }
  0x80   :  { %v40_v14 = vpop.permute.xlu0 %39 }
  0x84   :  { %v45_v18 = vpop.permute.xlu0 %44 }
  0xe5   :  { %v148_v15 = vpop.f32.mrf.mxu0 }
  0xe6   :  { %v149_v17 = vadd.f32 %v148_v15, %v40_v14 }
  0xe7   :  { %v150_v16 = vpop.f32.mrf.mxu0 }
  0xe8   :  { %v155_v22 = vmax.f32 %v149_v17, 0.0 }
  0xe9   :  { %v151_v19 = vpop.f32.mrf.mxu0 }
  0xea   :  { %v152_v20 = vadd.f32 %v151_v19, %v45_v18 }
  0xeb   :  { %v153_v21 = vpop.f32.mrf.mxu0 }
  0xec   :  { %v156_v23 = vmax.f32 %v152_v20, 0.0 }
  0xee   :  { %v190_v24 = vpack.c.bf16 %v156_v23, %v155_v22 }
  0xf0   :  { %191 = vst [vmem:[%s272_s3] sm:$0xff] %v190_v24  }

// kernel: forward.33
= control target key start
LH: loop header
LB: loop body
LE: loop exit
PB: predicated region body
PF: predicated region fallthrough
CT: control target
= control target key end

     0   :  { %v287_v0 = vmov 0   ;;  %vm133_vm0 = vcmask 130048   ;;  %s365_s1 = inlined_call_operand.vmem [shape: bf16[144,128], index: 1, kind: input, shape index: {}]   ;;  %s366_s0 = inlined_call_operand.vmem [shape: bf16[32,144], index: 0, kind: input, shape index: {}]   ;;  %s367_s2 = inlined_call_operand.vmem [shape: f32[32,1], index: 2, kind: input, shape index: {}]   ;;  %s368_s3 = inlined_call_operand.vmem [shape: bf16[32,128], index: 3, kind: output, shape index: {}]  }
   0x1   :  { %140 = vmatprep.subr.bf16.mxu0 %v287_v0  ;;  %251 = vmatprep.subr.bf16.mxu1 %v287_v0  ;;  %v272_v1 = vld [vmem:[%s365_s1 + $0x38] sm:$0xff]   ;;  %v273_v2 = vld [vmem:[%s365_s1 + $0x30] sm:$0xff]   ;;  %v274_v3 = vld [vmem:[%s365_s1 + $0x28] sm:$0xff]  }
   0x2   :  { %271 = vset.pattern.permute.xlu1 %v287_v0  ;;  %270 = vset.pattern.permute.xlu0 %v287_v0  ;;  %v275_v4 = vld [vmem:[%s365_s1 + $0x20] sm:$0xff]   ;;  %v286_v6 = vld [vmem:[%s366_s0 + $0x14] ss:$8 sps:$4 sm:$0xff]   ;;  %v38_v11 = vld [vmem:[%s367_s2 + $0x8] sm:$0xff] }
   0x3   :  { %141 = vmatpush1.bf16.msra.mxu0 %v272_v1  ;;  %260 = vmatpush1.bf16.msra.mxu1 %v272_v1  ;;  %v283_v5 = vld [vmem:[%s366_s0 + $0x4] ss:$8 sps:$4 sm:$0xff]   ;;  %v39_v7 = vld [vmem:[%s367_s2 + $0x10] sm:$0xff]  ;;  %v40_v9 = vld [vmem:[%s367_s2 + $0x18] sm:$0xff] }
   0x4   :  { %142 = vmatprep.subr.bf16.mxu0 %v287_v0  ;;  %252 = vmatprep.subr.bf16.mxu1 %v287_v0  ;;  %v37_v8 = vld [vmem:[%s367_s2] sm:$0xff]  ;;  %v276_v10 = vld [vmem:[%s365_s1 + $0x18] sm:$0xff]   ;;  %v277_v12 = vld [vmem:[%s365_s1 + $0x10] sm:$0xff]  }
   0x5   :  { %230 = vmatprep.mubr.msk.bf16.mxu0 %vm133_vm0, %v283_v5  ;;  %53 = vperm.xlu1 %271, %v39_v7   ;;  %v278_v13 = vld [vmem:[%s365_s1 + $0x8] sm:$0xff]   ;;  %v279_v14 = vld [vmem:[%s365_s1] sm:$0xff]   ;;  %v284_v17 = vld [vmem:[%s366_s0 + $0x10] ss:$8 sps:$4 sm:$0xff]  }
   0x6   :  { %231 = vmatprep.mubr.msk.bf16.mxu1 %vm133_vm0, %v286_v6  ;;  %43 = vperm.xlu0 %270, %v37_v8   ;;  %v280_v15 = vld [vmem:[%s365_s1 + $0x40] sm:$0xff]  }
   0x7   :  { %143 = vmatpush1.bf16.msra.mxu0 %v273_v2  ;;  %261 = vmatpush1.bf16.msra.mxu1 %v273_v2  ;;  %v281_v16 = vld [vmem:[%s366_s0] ss:$8 sps:$4 sm:$0xff]  }
   0x8   :  { %144 = vmatprep.subr.bf16.mxu0 %v287_v0  ;;  %253 = vmatprep.subr.bf16.mxu1 %v287_v0 }
   0x9   :  { %58 = vperm.xlu1 %271, %v40_v9  }
   0xa   :  { %48 = vperm.xlu0 %270, %v38_v11  }
   0xb   :  { %145 = vmatpush1.bf16.msra.mxu0 %v274_v3  ;;  %262 = vmatpush1.bf16.msra.mxu1 %v274_v3 }
   0xc   :  { %146 = vmatprep.subr.bf16.mxu0 %v287_v0  ;;  %254 = vmatprep.subr.bf16.mxu1 %v287_v0 }
   0xf   :  { %147 = vmatpush1.bf16.msra.mxu0 %v275_v4  ;;  %263 = vmatpush1.bf16.msra.mxu1 %v275_v4 }
  0x10   :  { %148 = vmatprep.subr.bf16.mxu0 %v287_v0  ;;  %255 = vmatprep.subr.bf16.mxu1 %v287_v0 }
  0x13   :  { %149 = vmatpush1.bf16.msra.mxu0 %v276_v10  ;;  %264 = vmatpush1.bf16.msra.mxu1 %v276_v10 }
  0x14   :  { %150 = vmatprep.subr.bf16.mxu0 %v287_v0  ;;  %256 = vmatprep.subr.bf16.mxu1 %v287_v0 }
  0x17   :  { %151 = vmatpush1.bf16.msra.mxu0 %v277_v12  ;;  %265 = vmatpush1.bf16.msra.mxu1 %v277_v12 }
  0x18   :  { %152 = vmatprep.subr.bf16.mxu0 %v287_v0  ;;  %257 = vmatprep.subr.bf16.mxu1 %v287_v0 }
  0x1b   :  { %153 = vmatpush1.bf16.msra.mxu0 %v278_v13  ;;  %266 = vmatpush1.bf16.msra.mxu1 %v278_v13 }
  0x1c   :  { %154 = vmatprep.subr.bf16.mxu0 %v287_v0  ;;  %258 = vmatprep.subr.bf16.mxu1 %v287_v0 }
  0x1f   :  { %155 = vmatpush1.bf16.msra.mxu0 %v279_v14  ;;  %267 = vmatpush1.bf16.msra.mxu1 %v279_v14 }
  0x20   :  { %170 = vmatprep.subr.bf16.mxu0 %v287_v0  ;;  %259 = vmatprep.subr.bf16.mxu1 %v287_v0 }
  0x23   :  { %171 = vmatpush2.bf16.msra.mxu0 %v280_v15  ;;  %268 = vmatpush2.bf16.msra.mxu1 %v280_v15 }
  0x26   :  { %173 = vmatmul.mubr.bf16.vlgmr.msra.gmra.mxu0 %v281_v16  ;;  %181 = vmatmul.mubr.bf16.vlgmr.msra.gmra.mxu1 %v284_v17 }
  0x80   :  { %v54_v18 = vpop.permute.xlu1 %53 }
  0x81   :  { %v44_v19 = vpop.permute.xlu0 %43 }
  0x84   :  { %v59_v24 = vpop.permute.xlu1 %58 }
  0x85   :  { %v49_v25 = vpop.permute.xlu0 %48 }
  0xe6   :  { %v174_v20 = vpop.f32.mrf.mxu0  ;;  %v182_v21 = vpop.f32.mrf.mxu1 }
  0xe7   :  { %v175_v26 = vadd.f32 %v174_v20, %v44_v19  ;;  %v183_v27 = vadd.f32 %v182_v21, %v54_v18 }
  0xe8   :  { %v176_v22 = vpop.f32.mrf.mxu0  ;;  %v184_v23 = vpop.f32.mrf.mxu1 }
  0xe9   :  { %v189_v34 = vmax.f32 %v175_v26, 0.0  ;;  %v191_v35 = vmax.f32 %v183_v27, 0.0 }
  0xea   :  { %v177_v28 = vpop.f32.mrf.mxu0  ;;  %v185_v29 = vpop.f32.mrf.mxu1 }
  0xeb   :  { %v178_v30 = vadd.f32 %v177_v28, %v49_v25  ;;  %v186_v31 = vadd.f32 %v185_v29, %v59_v24 }
  0xec   :  { %v179_v32 = vpop.f32.mrf.mxu0  ;;  %v187_v33 = vpop.f32.mrf.mxu1 }
  0xed   :  { %v190_v36 = vmax.f32 %v178_v30, 0.0  ;;  %v192_v37 = vmax.f32 %v186_v31, 0.0 }
  0xef   :  { %v243_v38 = vpack.c.bf16 %v190_v36, %v189_v34  ;;  %v248_v39 = vpack.c.bf16 %v192_v37, %v191_v35 }
  0xf1   :  { %244 = vst [vmem:[%s368_s3] sm:$0xff] %v243_v38   ;;  %250 = vst [vmem:[%s368_s3 + $0x8] sm:$0xff] %v248_v39  }

// kernel: forward.34
= control target key start
LH: loop header
LB: loop body
LE: loop exit
PB: predicated region body
PF: predicated region fallthrough
CT: control target
= control target key end

     0   :  { %vm61_vm0 = vcmask 130048   ;;  %v180_v1 = vmov 0   ;;  %s230_s1 = inlined_call_operand.vmem [shape: bf16[16,128], index: 1, kind: input, shape index: {}]   ;;  %s231_s0 = inlined_call_operand.vmem [shape: bf16[32,16], index: 0, kind: input, shape index: {}]   ;;  %s232_s2 = inlined_call_operand.vmem [shape: f32[32,1], index: 2, kind: input, shape index: {}]   ;;  %s233_s3 = inlined_call_operand.vmem [shape: bf16[32,128], index: 3, kind: output, shape index: {}]  }
   0x1   :  { %v177_v0 = vld [vmem:[%s230_s1] sm:$0xff]   ;;  %176 = vset.pattern.permute.xlu1 %v180_v1  ;;  %175 = vset.pattern.permute.xlu0 %v180_v1  ;;  %v179_v3 = vld [vmem:[%s231_s0 + $0x8] sm:$0xff]   ;;  %v23_v4 = vld [vmem:[%s232_s2 + $0x10] sm:$0xff] }
   0x2   :  { %v178_v2 = vld [vmem:[%s231_s0] sm:$0xff]   ;;  %168 = vmatprep.subr.bf16.mxu0 %v177_v0  ;;  %37 = vperm.xlu1 %176, %v23_v4   ;;  %v24_v6 = vld [vmem:[%s232_s2 + $0x18] sm:$0xff]  ;;  %v22_v7 = vld [vmem:[%s232_s2 + $0x8] sm:$0xff] }
   0x3   :  { %169 = vmatpush3.bf16.msra.mxu0 %v177_v0  ;;  %170 = vmatprep.mubr.msk.bf16.mxu0 %vm61_vm0, %v178_v2  ;;  %v21_v5 = vld [vmem:[%s232_s2] sm:$0xff] }
   0x4   :  { %27 = vperm.xlu0 %175, %v21_v5  }
   0x6   :  { %171 = vmatmul.mubr.msk.bf16.vlgmr.msra.gmra.mxu0 %vm61_vm0, %v179_v3  ;;  %42 = vperm.xlu1 %176, %v24_v6  }
   0x8   :  { %32 = vperm.xlu0 %175, %v22_v7  }
  0x7d   :  { %v38_v8 = vpop.permute.xlu1 %37 }
  0x7f   :  { %v28_v9 = vpop.permute.xlu0 %27 }
  0x81   :  { %v43_v12 = vpop.permute.xlu1 %42 }
  0x83   :  { %v33_v16 = vpop.permute.xlu0 %32 }
  0xc6   :  { %v172_v10 = vpop.f32.mrf.mxu0 }
  0xc7   :  { %v111_v14 = vadd.f32 %v172_v10, %v38_v8 }
  0xc8   :  { %v102_v11 = vpop.f32.mrf.mxu0 }
  0xc9   :  { %v103_v18 = vadd.f32 %v102_v11, %v28_v9 }
  0xca   :  { %v173_v13 = vpop.f32.mrf.mxu0 }
  0xcb   :  { %v114_v15 = vadd.f32 %v173_v13, %v43_v12 }
  0xcc   :  { %v105_v17 = vpop.f32.mrf.mxu0 }
  0xcd   :  { %v162_v19 = vpack.c.bf16 %v114_v15, %v111_v14  ;;  %v106_v20 = vadd.f32 %v105_v17, %v33_v16 }
  0xcf   :  { %164 = vst [vmem:[%s233_s3 + $0x8] sm:$0xff] %v162_v19   ;;  %v157_v21 = vpack.c.bf16 %v106_v20, %v103_v18 }
  0xd1   :  { %158 = vst [vmem:[%s233_s3] sm:$0xff] %v157_v21  }

// kernel: forward.36
= control target key start
LH: loop header
LB: loop body
LE: loop exit
PB: predicated region body
PF: predicated region fallthrough
CT: control target
= control target key end

     0   :  { %v468_v1 = vmov 0   ;;  %vm221_vm0 = vcmask 261120   ;;  %s581_s1 = inlined_call_operand.vmem [shape: bf16[288,128], index: 1, kind: input, shape index: {}]   ;;  %s582_s0 = inlined_call_operand.vmem [shape: bf16[32,288], index: 0, kind: input, shape index: {}]   ;;  %s583_s2 = inlined_call_operand.vmem [shape: f32[32,1], index: 2, kind: input, shape index: {}]   ;;  %s584_s3 = inlined_call_operand.vmem [shape: bf16[32,128], index: 3, kind: output, shape index: {}]  }
   0x1   :  { %v442_v0 = vld [vmem:[%s581_s1 + $0x78] sm:$0xff]   ;;  %440 = vset.pattern.permute.xlu0 %v468_v1  ;;  %441 = vset.pattern.permute.xlu1 %v468_v1  ;;  %v444_v3 = vld [vmem:[%s581_s1 + $0x70] sm:$0xff]   ;;  %v446_v5 = vld [vmem:[%s581_s1 + $0x68] sm:$0xff]  }
   0x2   :  { %v443_v2 = vld [vmem:[%s581_s1 + $0x38] sm:$0xff]   ;;  %399 = vmatprep.subr.bf16.mxu0 %v442_v0  ;;  %v445_v4 = vld [vmem:[%s581_s1 + $0x30] sm:$0xff]   ;;  %v447_v6 = vld [vmem:[%s581_s1 + $0x28] sm:$0xff]  }
   0x3   :  { %400 = vmatpush3.bf16.msra.mxu0 %v443_v2  ;;  %v448_v7 = vld [vmem:[%s581_s1 + $0x60] sm:$0xff]   ;;  %v450_v9 = vld [vmem:[%s581_s1 + $0x58] sm:$0xff]   ;;  %v457_v11 = vld [vmem:[%s581_s1 + $0x88] sm:$0xff]  }
   0x4   :  { %401 = vmatprep.subr.bf16.mxu0 %v444_v3  ;;  %v449_v8 = vld [vmem:[%s581_s1 + $0x20] sm:$0xff]   ;;  %v451_v10 = vld [vmem:[%s581_s1 + $0x18] sm:$0xff]   ;;  %v452_v12 = vld [vmem:[%s581_s1 + $0x50] sm:$0xff]   ;;  %431 = vmatprep.subr.bf16.mxu1 %v457_v11 }
   0x5   :  { %v453_v13 = vld [vmem:[%s581_s1 + $0x10] sm:$0xff]   ;;  %v454_v14 = vld [vmem:[%s581_s1 + $0x48] sm:$0xff]   ;;  %432 = vmatpush3.bf16.msra.mxu1 %v457_v11  ;;  %v462_v16 = vld [vmem:[%s581_s1 + $0x80] sm:$0xff]  }
   0x6   :  { %v461_v15 = vld [vmem:[%s582_s0 + $0x4] ss:$12 sps:$4 sm:$0xff]   ;;  %v463_v17 = vld [vmem:[%s582_s0 + $0x8] ss:$12 sps:$4 sm:$0xff]   ;;  %433 = vmatprep.subr.bf16.mxu1 %v462_v16  ;;  %v464_v18 = vld [vmem:[%s582_s0 + $0x20] ss:$12 sps:$4 sm:$0xff]  }
   0x7   :  { %402 = vmatpush3.bf16.msra.mxu0 %v445_v4  ;;  %260 = vmatprep.mubr.bf16.mxu0 %v461_v15  ;;  %v59_v19 = vld [vmem:[%s583_s2] sm:$0xff]  ;;  %v455_v20 = vld [vmem:[%s581_s1 + $0x8] sm:$0xff]   ;;  %v61_v21 = vld [vmem:[%s583_s2 + $0x10] sm:$0xff] }
   0x8   :  { %403 = vmatprep.subr.bf16.mxu0 %v446_v5  ;;  %435 = vmatprep.mubr.msk.bf16.mxu1 %vm221_vm0, %v463_v17  ;;  %v456_v22 = vld [vmem:[%s581_s1 + $0x40] sm:$0xff]   ;;  %v60_v23 = vld [vmem:[%s583_s2 + $0x8] sm:$0xff]  ;;  %v62_v24 = vld [vmem:[%s583_s2 + $0x18] sm:$0xff] }
   0x9   :  { %434 = vmatpush3.bf16.msra.mxu1 %v462_v16  ;;  %65 = vperm.xlu0 %440, %v59_v19   ;;  %v458_v25 = vld [vmem:[%s581_s1] sm:$0xff]   ;;  %v465_v27 = vld [vmem:[%s582_s0 + $0x1c] ss:$12 sps:$4 sm:$0xff]  }
   0xa   :  { %75 = vperm.xlu1 %441, %v61_v21   ;;  %v459_v26 = vld [vmem:[%s582_s0] ss:$12 sps:$4 sm:$0xff]   ;;  %v467_v28 = vld [vmem:[%s582_s0 + $0x18] ss:$12 sps:$4 sm:$0xff]  }
   0xb   :  { %404 = vmatpush3.bf16.msra.mxu0 %v447_v6 }
   0xc   :  { %405 = vmatprep.subr.bf16.mxu0 %v448_v7  ;;  %436 = vmatmul.mubr.msk.bf16.vlgmr.msra.gmra.mxu1 %vm221_vm0, %v464_v18 }
   0xd   :  { %70 = vperm.xlu0 %440, %v60_v23  }
   0xe   :  { %80 = vperm.xlu1 %441, %v62_v24  }
   0xf   :  { %406 = vmatpush3.bf16.msra.mxu0 %v449_v8 }
  0x10   :  { %407 = vmatprep.subr.bf16.mxu0 %v450_v9 }
  0x13   :  { %408 = vmatpush3.bf16.msra.mxu0 %v451_v10 }
  0x14   :  { %409 = vmatprep.subr.bf16.mxu0 %v452_v12 }
  0x17   :  { %410 = vmatpush3.bf16.msra.mxu0 %v453_v13 }
  0x18   :  { %411 = vmatprep.subr.bf16.mxu0 %v454_v14 }
  0x1b   :  { %412 = vmatpush3.bf16.msra.mxu0 %v455_v20 }
  0x1c   :  { %413 = vmatprep.subr.bf16.mxu0 %v456_v22 }
  0x1f   :  { %414 = vmatpush3.bf16.msra.mxu0 %v458_v25 }
  0x22   :  { %261 = vmatmul.mubr.bf16.vlgmr.msra.gmra.mxu0 %v459_v26 }
  0x23   :  { %268 = vmatprep.mubr.bf16.mxu0 %v465_v27 }
  0x2a   :  { %269 = vmatmul.mubr.bf16.gmra.mxu0 %v467_v28 }
  0x84   :  { %v66_v30 = vpop.permute.xlu0 %65 }
  0x85   :  { %v76_v45 = vpop.permute.xlu1 %75 }
  0x88   :  { %v71_v39 = vpop.permute.xlu0 %70 }
  0x89   :  { %v81_v56 = vpop.permute.xlu1 %80 }
  0xcc   :  { %v437_v29 = vpop.f32.mrf.mxu1 }
  0xce   :  { %v311_v32 = vpop.f32.mrf.mxu1 }
  0xd0   :  { %v438_v36 = vpop.f32.mrf.mxu1 }
  0xd2   :  { %v314_v42 = vpop.f32.mrf.mxu1 }
  0xe2   :  { %v415_v31 = vpop.f32.mrf.mxu0 }
  0xe4   :  { %v416_v33 = vpop.f32.mrf.mxu0 }
  0xe5   :  { %v417_v34 = vadd.f32 %v416_v33, %v415_v31 }
  0xe6   :  { %v418_v35 = vpop.f32.mrf.mxu0 }
  0xe7   :  { %v263_v37 = vadd.f32 %v417_v34, %v66_v30 }
  0xe8   :  { %v419_v38 = vpop.f32.mrf.mxu0 }
  0xe9   :  { %v420_v40 = vadd.f32 %v419_v38, %v418_v35  ;;  %v312_v43 = vadd.f32 %v311_v32, %v263_v37 }
  0xea   :  { %v421_v41 = vpop.f32.mrf.mxu0 }
  0xeb   :  { %v266_v44 = vadd.f32 %v420_v40, %v71_v39  ;;  %v326_v50 = vmax.f32 %v312_v43, 0.0 }
  0xec   :  { %v422_v46 = vpop.f32.mrf.mxu0 }
  0xed   :  { %v423_v47 = vadd.f32 %v422_v46, %v421_v41  ;;  %v315_v48 = vadd.f32 %v314_v42, %v266_v44 }
  0xee   :  { %v424_v49 = vpop.f32.mrf.mxu0 }
  0xef   :  { %v271_v51 = vadd.f32 %v423_v47, %v76_v45  ;;  %v327_v52 = vmax.f32 %v315_v48, 0.0 }
  0xf0   :  { %v425_v53 = vpop.f32.mrf.mxu0 }
  0xf1   :  { %v391_v54 = vpack.c.bf16 %v327_v52, %v326_v50  ;;  %v426_v55 = vadd.f32 %v425_v53, %v424_v49  ;;  %v320_v57 = vadd.f32 %v437_v29, %v271_v51 }
  0xf3   :  { %392 = vst [vmem:[%s584_s3] sm:$0xff] %v391_v54   ;;  %v274_v58 = vadd.f32 %v426_v55, %v81_v56  ;;  %v328_v60 = vmax.f32 %v320_v57, 0.0 }
  0xf5   :  { %v323_v59 = vadd.f32 %v438_v36, %v274_v58 }
  0xf7   :  { %v329_v61 = vmax.f32 %v323_v59, 0.0 }
  0xf9   :  { %v396_v62 = vpack.c.bf16 %v329_v61, %v328_v60 }
  0xfb   :  { %398 = vst [vmem:[%s584_s3 + $0x8] sm:$0xff] %v396_v62  }

// kernel: forward.35
= control target key start
LH: loop header
LB: loop body
LE: loop exit
PB: predicated region body
PF: predicated region fallthrough
CT: control target
= control target key end

     0   :  { %v492_v1 = vmov 0   ;;  %vm224_vm0 = vcmask 261120   ;;  %s616_s1 = inlined_call_operand.vmem [shape: bf16[288,128], index: 1, kind: input, shape index: {}]   ;;  %s617_s0 = inlined_call_operand.vmem [shape: bf16[32,288], index: 0, kind: input, shape index: {}]   ;;  %s618_s2 = inlined_call_operand.vmem [shape: f32[32,1], index: 2, kind: input, shape index: {}]   ;;  %s619_s3 = inlined_call_operand.vmem [shape: bf16[32,128], index: 3, kind: input, shape index: {}, may-alias: {3,4}]   ;;  %s620_s4 = inlined_call_operand.vmem [shape: bf16[32,128], index: 4, kind: output, shape index: {}, may-alias: {3,4}]  }
   0x1   :  { %v466_v0 = vld [vmem:[%s616_s1 + $0x78] sm:$0xff]   ;;  %464 = vset.pattern.permute.xlu0 %v492_v1  ;;  %465 = vset.pattern.permute.xlu1 %v492_v1  ;;  %v468_v3 = vld [vmem:[%s616_s1 + $0x70] sm:$0xff]   ;;  %v470_v5 = vld [vmem:[%s616_s1 + $0x68] sm:$0xff]  }
   0x2   :  { %v467_v2 = vld [vmem:[%s616_s1 + $0x38] sm:$0xff]   ;;  %423 = vmatprep.subr.bf16.mxu0 %v466_v0  ;;  %v469_v4 = vld [vmem:[%s616_s1 + $0x30] sm:$0xff]   ;;  %v471_v6 = vld [vmem:[%s616_s1 + $0x28] sm:$0xff]  }
   0x3   :  { %424 = vmatpush3.bf16.msra.mxu0 %v467_v2  ;;  %v472_v7 = vld [vmem:[%s616_s1 + $0x60] sm:$0xff]   ;;  %v474_v9 = vld [vmem:[%s616_s1 + $0x58] sm:$0xff]   ;;  %v481_v11 = vld [vmem:[%s616_s1 + $0x88] sm:$0xff]  }
   0x4   :  { %425 = vmatprep.subr.bf16.mxu0 %v468_v3  ;;  %v473_v8 = vld [vmem:[%s616_s1 + $0x20] sm:$0xff]   ;;  %v475_v10 = vld [vmem:[%s616_s1 + $0x18] sm:$0xff]   ;;  %v476_v12 = vld [vmem:[%s616_s1 + $0x50] sm:$0xff]   ;;  %455 = vmatprep.subr.bf16.mxu1 %v481_v11 }
   0x5   :  { %v477_v13 = vld [vmem:[%s616_s1 + $0x10] sm:$0xff]   ;;  %v478_v14 = vld [vmem:[%s616_s1 + $0x48] sm:$0xff]   ;;  %456 = vmatpush3.bf16.msra.mxu1 %v481_v11  ;;  %v486_v16 = vld [vmem:[%s616_s1 + $0x80] sm:$0xff]  }
   0x6   :  { %v485_v15 = vld [vmem:[%s617_s0 + $0x4] ss:$12 sps:$4 sm:$0xff]   ;;  %v487_v17 = vld [vmem:[%s617_s0 + $0x8] ss:$12 sps:$4 sm:$0xff]   ;;  %457 = vmatprep.subr.bf16.mxu1 %v486_v16  ;;  %v488_v18 = vld [vmem:[%s617_s0 + $0x20] ss:$12 sps:$4 sm:$0xff]  }
   0x7   :  { %426 = vmatpush3.bf16.msra.mxu0 %v469_v4  ;;  %263 = vmatprep.mubr.bf16.mxu0 %v485_v15  ;;  %v62_v19 = vld [vmem:[%s618_s2] sm:$0xff]  ;;  %v479_v20 = vld [vmem:[%s616_s1 + $0x8] sm:$0xff]   ;;  %v64_v21 = vld [vmem:[%s618_s2 + $0x10] sm:$0xff] }
   0x8   :  { %427 = vmatprep.subr.bf16.mxu0 %v470_v5  ;;  %459 = vmatprep.mubr.msk.bf16.mxu1 %vm224_vm0, %v487_v17  ;;  %v480_v22 = vld [vmem:[%s616_s1 + $0x40] sm:$0xff]   ;;  %v63_v23 = vld [vmem:[%s618_s2 + $0x8] sm:$0xff]  ;;  %v65_v24 = vld [vmem:[%s618_s2 + $0x18] sm:$0xff] }
   0x9   :  { %458 = vmatpush3.bf16.msra.mxu1 %v486_v16  ;;  %68 = vperm.xlu0 %464, %v62_v19   ;;  %v482_v25 = vld [vmem:[%s616_s1] sm:$0xff]   ;;  %v489_v27 = vld [vmem:[%s617_s0 + $0x1c] ss:$12 sps:$4 sm:$0xff]  }
   0xa   :  { %78 = vperm.xlu1 %465, %v64_v21   ;;  %v483_v26 = vld [vmem:[%s617_s0] ss:$12 sps:$4 sm:$0xff]   ;;  %v491_v28 = vld [vmem:[%s617_s0 + $0x18] ss:$12 sps:$4 sm:$0xff]  }
   0xb   :  { %428 = vmatpush3.bf16.msra.mxu0 %v471_v6  ;;  %v404_v36 = vld [vmem:[%s619_s3] sm:$0xff]   ;;  %v421_v50 = vld [vmem:[%s619_s3 + $0x8] sm:$0xff]  }
   0xc   :  { %429 = vmatprep.subr.bf16.mxu0 %v472_v7  ;;  %460 = vmatmul.mubr.msk.bf16.vlgmr.msra.gmra.mxu1 %vm224_vm0, %v488_v18  ;;  %v405_v43 = vunpack.c.l.bf16 %v404_v36  ;;  %v406_v47 = vunpack.c.h.bf16 %v404_v36  ;;  %v409_v57 = vunpack.c.l.bf16 %v421_v50  ;;  %v410_v2 = vunpack.c.h.bf16 %v421_v50 }
   0xd   :  { %73 = vperm.xlu0 %464, %v63_v23  }
   0xe   :  { %83 = vperm.xlu1 %465, %v65_v24  }
   0xf   :  { %430 = vmatpush3.bf16.msra.mxu0 %v473_v8 }
  0x10   :  { %431 = vmatprep.subr.bf16.mxu0 %v474_v9 }
  0x13   :  { %432 = vmatpush3.bf16.msra.mxu0 %v475_v10 }
  0x14   :  { %433 = vmatprep.subr.bf16.mxu0 %v476_v12 }
  0x17   :  { %434 = vmatpush3.bf16.msra.mxu0 %v477_v13 }
  0x18   :  { %435 = vmatprep.subr.bf16.mxu0 %v478_v14 }
  0x1b   :  { %436 = vmatpush3.bf16.msra.mxu0 %v479_v20 }
  0x1c   :  { %437 = vmatprep.subr.bf16.mxu0 %v480_v22 }
  0x1f   :  { %438 = vmatpush3.bf16.msra.mxu0 %v482_v25 }
  0x22   :  { %264 = vmatmul.mubr.bf16.vlgmr.msra.gmra.mxu0 %v483_v26 }
  0x23   :  { %271 = vmatprep.mubr.bf16.mxu0 %v489_v27 }
  0x2a   :  { %272 = vmatmul.mubr.bf16.gmra.mxu0 %v491_v28 }
  0x84   :  { %v69_v30 = vpop.permute.xlu0 %68 }
  0x85   :  { %v79_v48 = vpop.permute.xlu1 %78 }
  0x88   :  { %v74_v40 = vpop.permute.xlu0 %73 }
  0x89   :  { %v84_v63 = vpop.permute.xlu1 %83 }
  0xcc   :  { %v461_v29 = vpop.f32.mrf.mxu1 }
  0xce   :  { %v314_v32 = vpop.f32.mrf.mxu1 }
  0xd0   :  { %v462_v37 = vpop.f32.mrf.mxu1 }
  0xd2   :  { %v317_v45 = vpop.f32.mrf.mxu1 }
  0xe2   :  { %v439_v31 = vpop.f32.mrf.mxu0 }
  0xe4   :  { %v440_v33 = vpop.f32.mrf.mxu0 }
  0xe5   :  { %v441_v34 = vadd.f32 %v440_v33, %v439_v31 }
  0xe6   :  { %v442_v35 = vpop.f32.mrf.mxu0 }
  0xe7   :  { %v266_v38 = vadd.f32 %v441_v34, %v69_v30 }
  0xe8   :  { %v443_v39 = vpop.f32.mrf.mxu0 }
  0xe9   :  { %v444_v41 = vadd.f32 %v443_v39, %v442_v35  ;;  %v315_v42 = vadd.f32 %v314_v32, %v266_v38 }
  0xea   :  { %v445_v44 = vpop.f32.mrf.mxu0 }
  0xeb   :  { %v269_v46 = vadd.f32 %v444_v41, %v74_v40  ;;  %v337_v51 = vadd.f32 %v405_v43, %v315_v42 }
  0xec   :  { %v446_v49 = vpop.f32.mrf.mxu0 }
  0xed   :  { %v447_v52 = vadd.f32 %v446_v49, %v445_v44  ;;  %v318_v53 = vadd.f32 %v317_v45, %v269_v46  ;;  %v341_v59 = vmax.f32 %v337_v51, 0.0 }
  0xee   :  { %v448_v54 = vpop.f32.mrf.mxu0 }
  0xef   :  { %v274_v55 = vadd.f32 %v447_v52, %v79_v48  ;;  %v338_v56 = vadd.f32 %v406_v47, %v318_v53 }
  0xf0   :  { %v449_v58 = vpop.f32.mrf.mxu0 }
  0xf1   :  { %v323_v60 = vadd.f32 %v461_v29, %v274_v55  ;;  %v342_v61 = vmax.f32 %v338_v56, 0.0  ;;  %v450_v62 = vadd.f32 %v449_v58, %v448_v54 }
  0xf3   :  { %v414_v0 = vpack.c.bf16 %v342_v61, %v341_v59  ;;  %v277_v1 = vadd.f32 %v450_v62, %v84_v63  ;;  %v339_v3 = vadd.f32 %v409_v57, %v323_v60 }
  0xf5   :  { %415 = vst [vmem:[%s620_s4] sm:$0xff] %v414_v0   ;;  %v326_v4 = vadd.f32 %v462_v37, %v277_v1  ;;  %v343_v6 = vmax.f32 %v339_v3, 0.0 }
  0xf7   :  { %v340_v5 = vadd.f32 %v410_v2, %v326_v4 }
  0xf9   :  { %v344_v7 = vmax.f32 %v340_v5, 0.0 }
  0xfb   :  { %v419_v8 = vpack.c.bf16 %v344_v7, %v343_v6 }
  0xfd   :  { %422 = vst [vmem:[%s620_s4 + $0x8] sm:$0xff] %v419_v8  }

// kernel: forward.38
= control target key start
LH: loop header
LB: loop body
LE: loop exit
PB: predicated region body
PF: predicated region fallthrough
CT: control target
= control target key end

     0   :  { %v662_v1 = vmov 0   ;;  %vm283_vm0 = vcmask 261120   ;;  %s813_s1 = inlined_call_operand.vmem [shape: bf16[288,128], index: 1, kind: input, shape index: {}]   ;;  %s814_s0 = inlined_call_operand.vmem [shape: bf16[64,288], index: 0, kind: input, shape index: {}]   ;;  %s815_s2 = inlined_call_operand.vmem [shape: f32[64,1], index: 2, kind: input, shape index: {}]   ;;  %s816_s3 = inlined_call_operand.vmem [shape: bf16[64,128], index: 3, kind: output, shape index: {}]  }
   0x1   :  { %v628_v0 = vld [vmem:[%s813_s1 + $0x78] sm:$0xff]   ;;  %626 = vset.pattern.permute.xlu0 %v662_v1  ;;  %627 = vset.pattern.permute.xlu1 %v662_v1  ;;  %v630_v3 = vld [vmem:[%s813_s1 + $0x70] sm:$0xff]   ;;  %v632_v5 = vld [vmem:[%s813_s1 + $0x68] sm:$0xff]  }
   0x2   :  { %v629_v2 = vld [vmem:[%s813_s1 + $0x38] sm:$0xff]   ;;  %551 = vmatprep.subr.bf16.mxu0 %v628_v0  ;;  %609 = vmatprep.subr.bf16.mxu1 %v628_v0  ;;  %v631_v4 = vld [vmem:[%s813_s1 + $0x30] sm:$0xff]   ;;  %v633_v6 = vld [vmem:[%s813_s1 + $0x28] sm:$0xff]  }
   0x3   :  { %552 = vmatpush3.bf16.msra.mxu0 %v629_v2  ;;  %617 = vmatpush3.bf16.msra.mxu1 %v629_v2  ;;  %v634_v7 = vld [vmem:[%s813_s1 + $0x60] sm:$0xff]   ;;  %v636_v9 = vld [vmem:[%s813_s1 + $0x58] sm:$0xff]   ;;  %v638_v11 = vld [vmem:[%s813_s1 + $0x50] sm:$0xff]  }
   0x4   :  { %553 = vmatprep.subr.bf16.mxu0 %v630_v3  ;;  %610 = vmatprep.subr.bf16.mxu1 %v630_v3  ;;  %v635_v8 = vld [vmem:[%s813_s1 + $0x20] sm:$0xff]   ;;  %v637_v10 = vld [vmem:[%s813_s1 + $0x18] sm:$0xff]   ;;  %v639_v14 = vld [vmem:[%s813_s1 + $0x10] sm:$0xff]  }
   0x5   :  { %v646_v12 = vld [vmem:[%s814_s0 + $0x4] ss:$12 sps:$4 sm:$0xff]   ;;  %v649_v13 = vld [vmem:[%s814_s0 + $0x4c] ss:$12 sps:$4 sm:$0xff]   ;;  %v647_v23 = vld [vmem:[%s814_s0 + $0x48] ss:$12 sps:$4 sm:$0xff]  }
   0x6   :  { %v640_v15 = vld [vmem:[%s813_s1 + $0x48] sm:$0xff]   ;;  %328 = vmatprep.mubr.bf16.mxu0 %v646_v12  ;;  %352 = vmatprep.mubr.bf16.mxu1 %v649_v13  ;;  %v642_v17 = vld [vmem:[%s813_s1 + $0x40] sm:$0xff]   ;;  %v69_v20 = vld [vmem:[%s815_s2 + $0x10] sm:$0xff] }
   0x7   :  { %554 = vmatpush3.bf16.msra.mxu0 %v631_v4  ;;  %618 = vmatpush3.bf16.msra.mxu1 %v631_v4  ;;  %v641_v16 = vld [vmem:[%s813_s1 + $0x8] sm:$0xff]   ;;  %v643_v18 = vld [vmem:[%s813_s1] sm:$0xff]   ;;  %v70_v25 = vld [vmem:[%s815_s2 + $0x18] sm:$0xff] }
   0x8   :  { %555 = vmatprep.subr.bf16.mxu0 %v632_v5  ;;  %611 = vmatprep.subr.bf16.mxu1 %v632_v5  ;;  %v67_v19 = vld [vmem:[%s815_s2] sm:$0xff]  ;;  %v650_v21 = vld [vmem:[%s813_s1 + $0x88] sm:$0xff]   ;;  %v73_v33 = vld [vmem:[%s815_s2 + $0x30] sm:$0xff] }
   0x9   :  { %v644_v22 = vld [vmem:[%s814_s0] ss:$12 sps:$4 sm:$0xff]   ;;  %77 = vperm.xlu0 %626, %v67_v19   ;;  %87 = vperm.xlu1 %627, %v69_v20   ;;  %v652_v26 = vld [vmem:[%s814_s0 + $0x1c] ss:$12 sps:$4 sm:$0xff]   ;;  %v655_v31 = vld [vmem:[%s814_s0 + $0x18] ss:$12 sps:$4 sm:$0xff]  }
   0xa   :  { %v68_v24 = vld [vmem:[%s815_s2 + $0x8] sm:$0xff]  ;;  %v651_v27 = vld [vmem:[%s813_s1 + $0x80] sm:$0xff]   ;;  %v74_v34 = vld [vmem:[%s815_s2 + $0x38] sm:$0xff] }
   0xb   :  { %556 = vmatpush3.bf16.msra.mxu0 %v633_v6  ;;  %619 = vmatpush3.bf16.msra.mxu1 %v633_v6  ;;  %v654_v28 = vld [vmem:[%s814_s0 + $0x8] ss:$12 sps:$4 sm:$0xff]   ;;  %v71_v29 = vld [vmem:[%s815_s2 + $0x20] sm:$0xff]  ;;  %v660_v37 = vld [vmem:[%s814_s0 + $0x30] ss:$12 sps:$4 sm:$0xff]  }
   0xc   :  { %557 = vmatprep.subr.bf16.mxu0 %v634_v7  ;;  %612 = vmatprep.subr.bf16.mxu1 %v634_v7  ;;  %v72_v30 = vld [vmem:[%s815_s2 + $0x28] sm:$0xff]  ;;  %v657_v35 = vld [vmem:[%s814_s0 + $0x34] ss:$12 sps:$4 sm:$0xff]   ;;  %v659_v36 = vld [vmem:[%s814_s0 + $0x38] ss:$12 sps:$4 sm:$0xff]  }
   0xd   :  { %82 = vperm.xlu0 %626, %v68_v24   ;;  %92 = vperm.xlu1 %627, %v70_v25   ;;  %v656_v32 = vld [vmem:[%s814_s0 + $0x20] ss:$12 sps:$4 sm:$0xff]   ;;  %v661_v38 = vld [vmem:[%s814_s0 + $0x50] ss:$12 sps:$4 sm:$0xff]  }
   0xf   :  { %558 = vmatpush3.bf16.msra.mxu0 %v635_v8  ;;  %620 = vmatpush3.bf16.msra.mxu1 %v635_v8 }
  0x10   :  { %559 = vmatprep.subr.bf16.mxu0 %v636_v9  ;;  %613 = vmatprep.subr.bf16.mxu1 %v636_v9 }
  0x11   :  { %97 = vperm.xlu0 %626, %v71_v29   ;;  %102 = vperm.xlu1 %627, %v72_v30  }
  0x13   :  { %560 = vmatpush3.bf16.msra.mxu0 %v637_v10  ;;  %621 = vmatpush3.bf16.msra.mxu1 %v637_v10 }
  0x14   :  { %561 = vmatprep.subr.bf16.mxu0 %v638_v11  ;;  %614 = vmatprep.subr.bf16.mxu1 %v638_v11 }
  0x15   :  { %107 = vperm.xlu0 %626, %v73_v33   ;;  %112 = vperm.xlu1 %627, %v74_v34  }
  0x17   :  { %562 = vmatpush3.bf16.msra.mxu0 %v639_v14  ;;  %622 = vmatpush3.bf16.msra.mxu1 %v639_v14 }
  0x18   :  { %563 = vmatprep.subr.bf16.mxu0 %v640_v15  ;;  %615 = vmatprep.subr.bf16.mxu1 %v640_v15 }
  0x1b   :  { %564 = vmatpush3.bf16.msra.mxu0 %v641_v16  ;;  %623 = vmatpush3.bf16.msra.mxu1 %v641_v16 }
  0x1c   :  { %565 = vmatprep.subr.bf16.mxu0 %v642_v17  ;;  %616 = vmatprep.subr.bf16.mxu1 %v642_v17 }
  0x1f   :  { %566 = vmatpush3.bf16.msra.mxu0 %v643_v18  ;;  %624 = vmatpush3.bf16.msra.mxu1 %v643_v18 }
  0x20   :  { %597 = vmatprep.subr.bf16.mxu1 %v650_v21 }
  0x22   :  { %329 = vmatmul.mubr.bf16.vlgmr.msra.gmra.mxu0 %v644_v22  ;;  %353 = vmatmul.mubr.bf16.vlgmr.msra.gmra.mxu1 %v647_v23 }
  0x23   :  { %598 = vmatpush3.bf16.msra.mxu1 %v650_v21  ;;  %336 = vmatprep.mubr.bf16.mxu0 %v652_v26 }
  0x24   :  { %599 = vmatprep.subr.bf16.mxu1 %v651_v27  ;;  %601 = vmatprep.mubr.msk.bf16.mxu1 %vm283_vm0, %v654_v28 }
  0x27   :  { %600 = vmatpush3.bf16.msra.mxu1 %v651_v27 }
  0x2a   :  { %337 = vmatmul.mubr.bf16.gmra.mxu0 %v655_v31  ;;  %602 = vmatmul.mubr.msk.bf16.vlgmr.msra.gmra.mxu1 %vm283_vm0, %v656_v32 }
  0x2b   :  { %344 = vmatprep.mubr.bf16.mxu0 %v657_v35  ;;  %605 = vmatprep.mubr.msk.bf16.mxu1 %vm283_vm0, %v659_v36 }
  0x32   :  { %345 = vmatmul.mubr.bf16.gmra.mxu0 %v660_v37  ;;  %606 = vmatmul.mubr.msk.bf16.gmra.mxu1 %vm283_vm0, %v661_v38 }
  0x84   :  { %v78_v39 = vpop.permute.xlu0 %77  ;;  %v88_v40 = vpop.permute.xlu1 %87 }
  0x88   :  { %v83_v43 = vpop.permute.xlu0 %82  ;;  %v93_v46 = vpop.permute.xlu1 %92 }
  0x8c   :  { %v98_v51 = vpop.permute.xlu0 %97  ;;  %v103_v55 = vpop.permute.xlu1 %102 }
  0x90   :  { %v108_v0 = vpop.permute.xlu0 %107  ;;  %v113_v7 = vpop.permute.xlu1 %112 }
  0xe2   :  { %v567_v41 = vpop.f32.mrf.mxu0  ;;  %v585_v42 = vpop.f32.mrf.mxu1 }
  0xe4   :  { %v568_v44 = vpop.f32.mrf.mxu0  ;;  %v586_v45 = vpop.f32.mrf.mxu1 }
  0xe5   :  { %v569_v52 = vadd.f32 %v568_v44, %v567_v41  ;;  %v587_v61 = vadd.f32 %v586_v45, %v585_v42 }
  0xe6   :  { %v570_v47 = vpop.f32.mrf.mxu0  ;;  %v588_v48 = vpop.f32.mrf.mxu1 }
  0xe7   :  { %v331_v60 = vadd.f32 %v569_v52, %v78_v39  ;;  %v355_v10 = vadd.f32 %v587_v61, %v108_v0 }
  0xe8   :  { %v571_v49 = vpop.f32.mrf.mxu0  ;;  %v589_v50 = vpop.f32.mrf.mxu1 }
  0xe9   :  { %v572_v56 = vadd.f32 %v571_v49, %v570_v47  ;;  %v590_v4 = vadd.f32 %v589_v50, %v588_v48 }
  0xea   :  { %v573_v53 = vpop.f32.mrf.mxu0  ;;  %v603_v54 = vpop.f32.mrf.mxu1 }
  0xeb   :  { %v334_v3 = vadd.f32 %v572_v56, %v83_v43  ;;  %v358_v17 = vadd.f32 %v590_v4, %v113_v7 }
  0xec   :  { %v574_v57 = vpop.f32.mrf.mxu0  ;;  %v395_v58 = vpop.f32.mrf.mxu1 }
  0xed   :  { %v575_v59 = vadd.f32 %v574_v57, %v573_v53  ;;  %v396_v2 = vadd.f32 %v395_v58, %v331_v60 }
  0xee   :  { %v576_v62 = vpop.f32.mrf.mxu0  ;;  %v604_v63 = vpop.f32.mrf.mxu1 }
  0xef   :  { %v339_v1 = vadd.f32 %v575_v59, %v88_v40  ;;  %v426_v14 = vmax.f32 %v396_v2, 0.0 }
  0xf0   :  { %v577_v5 = vpop.f32.mrf.mxu0  ;;  %v398_v6 = vpop.f32.mrf.mxu1 }
  0xf1   :  { %v578_v8 = vadd.f32 %v577_v5, %v576_v62  ;;  %v399_v9 = vadd.f32 %v398_v6, %v334_v3  ;;  %v404_v13 = vadd.f32 %v603_v54, %v339_v1 }
  0xf2   :  { %v579_v11 = vpop.f32.mrf.mxu0  ;;  %v607_v12 = vpop.f32.mrf.mxu1 }
  0xf3   :  { %v342_v15 = vadd.f32 %v578_v8, %v93_v46  ;;  %v427_v16 = vmax.f32 %v399_v9, 0.0  ;;  %v420_v22 = vadd.f32 %v607_v12, %v355_v10  ;;  %v428_v26 = vmax.f32 %v404_v13, 0.0 }
  0xf4   :  { %v580_v18 = vpop.f32.mrf.mxu0  ;;  %v411_v19 = vpop.f32.mrf.mxu1 }
  0xf5   :  { %v407_v20 = vadd.f32 %v604_v63, %v342_v15  ;;  %v531_v21 = vpack.c.bf16 %v427_v16, %v426_v14  ;;  %v581_v23 = vadd.f32 %v580_v18, %v579_v11  ;;  %v432_v32 = vmax.f32 %v420_v22, 0.0 }
  0xf6   :  { %v582_v24 = vpop.f32.mrf.mxu0  ;;  %v608_v25 = vpop.f32.mrf.mxu1 }
  0xf7   :  { %v429_v27 = vmax.f32 %v407_v20, 0.0  ;;  %532 = vst [vmem:[%s816_s3] sm:$0xff] %v531_v21   ;;  %v347_v28 = vadd.f32 %v581_v23, %v98_v51  ;;  %v423_v29 = vadd.f32 %v608_v25, %v358_v17 }
  0xf8   :  { %v583_v30 = vpop.f32.mrf.mxu0  ;;  %v414_v38 = vpop.f32.mrf.mxu1 }
  0xf9   :  { %v536_v31 = vpack.c.bf16 %v429_v27, %v428_v26  ;;  %v433_v33 = vmax.f32 %v423_v29, 0.0  ;;  %v584_v34 = vadd.f32 %v583_v30, %v582_v24  ;;  %v412_v35 = vadd.f32 %v411_v19, %v347_v28 }
  0xfb   :  { %548 = vst [vmem:[%s816_s3 + $0x8] sm:$0xff] %v536_v31   ;;  %v546_v36 = vpack.c.bf16 %v433_v33, %v432_v32  ;;  %v350_v37 = vadd.f32 %v584_v34, %v103_v55  ;;  %v430_v40 = vmax.f32 %v412_v35, 0.0 }
  0xfd   :  { %550 = vst [vmem:[%s816_s3 + $0x18] sm:$0xff] %v546_v36   ;;  %v415_v39 = vadd.f32 %v414_v38, %v350_v37 }
  0xff   :  { %v431_v41 = vmax.f32 %v415_v39, 0.0 }
 0x101   :  { %v541_v42 = vpack.c.bf16 %v431_v41, %v430_v40 }
 0x103   :  { %549 = vst [vmem:[%s816_s3 + $0x10] sm:$0xff] %v541_v42  }

// kernel: forward.39
= control target key start
LH: loop header
LB: loop body
LE: loop exit
PB: predicated region body
PF: predicated region fallthrough
CT: control target
= control target key end

     0   :  { %v309_v1 = vmov 0   ;;  %vm107_vm0 = vcmask 261120   ;;  %s388_s1 = inlined_call_operand.vmem [shape: bf16[32,128], index: 1, kind: input, shape index: {}]   ;;  %s389_s0 = inlined_call_operand.vmem [shape: bf16[64,32], index: 0, kind: input, shape index: {}]   ;;  %s390_s2 = inlined_call_operand.vmem [shape: f32[64,1], index: 2, kind: input, shape index: {}]   ;;  %s391_s3 = inlined_call_operand.vmem [shape: bf16[64,128], index: 3, kind: output, shape index: {}]  }
   0x1   :  { %v303_v0 = vld [vmem:[%s388_s1 + $0x8] sm:$0xff]   ;;  %302 = vset.pattern.permute.xlu1 %v309_v1  ;;  %301 = vset.pattern.permute.xlu0 %v309_v1  ;;  %v304_v2 = vld [vmem:[%s388_s1] sm:$0xff]   ;;  %v306_v4 = vld [vmem:[%s389_s0 + $0x10] sm:$0xff]  }
   0x2   :  { %284 = vmatprep.subr.bf16.mxu0 %v303_v0  ;;  %296 = vmatprep.subr.bf16.mxu1 %v303_v0  ;;  %v305_v3 = vld [vmem:[%s389_s0] sm:$0xff]   ;;  %v307_v5 = vld [vmem:[%s389_s0 + $0x8] sm:$0xff]   ;;  %v308_v6 = vld [vmem:[%s389_s0 + $0x18] sm:$0xff]  }
   0x3   :  { %285 = vmatpush3.bf16.msra.mxu0 %v303_v0  ;;  %298 = vmatpush3.bf16.msra.mxu1 %v303_v0  ;;  %v29_v7 = vld [vmem:[%s390_s2 + $0x10] sm:$0xff]  ;;  %v27_v8 = vld [vmem:[%s390_s2] sm:$0xff]  ;;  %v30_v9 = vld [vmem:[%s390_s2 + $0x18] sm:$0xff] }
   0x4   :  { %286 = vmatprep.subr.bf16.mxu0 %v304_v2  ;;  %297 = vmatprep.subr.bf16.mxu1 %v304_v2  ;;  %v28_v10 = vld [vmem:[%s390_s2 + $0x8] sm:$0xff]  ;;  %v31_v12 = vld [vmem:[%s390_s2 + $0x20] sm:$0xff]  ;;  %v34_v13 = vld [vmem:[%s390_s2 + $0x38] sm:$0xff] }
   0x5   :  { %288 = vmatprep.mubr.msk.bf16.mxu0 %vm107_vm0, %v305_v3  ;;  %292 = vmatprep.mubr.msk.bf16.mxu1 %vm107_vm0, %v306_v4  ;;  %v32_v11 = vld [vmem:[%s390_s2 + $0x28] sm:$0xff]  ;;  %v33_v14 = vld [vmem:[%s390_s2 + $0x30] sm:$0xff] }
   0x6   :  { %47 = vperm.xlu1 %302, %v29_v7   ;;  %37 = vperm.xlu0 %301, %v27_v8  }
   0x7   :  { %287 = vmatpush3.bf16.msra.mxu0 %v304_v2  ;;  %299 = vmatpush3.bf16.msra.mxu1 %v304_v2 }
   0xa   :  { %289 = vmatmul.mubr.msk.bf16.vlgmr.msra.gmra.mxu0 %vm107_vm0, %v307_v5  ;;  %293 = vmatmul.mubr.msk.bf16.vlgmr.msra.gmra.mxu1 %vm107_vm0, %v308_v6 }
   0xb   :  { %52 = vperm.xlu1 %302, %v30_v9   ;;  %42 = vperm.xlu0 %301, %v28_v10  }
   0xf   :  { %62 = vperm.xlu1 %302, %v32_v11   ;;  %57 = vperm.xlu0 %301, %v31_v12  }
  0x13   :  { %72 = vperm.xlu1 %302, %v34_v13   ;;  %67 = vperm.xlu0 %301, %v33_v14  }
  0x81   :  { %v48_v15 = vpop.permute.xlu1 %47  ;;  %v38_v16 = vpop.permute.xlu0 %37 }
  0x86   :  { %v53_v17 = vpop.permute.xlu1 %52  ;;  %v43_v18 = vpop.permute.xlu0 %42 }
  0x8a   :  { %v63_v19 = vpop.permute.xlu1 %62  ;;  %v58_v20 = vpop.permute.xlu0 %57 }
  0x8e   :  { %v73_v25 = vpop.permute.xlu1 %72  ;;  %v68_v26 = vpop.permute.xlu0 %67 }
  0xca   :  { %v290_v21 = vpop.f32.mrf.mxu0  ;;  %v294_v22 = vpop.f32.mrf.mxu1 }
  0xcb   :  { %v163_v29 = vadd.f32 %v290_v21, %v48_v15  ;;  %v179_v30 = vadd.f32 %v294_v22, %v68_v26 }
  0xcc   :  { %v154_v23 = vpop.f32.mrf.mxu0  ;;  %v170_v24 = vpop.f32.mrf.mxu1 }
  0xcd   :  { %v155_v33 = vadd.f32 %v154_v23, %v38_v16  ;;  %v171_v34 = vadd.f32 %v170_v24, %v58_v20 }
  0xce   :  { %v291_v27 = vpop.f32.mrf.mxu0  ;;  %v295_v28 = vpop.f32.mrf.mxu1 }
  0xcf   :  { %v166_v31 = vadd.f32 %v291_v27, %v53_v17  ;;  %v182_v32 = vadd.f32 %v295_v28, %v73_v25 }
  0xd0   :  { %v157_v35 = vpop.f32.mrf.mxu0  ;;  %v173_v36 = vpop.f32.mrf.mxu1 }
  0xd1   :  { %v263_v37 = vpack.c.bf16 %v166_v31, %v163_v29  ;;  %v273_v38 = vpack.c.bf16 %v182_v32, %v179_v30  ;;  %v158_v39 = vadd.f32 %v157_v35, %v43_v18  ;;  %v174_v40 = vadd.f32 %v173_v36, %v63_v19 }
  0xd3   :  { %275 = vst [vmem:[%s391_s3 + $0x8] sm:$0xff] %v263_v37   ;;  %277 = vst [vmem:[%s391_s3 + $0x18] sm:$0xff] %v273_v38   ;;  %v258_v41 = vpack.c.bf16 %v158_v39, %v155_v33  ;;  %v268_v42 = vpack.c.bf16 %v174_v40, %v171_v34 }
  0xd5   :  { %259 = vst [vmem:[%s391_s3] sm:$0xff] %v258_v41   ;;  %276 = vst [vmem:[%s391_s3 + $0x10] sm:$0xff] %v268_v42  }

// kernel: forward.40
= control target key start
LH: loop header
LB: loop body
LE: loop exit
PB: predicated region body
PF: predicated region fallthrough
CT: control target
= control target key end

     0   :  { %v1059_v1 = vmov 0   ;;  %vm478_vm0 = vcmask 523264   ;;  %s1319_s1 = inlined_call_operand.vmem [shape: bf16[576,128], index: 1, kind: input, shape index: {}]   ;;  %s1320_s0 = inlined_call_operand.vmem [shape: bf16[64,576], index: 0, kind: input, shape index: {}]   ;;  %s1321_s2 = inlined_call_operand.vmem [shape: f32[64,1], index: 2, kind: input, shape index: {}]   ;;  %s1322_s3 = inlined_call_operand.vmem [shape: bf16[64,128], index: 3, kind: input, shape index: {}, may-alias: {3,4}]   ;;  %s1323_s4 = inlined_call_operand.vmem [shape: bf16[64,128], index: 4, kind: output, shape index: {}, may-alias: {3,4}]  }
   0x1   :  { %v995_v0 = vld [vmem:[%s1319_s1 + $0x78] sm:$0xff]   ;;  %993 = vset.pattern.permute.xlu0 %v1059_v1  ;;  %994 = vset.pattern.permute.xlu1 %v1059_v1  ;;  %v999_v5 = vld [vmem:[%s1319_s1 + $0x70] sm:$0xff]   ;;  %v1003_v9 = vld [vmem:[%s1319_s1 + $0x68] sm:$0xff]  }
   0x2   :  { %v996_v2 = vld [vmem:[%s1319_s1 + $0xf8] sm:$0xff]   ;;  %880 = vmatprep.subr.bf16.mxu0 %v995_v0  ;;  %v1000_v6 = vld [vmem:[%s1319_s1 + $0xf0] sm:$0xff]   ;;  %v1004_v10 = vld [vmem:[%s1319_s1 + $0xe8] sm:$0xff]  }
   0x3   :  { %v997_v3 = vld [vmem:[%s1319_s1 + $0x38] sm:$0xff]   ;;  %920 = vmatprep.subr.bf16.mxu1 %v996_v2  ;;  %v1001_v7 = vld [vmem:[%s1319_s1 + $0x30] sm:$0xff]   ;;  %v1005_v11 = vld [vmem:[%s1319_s1 + $0x28] sm:$0xff]  }
   0x4   :  { %v998_v4 = vld [vmem:[%s1319_s1 + $0xb8] sm:$0xff]   ;;  %881 = vmatpush3.bf16.msra.mxu0 %v997_v3  ;;  %v1002_v8 = vld [vmem:[%s1319_s1 + $0xb0] sm:$0xff]   ;;  %v1006_v12 = vld [vmem:[%s1319_s1 + $0xa8] sm:$0xff]  }
   0x5   :  { %921 = vmatpush3.bf16.msra.mxu1 %v998_v4  ;;  %882 = vmatprep.subr.bf16.mxu0 %v999_v5  ;;  %v1007_v13 = vld [vmem:[%s1319_s1 + $0x60] sm:$0xff]   ;;  %v1011_v17 = vld [vmem:[%s1319_s1 + $0x58] sm:$0xff]   ;;  %v1015_v21 = vld [vmem:[%s1319_s1 + $0x50] sm:$0xff]  }
   0x6   :  { %922 = vmatprep.subr.bf16.mxu1 %v1000_v6  ;;  %v1008_v14 = vld [vmem:[%s1319_s1 + $0xe0] sm:$0xff]   ;;  %v1012_v18 = vld [vmem:[%s1319_s1 + $0xd8] sm:$0xff]   ;;  %v1016_v22 = vld [vmem:[%s1319_s1 + $0xd0] sm:$0xff]  }
   0x7   :  { %v1009_v15 = vld [vmem:[%s1319_s1 + $0x20] sm:$0xff]   ;;  %v1013_v19 = vld [vmem:[%s1319_s1 + $0x18] sm:$0xff]   ;;  %v1017_v23 = vld [vmem:[%s1319_s1 + $0x10] sm:$0xff]  }
   0x8   :  { %883 = vmatpush3.bf16.msra.mxu0 %v1001_v7  ;;  %v1010_v16 = vld [vmem:[%s1319_s1 + $0xa0] sm:$0xff]   ;;  %v1014_v20 = vld [vmem:[%s1319_s1 + $0x98] sm:$0xff]   ;;  %v1018_v24 = vld [vmem:[%s1319_s1 + $0x90] sm:$0xff]  }
   0x9   :  { %923 = vmatpush3.bf16.msra.mxu1 %v1002_v8  ;;  %884 = vmatprep.subr.bf16.mxu0 %v1003_v9  ;;  %v1019_v25 = vld [vmem:[%s1319_s1 + $0x48] sm:$0xff]   ;;  %v1023_v29 = vld [vmem:[%s1319_s1 + $0x40] sm:$0xff]   ;;  %v1033_v37 = vld [vmem:[%s1319_s1 + $0x118] sm:$0xff]  }
   0xa   :  { %924 = vmatprep.subr.bf16.mxu1 %v1004_v10  ;;  %v1020_v26 = vld [vmem:[%s1319_s1 + $0xc8] sm:$0xff]   ;;  %v1024_v30 = vld [vmem:[%s1319_s1 + $0xc0] sm:$0xff]   ;;  %v1040_v40 = vld [vmem:[%s1319_s1 + $0x110] sm:$0xff]  }
   0xb   :  { %v1021_v27 = vld [vmem:[%s1319_s1 + $0x8] sm:$0xff]   ;;  %v1025_v31 = vld [vmem:[%s1319_s1] sm:$0xff]   ;;  %v1043_v44 = vld [vmem:[%s1320_s0 + $0x5c] ss:$20 sps:$4 sm:$0xff]  }
   0xc   :  { %885 = vmatpush3.bf16.msra.mxu0 %v1005_v11  ;;  %v1022_v28 = vld [vmem:[%s1319_s1 + $0x88] sm:$0xff]   ;;  %v1026_v32 = vld [vmem:[%s1319_s1 + $0x80] sm:$0xff]   ;;  %v1048_v49 = vld [vmem:[%s1320_s0 + $0x7c] ss:$20 sps:$4 sm:$0xff]  }
   0xd   :  { %925 = vmatpush3.bf16.msra.mxu1 %v1006_v12  ;;  %886 = vmatprep.subr.bf16.mxu0 %v1007_v13  ;;  %v1027_v33 = vld [vmem:[%s1320_s0] ss:$20 sps:$4 sm:$0xff]   ;;  %v1029_v34 = vld [vmem:[%s1320_s0 + $0x4] ss:$20 sps:$4 sm:$0xff]   ;;  %v1030_v35 = vld [vmem:[%s1320_s0 + $0x8] ss:$20 sps:$4 sm:$0xff]  }
   0xe   :  { %926 = vmatprep.subr.bf16.mxu1 %v1008_v14  ;;  %v1032_v36 = vld [vmem:[%s1320_s0 + $0xc] ss:$20 sps:$4 sm:$0xff]   ;;  %523 = vmatprep.mubr.bf16.mxu0 %v1029_v34  ;;  %v1036_v39 = vld [vmem:[%s1320_s0 + $0x34] ss:$20 sps:$4 sm:$0xff]   ;;  %v1039_v42 = vld [vmem:[%s1320_s0 + $0x30] ss:$20 sps:$4 sm:$0xff]  }
   0xf   :  { %588 = vmatprep.mubr.bf16.mxu1 %v1032_v36  ;;  %v1034_v38 = vld [vmem:[%s1320_s0 + $0x2c] ss:$20 sps:$4 sm:$0xff]   ;;  %v1038_v41 = vld [vmem:[%s1320_s0 + $0x28] ss:$20 sps:$4 sm:$0xff]   ;;  %v1045_v47 = vld [vmem:[%s1320_s0 + $0x50] ss:$20 sps:$4 sm:$0xff]  }
  0x10   :  { %887 = vmatpush3.bf16.msra.mxu0 %v1009_v15  ;;  %v1041_v43 = vld [vmem:[%s1320_s0 + $0x54] ss:$20 sps:$4 sm:$0xff]   ;;  %v1054_v46 = vld [vmem:[%s1319_s1 + $0x100] sm:$0xff]   ;;  %v1046_v48 = vld [vmem:[%s1320_s0 + $0x58] ss:$20 sps:$4 sm:$0xff]  }
  0x11   :  { %927 = vmatpush3.bf16.msra.mxu1 %v1010_v16  ;;  %888 = vmatprep.subr.bf16.mxu0 %v1011_v17  ;;  %v1047_v45 = vld [vmem:[%s1319_s1 + $0x108] sm:$0xff]   ;;  %v1050_v50 = vld [vmem:[%s1320_s0 + $0x84] ss:$20 sps:$4 sm:$0xff]   ;;  %v116_v52 = vld [vmem:[%s1321_s2 + $0x10] sm:$0xff] }
  0x12   :  { %928 = vmatprep.subr.bf16.mxu1 %v1012_v18  ;;  %v114_v51 = vld [vmem:[%s1321_s2] sm:$0xff]  ;;  %v115_v53 = vld [vmem:[%s1321_s2 + $0x8] sm:$0xff]  ;;  %134 = vperm.xlu1 %994, %v116_v52   ;;  %v117_v54 = vld [vmem:[%s1321_s2 + $0x18] sm:$0xff] }
  0x13   :  { %124 = vperm.xlu0 %993, %v114_v51   ;;  %v1052_v55 = vld [vmem:[%s1320_s0 + $0x78] ss:$20 sps:$4 sm:$0xff]   ;;  %v1053_v56 = vld [vmem:[%s1320_s0 + $0x80] ss:$20 sps:$4 sm:$0xff]   ;;  %v1055_v57 = vld [vmem:[%s1320_s0 + $0x10] ss:$20 sps:$4 sm:$0xff]  }
  0x14   :  { %889 = vmatpush3.bf16.msra.mxu0 %v1013_v19  ;;  %v118_v58 = vld [vmem:[%s1321_s2 + $0x20] sm:$0xff]  ;;  %v119_v60 = vld [vmem:[%s1321_s2 + $0x28] sm:$0xff]  ;;  %v120_v61 = vld [vmem:[%s1321_s2 + $0x30] sm:$0xff] }
  0x15   :  { %929 = vmatpush3.bf16.msra.mxu1 %v1014_v20  ;;  %890 = vmatprep.subr.bf16.mxu0 %v1015_v21  ;;  %v1056_v59 = vld [vmem:[%s1320_s0 + $0x60] ss:$20 sps:$4 sm:$0xff]   ;;  %v121_v62 = vld [vmem:[%s1321_s2 + $0x38] sm:$0xff] }
  0x16   :  { %930 = vmatprep.subr.bf16.mxu1 %v1016_v22  ;;  %139 = vperm.xlu1 %994, %v117_v54   ;;  %v1057_v63 = vld [vmem:[%s1320_s0 + $0x38] ss:$20 sps:$4 sm:$0xff]   ;;  %v1058_v0 = vld [vmem:[%s1320_s0 + $0x88] ss:$20 sps:$4 sm:$0xff]   ;;  %v839_v52 = vld [vmem:[%s1322_s3] sm:$0xff]  }
  0x17   :  { %129 = vperm.xlu0 %993, %v115_v53  }
  0x18   :  { %891 = vmatpush3.bf16.msra.mxu0 %v1017_v23 }
  0x19   :  { %931 = vmatpush3.bf16.msra.mxu1 %v1018_v24  ;;  %892 = vmatprep.subr.bf16.mxu0 %v1019_v25 }
  0x1a   :  { %932 = vmatprep.subr.bf16.mxu1 %v1020_v26  ;;  %149 = vperm.xlu1 %994, %v119_v60  }
  0x1b   :  { %144 = vperm.xlu0 %993, %v118_v58  }
  0x1c   :  { %893 = vmatpush3.bf16.msra.mxu0 %v1021_v27 }
  0x1d   :  { %933 = vmatpush3.bf16.msra.mxu1 %v1022_v28  ;;  %894 = vmatprep.subr.bf16.mxu0 %v1023_v29 }
  0x1e   :  { %934 = vmatprep.subr.bf16.mxu1 %v1024_v30  ;;  %159 = vperm.xlu1 %994, %v121_v62  }
  0x1f   :  { %154 = vperm.xlu0 %993, %v120_v61  }
  0x20   :  { %895 = vmatpush3.bf16.msra.mxu0 %v1025_v31 }
  0x21   :  { %935 = vmatpush3.bf16.msra.mxu1 %v1026_v32  ;;  %968 = vmatprep.subr.bf16.mxu0 %v1033_v37 }
  0x22   :  { %984 = vmatprep.subr.bf16.mxu1 %v1033_v37 }
  0x23   :  { %524 = vmatmul.mubr.bf16.vlgmr.msra.gmra.mxu0 %v1027_v33 }
  0x24   :  { %589 = vmatmul.mubr.bf16.vlgmr.msra.gmra.mxu1 %v1030_v35  ;;  %969 = vmatpush3.bf16.msra.mxu0 %v1033_v37 }
  0x25   :  { %988 = vmatpush3.bf16.msra.mxu1 %v1033_v37  ;;  %531 = vmatprep.mubr.bf16.mxu0 %v1034_v38  ;;  %v1288_v37 = vld [vmem:[%s1322_s3 + $0x8] sm:$0xff]  }
  0x26   :  { %596 = vmatprep.mubr.bf16.mxu1 %v1036_v39  ;;  %970 = vmatprep.subr.bf16.mxu0 %v1040_v40  ;;  %v844_v51 = vunpack.c.l.bf16 %v1288_v37 }
  0x27   :  { %985 = vmatprep.subr.bf16.mxu1 %v1040_v40 }
  0x28   :  { %971 = vmatpush3.bf16.msra.mxu0 %v1040_v40 }
  0x29   :  { %989 = vmatpush3.bf16.msra.mxu1 %v1040_v40  ;;  %972 = vmatprep.subr.bf16.mxu0 %v1047_v45 }
  0x2a   :  { %986 = vmatprep.subr.bf16.mxu1 %v1047_v45 }
  0x2b   :  { %532 = vmatmul.mubr.bf16.gmra.mxu0 %v1038_v41 }
  0x2c   :  { %597 = vmatmul.mubr.bf16.gmra.mxu1 %v1039_v42  ;;  %539 = vmatprep.mubr.bf16.mxu0 %v1041_v43  ;;  %v1293_v42 = vld [vmem:[%s1322_s3 + $0x18] sm:$0xff]  }
  0x2d   :  { %604 = vmatprep.mubr.bf16.mxu1 %v1043_v44  ;;  %973 = vmatpush3.bf16.msra.mxu0 %v1047_v45 }
  0x2e   :  { %990 = vmatpush3.bf16.msra.mxu1 %v1047_v45  ;;  %974 = vmatprep.subr.bf16.mxu0 %v1054_v46 }
  0x2f   :  { %987 = vmatprep.subr.bf16.mxu1 %v1054_v46 }
  0x31   :  { %975 = vmatpush3.bf16.msra.mxu0 %v1054_v46 }
  0x32   :  { %991 = vmatpush3.bf16.msra.mxu1 %v1054_v46 }
  0x33   :  { %540 = vmatmul.mubr.bf16.gmra.mxu0 %v1045_v47 }
  0x34   :  { %605 = vmatmul.mubr.bf16.gmra.mxu1 %v1046_v48  ;;  %547 = vmatprep.mubr.bf16.mxu0 %v1048_v49 }
  0x35   :  { %612 = vmatprep.mubr.bf16.mxu1 %v1050_v50 }
  0x3b   :  { %548 = vmatmul.mubr.bf16.gmra.mxu0 %v1052_v55 }
  0x3c   :  { %613 = vmatmul.mubr.bf16.gmra.mxu1 %v1053_v56  ;;  %976 = vmatprep.mubr.msk.bf16.mxu0 %vm478_vm0, %v1055_v57  ;;  %v852_v57 = vunpack.c.l.bf16 %v1293_v42 }
  0x3d   :  { %980 = vmatprep.mubr.msk.bf16.mxu1 %vm478_vm0, %v1056_v59 }
  0x43   :  { %977 = vmatmul.mubr.msk.bf16.vlgmr.msra.gmra.mxu0 %vm478_vm0, %v1057_v63 }
  0x44   :  { %981 = vmatmul.mubr.msk.bf16.vlgmr.msra.gmra.mxu1 %vm478_vm0, %v1058_v0 }
  0x8d   :  { %v135_v16 = vpop.permute.xlu1 %134 }
  0x8e   :  { %v125_v13 = vpop.permute.xlu0 %124 }
  0x91   :  { %v140_v24 = vpop.permute.xlu1 %139 }
  0x92   :  { %v130_v21 = vpop.permute.xlu0 %129 }
  0x95   :  { %v150_v35 = vpop.permute.xlu1 %149 }
  0x96   :  { %v145_v27 = vpop.permute.xlu0 %144 }
  0x9a   :  { %v155_v45 = vpop.permute.xlu0 %154 }
  0xe3   :  { %v896_v1 = vpop.f32.mrf.mxu0 }
  0xe4   :  { %v936_v2 = vpop.f32.mrf.mxu1 }
  0xe5   :  { %v897_v3 = vpop.f32.mrf.mxu0 }
  0xe6   :  { %v937_v4 = vpop.f32.mrf.mxu1  ;;  %v898_v31 = vadd.f32 %v897_v3, %v896_v1  ;;  %v160_v1 = vpop.permute.xlu1 %159 }
  0xe7   :  { %v899_v5 = vpop.f32.mrf.mxu0  ;;  %v938_v53 = vadd.f32 %v937_v4, %v936_v2 }
  0xe8   :  { %v1281_v6 = vpop.f32.mrf.mxu1  ;;  %v526_v43 = vadd.f32 %v898_v31, %v125_v13 }
  0xe9   :  { %v900_v7 = vpop.f32.mrf.mxu0 }
  0xea   :  { %v1283_v8 = vpop.f32.mrf.mxu1  ;;  %v901_v44 = vadd.f32 %v900_v7, %v899_v5  ;;  %v591_v5 = vadd.f32 %v938_v53, %v526_v43  ;;  %v840_v7 = vunpack.c.l.bf16 %v839_v52 }
  0xeb   :  { %v902_v9 = vpop.f32.mrf.mxu0 }
  0xec   :  { %v942_v10 = vpop.f32.mrf.mxu1  ;;  %v529_v63 = vadd.f32 %v901_v44, %v130_v21 }
  0xed   :  { %v903_v11 = vpop.f32.mrf.mxu0 }
  0xee   :  { %v943_v12 = vpop.f32.mrf.mxu1  ;;  %v904_v29 = vadd.f32 %v903_v11, %v902_v9 }
  0xef   :  { %v905_v14 = vpop.f32.mrf.mxu0  ;;  %v944_v47 = vadd.f32 %v943_v12, %v942_v10  ;;  %v875_v12 = vld [vmem:[%s1322_s3 + $0x10] sm:$0xff]  }
  0xf0   :  { %v945_v15 = vpop.f32.mrf.mxu1  ;;  %v534_v38 = vadd.f32 %v904_v29, %v135_v16 }
  0xf1   :  { %v906_v17 = vpop.f32.mrf.mxu0 }
  0xf2   :  { %v946_v18 = vpop.f32.mrf.mxu1  ;;  %v907_v39 = vadd.f32 %v906_v17, %v905_v14  ;;  %v599_v61 = vadd.f32 %v944_v47, %v534_v38 }
  0xf3   :  { %v908_v19 = vpop.f32.mrf.mxu0  ;;  %v947_v9 = vadd.f32 %v946_v18, %v945_v15 }
  0xf4   :  { %v948_v20 = vpop.f32.mrf.mxu1  ;;  %v537_v58 = vadd.f32 %v907_v39, %v140_v24 }
  0xf5   :  { %v909_v22 = vpop.f32.mrf.mxu0 }
  0xf6   :  { %v949_v23 = vpop.f32.mrf.mxu1  ;;  %v910_v34 = vadd.f32 %v909_v22, %v908_v19  ;;  %v845_v19 = vunpack.c.h.bf16 %v1288_v37  ;;  %v602_v15 = vadd.f32 %v947_v9, %v537_v58 }
  0xf7   :  { %v911_v25 = vpop.f32.mrf.mxu0  ;;  %v950_v0 = vadd.f32 %v949_v23, %v948_v20  ;;  %v941_v20 = vadd.f32 %v1283_v8, %v1281_v6  ;;  %v849_v6 = vunpack.c.h.bf16 %v875_v12 }
  0xf8   :  { %v951_v26 = vpop.f32.mrf.mxu1  ;;  %v542_v54 = vadd.f32 %v910_v34, %v145_v27  ;;  %v841_v34 = vunpack.c.h.bf16 %v839_v52 }
  0xf9   :  { %v912_v28 = vpop.f32.mrf.mxu0 }
  0xfa   :  { %v952_v30 = vpop.f32.mrf.mxu1  ;;  %v913_v55 = vadd.f32 %v912_v28, %v911_v25  ;;  %v607_v17 = vadd.f32 %v950_v0, %v542_v54  ;;  %v848_v25 = vunpack.c.l.bf16 %v875_v12  ;;  %v853_v28 = vunpack.c.h.bf16 %v1293_v42 }
  0xfb   :  { %v914_v32 = vpop.f32.mrf.mxu0  ;;  %v953_v23 = vadd.f32 %v952_v30, %v951_v26 }
  0xfc   :  { %v954_v33 = vpop.f32.mrf.mxu1  ;;  %v545_v13 = vadd.f32 %v913_v55, %v150_v35 }
  0xfd   :  { %v915_v36 = vpop.f32.mrf.mxu0 }
  0xfe   :  { %v916_v40 = vadd.f32 %v915_v36, %v914_v32  ;;  %v955_v41 = vpop.f32.mrf.mxu1  ;;  %v610_v38 = vadd.f32 %v953_v23, %v545_v13 }
  0xff   :  { %v917_v46 = vpop.f32.mrf.mxu0  ;;  %v956_v49 = vadd.f32 %v955_v41, %v954_v33  ;;  %v594_v33 = vadd.f32 %v941_v20, %v529_v63 }
 0x100   :  { %v550_v48 = vadd.f32 %v916_v40, %v155_v45  ;;  %v957_v50 = vpop.f32.mrf.mxu1 }
 0x101   :  { %v918_v56 = vpop.f32.mrf.mxu0 }
 0x102   :  { %v919_v59 = vadd.f32 %v918_v56, %v917_v46  ;;  %v958_v60 = vpop.f32.mrf.mxu1  ;;  %v615_v62 = vadd.f32 %v956_v49, %v550_v48 }
 0x103   :  { %v978_v3 = vpop.f32.mrf.mxu0  ;;  %v959_v11 = vadd.f32 %v958_v60, %v957_v50 }
 0x104   :  { %v553_v10 = vadd.f32 %v919_v59, %v160_v1  ;;  %v664_v2 = vadd.f32 %v978_v3, %v599_v61  ;;  %v982_v4 = vpop.f32.mrf.mxu1 }
 0x105   :  { %v680_v14 = vadd.f32 %v982_v4, %v615_v62  ;;  %v655_v16 = vpop.f32.mrf.mxu0 }
 0x106   :  { %v656_v21 = vadd.f32 %v655_v16, %v591_v5  ;;  %v671_v22 = vpop.f32.mrf.mxu1  ;;  %v618_v18 = vadd.f32 %v959_v11, %v553_v10  ;;  %v704_v29 = vadd.f32 %v844_v51, %v664_v2 }
 0x107   :  { %v672_v24 = vadd.f32 %v671_v22, %v607_v17  ;;  %v979_v27 = vpop.f32.mrf.mxu0  ;;  %v708_v35 = vadd.f32 %v852_v57, %v680_v14 }
 0x108   :  { %v667_v31 = vadd.f32 %v979_v27, %v602_v15  ;;  %v983_v32 = vpop.f32.mrf.mxu1  ;;  %v702_v8 = vadd.f32 %v840_v7, %v656_v21  ;;  %v712_v44 = vmax.f32 %v704_v29, 0.0 }
 0x109   :  { %v683_v36 = vadd.f32 %v983_v32, %v618_v18  ;;  %v658_v37 = vpop.f32.mrf.mxu0  ;;  %v706_v26 = vadd.f32 %v848_v25, %v672_v24  ;;  %v716_v46 = vmax.f32 %v708_v35, 0.0 }
 0x10a   :  { %v705_v39 = vadd.f32 %v845_v19, %v667_v31  ;;  %v659_v40 = vadd.f32 %v658_v37, %v594_v33  ;;  %v674_v41 = vpop.f32.mrf.mxu1  ;;  %v710_v49 = vmax.f32 %v702_v8, 0.0 }
 0x10b   :  { %v709_v30 = vadd.f32 %v853_v28, %v683_v36  ;;  %v675_v43 = vadd.f32 %v674_v41, %v610_v38  ;;  %v714_v52 = vmax.f32 %v706_v26, 0.0 }
 0x10c   :  { %v713_v45 = vmax.f32 %v705_v39, 0.0  ;;  %v703_v42 = vadd.f32 %v841_v34, %v659_v40 }
 0x10d   :  { %v717_v47 = vmax.f32 %v709_v30, 0.0  ;;  %v707_v48 = vadd.f32 %v849_v6, %v675_v43 }
 0x10e   :  { %v862_v50 = vpack.c.bf16 %v713_v45, %v712_v44  ;;  %v711_v51 = vmax.f32 %v703_v42, 0.0 }
 0x10f   :  { %v872_v53 = vpack.c.bf16 %v717_v47, %v716_v46  ;;  %v715_v54 = vmax.f32 %v707_v48, 0.0 }
 0x110   :  { %877 = vst [vmem:[%s1323_s4 + $0x8] sm:$0xff] %v862_v50   ;;  %v857_v55 = vpack.c.bf16 %v711_v51, %v710_v49 }
 0x111   :  { %879 = vst [vmem:[%s1323_s4 + $0x18] sm:$0xff] %v872_v53   ;;  %v867_v56 = vpack.c.bf16 %v715_v54, %v714_v52 }
 0x112   :  { %858 = vst [vmem:[%s1323_s4] sm:$0xff] %v857_v55  }
 0x113   :  { %878 = vst [vmem:[%s1323_s4 + $0x10] sm:$0xff] %v867_v56  }

// kernel: forward.41
= control target key start
LH: loop header
LB: loop body
LE: loop exit
PB: predicated region body
PF: predicated region fallthrough
CT: control target
= control target key end

     0   :  { %v1013_v1 = vmov 0   ;;  %vm475_vm0 = vcmask 523264   ;;  %s1245_s1 = inlined_call_operand.vmem [shape: bf16[576,128], index: 1, kind: input, shape index: {}]   ;;  %s1246_s0 = inlined_call_operand.vmem [shape: bf16[64,576], index: 0, kind: input, shape index: {}]   ;;  %s1247_s2 = inlined_call_operand.vmem [shape: f32[64,1], index: 2, kind: input, shape index: {}]   ;;  %s1248_s3 = inlined_call_operand.vmem [shape: bf16[64,128], index: 3, kind: output, shape index: {}]  }
   0x1   :  { %v949_v0 = vld [vmem:[%s1245_s1 + $0x78] sm:$0xff]   ;;  %947 = vset.pattern.permute.xlu0 %v1013_v1  ;;  %948 = vset.pattern.permute.xlu1 %v1013_v1  ;;  %v953_v5 = vld [vmem:[%s1245_s1 + $0x70] sm:$0xff]   ;;  %v957_v9 = vld [vmem:[%s1245_s1 + $0x68] sm:$0xff]  }
   0x2   :  { %v950_v2 = vld [vmem:[%s1245_s1 + $0xf8] sm:$0xff]   ;;  %834 = vmatprep.subr.bf16.mxu0 %v949_v0  ;;  %v954_v6 = vld [vmem:[%s1245_s1 + $0xf0] sm:$0xff]   ;;  %v958_v10 = vld [vmem:[%s1245_s1 + $0xe8] sm:$0xff]  }
   0x3   :  { %v951_v3 = vld [vmem:[%s1245_s1 + $0x38] sm:$0xff]   ;;  %874 = vmatprep.subr.bf16.mxu1 %v950_v2  ;;  %v955_v7 = vld [vmem:[%s1245_s1 + $0x30] sm:$0xff]   ;;  %v959_v11 = vld [vmem:[%s1245_s1 + $0x28] sm:$0xff]  }
   0x4   :  { %v952_v4 = vld [vmem:[%s1245_s1 + $0xb8] sm:$0xff]   ;;  %835 = vmatpush3.bf16.msra.mxu0 %v951_v3  ;;  %v956_v8 = vld [vmem:[%s1245_s1 + $0xb0] sm:$0xff]   ;;  %v960_v12 = vld [vmem:[%s1245_s1 + $0xa8] sm:$0xff]  }
   0x5   :  { %875 = vmatpush3.bf16.msra.mxu1 %v952_v4  ;;  %836 = vmatprep.subr.bf16.mxu0 %v953_v5  ;;  %v961_v13 = vld [vmem:[%s1245_s1 + $0x60] sm:$0xff]   ;;  %v965_v17 = vld [vmem:[%s1245_s1 + $0x58] sm:$0xff]   ;;  %v969_v21 = vld [vmem:[%s1245_s1 + $0x50] sm:$0xff]  }
   0x6   :  { %876 = vmatprep.subr.bf16.mxu1 %v954_v6  ;;  %v962_v14 = vld [vmem:[%s1245_s1 + $0xe0] sm:$0xff]   ;;  %v966_v18 = vld [vmem:[%s1245_s1 + $0xd8] sm:$0xff]   ;;  %v970_v22 = vld [vmem:[%s1245_s1 + $0xd0] sm:$0xff]  }
   0x7   :  { %v963_v15 = vld [vmem:[%s1245_s1 + $0x20] sm:$0xff]   ;;  %v967_v19 = vld [vmem:[%s1245_s1 + $0x18] sm:$0xff]   ;;  %v971_v23 = vld [vmem:[%s1245_s1 + $0x10] sm:$0xff]  }
   0x8   :  { %837 = vmatpush3.bf16.msra.mxu0 %v955_v7  ;;  %v964_v16 = vld [vmem:[%s1245_s1 + $0xa0] sm:$0xff]   ;;  %v968_v20 = vld [vmem:[%s1245_s1 + $0x98] sm:$0xff]   ;;  %v972_v24 = vld [vmem:[%s1245_s1 + $0x90] sm:$0xff]  }
   0x9   :  { %877 = vmatpush3.bf16.msra.mxu1 %v956_v8  ;;  %838 = vmatprep.subr.bf16.mxu0 %v957_v9  ;;  %v973_v25 = vld [vmem:[%s1245_s1 + $0x48] sm:$0xff]   ;;  %v977_v29 = vld [vmem:[%s1245_s1 + $0x40] sm:$0xff]   ;;  %v987_v37 = vld [vmem:[%s1245_s1 + $0x118] sm:$0xff]  }
   0xa   :  { %878 = vmatprep.subr.bf16.mxu1 %v958_v10  ;;  %v974_v26 = vld [vmem:[%s1245_s1 + $0xc8] sm:$0xff]   ;;  %v978_v30 = vld [vmem:[%s1245_s1 + $0xc0] sm:$0xff]   ;;  %v994_v40 = vld [vmem:[%s1245_s1 + $0x110] sm:$0xff]  }
   0xb   :  { %v975_v27 = vld [vmem:[%s1245_s1 + $0x8] sm:$0xff]   ;;  %v979_v31 = vld [vmem:[%s1245_s1] sm:$0xff]   ;;  %v997_v44 = vld [vmem:[%s1246_s0 + $0x5c] ss:$20 sps:$4 sm:$0xff]  }
   0xc   :  { %839 = vmatpush3.bf16.msra.mxu0 %v959_v11  ;;  %v976_v28 = vld [vmem:[%s1245_s1 + $0x88] sm:$0xff]   ;;  %v980_v32 = vld [vmem:[%s1245_s1 + $0x80] sm:$0xff]   ;;  %v1002_v49 = vld [vmem:[%s1246_s0 + $0x7c] ss:$20 sps:$4 sm:$0xff]  }
   0xd   :  { %879 = vmatpush3.bf16.msra.mxu1 %v960_v12  ;;  %840 = vmatprep.subr.bf16.mxu0 %v961_v13  ;;  %v981_v33 = vld [vmem:[%s1246_s0] ss:$20 sps:$4 sm:$0xff]   ;;  %v983_v34 = vld [vmem:[%s1246_s0 + $0x4] ss:$20 sps:$4 sm:$0xff]   ;;  %v984_v35 = vld [vmem:[%s1246_s0 + $0x8] ss:$20 sps:$4 sm:$0xff]  }
   0xe   :  { %880 = vmatprep.subr.bf16.mxu1 %v962_v14  ;;  %v986_v36 = vld [vmem:[%s1246_s0 + $0xc] ss:$20 sps:$4 sm:$0xff]   ;;  %520 = vmatprep.mubr.bf16.mxu0 %v983_v34  ;;  %v990_v39 = vld [vmem:[%s1246_s0 + $0x34] ss:$20 sps:$4 sm:$0xff]   ;;  %v993_v42 = vld [vmem:[%s1246_s0 + $0x30] ss:$20 sps:$4 sm:$0xff]  }
   0xf   :  { %585 = vmatprep.mubr.bf16.mxu1 %v986_v36  ;;  %v988_v38 = vld [vmem:[%s1246_s0 + $0x2c] ss:$20 sps:$4 sm:$0xff]   ;;  %v992_v41 = vld [vmem:[%s1246_s0 + $0x28] ss:$20 sps:$4 sm:$0xff]   ;;  %v999_v47 = vld [vmem:[%s1246_s0 + $0x50] ss:$20 sps:$4 sm:$0xff]  }
  0x10   :  { %841 = vmatpush3.bf16.msra.mxu0 %v963_v15  ;;  %v995_v43 = vld [vmem:[%s1246_s0 + $0x54] ss:$20 sps:$4 sm:$0xff]   ;;  %v1008_v46 = vld [vmem:[%s1245_s1 + $0x100] sm:$0xff]   ;;  %v1000_v48 = vld [vmem:[%s1246_s0 + $0x58] ss:$20 sps:$4 sm:$0xff]  }
  0x11   :  { %881 = vmatpush3.bf16.msra.mxu1 %v964_v16  ;;  %842 = vmatprep.subr.bf16.mxu0 %v965_v17  ;;  %v1001_v45 = vld [vmem:[%s1245_s1 + $0x108] sm:$0xff]   ;;  %v1004_v50 = vld [vmem:[%s1246_s0 + $0x84] ss:$20 sps:$4 sm:$0xff]   ;;  %v113_v52 = vld [vmem:[%s1247_s2 + $0x10] sm:$0xff] }
  0x12   :  { %882 = vmatprep.subr.bf16.mxu1 %v966_v18  ;;  %v111_v51 = vld [vmem:[%s1247_s2] sm:$0xff]  ;;  %v112_v53 = vld [vmem:[%s1247_s2 + $0x8] sm:$0xff]  ;;  %131 = vperm.xlu1 %948, %v113_v52   ;;  %v114_v54 = vld [vmem:[%s1247_s2 + $0x18] sm:$0xff] }
  0x13   :  { %121 = vperm.xlu0 %947, %v111_v51   ;;  %v1006_v55 = vld [vmem:[%s1246_s0 + $0x78] ss:$20 sps:$4 sm:$0xff]   ;;  %v1007_v56 = vld [vmem:[%s1246_s0 + $0x80] ss:$20 sps:$4 sm:$0xff]   ;;  %v1009_v57 = vld [vmem:[%s1246_s0 + $0x10] ss:$20 sps:$4 sm:$0xff]  }
  0x14   :  { %843 = vmatpush3.bf16.msra.mxu0 %v967_v19  ;;  %v115_v58 = vld [vmem:[%s1247_s2 + $0x20] sm:$0xff]  ;;  %v116_v60 = vld [vmem:[%s1247_s2 + $0x28] sm:$0xff]  ;;  %v117_v61 = vld [vmem:[%s1247_s2 + $0x30] sm:$0xff] }
  0x15   :  { %883 = vmatpush3.bf16.msra.mxu1 %v968_v20  ;;  %844 = vmatprep.subr.bf16.mxu0 %v969_v21  ;;  %v1010_v59 = vld [vmem:[%s1246_s0 + $0x60] ss:$20 sps:$4 sm:$0xff]   ;;  %v118_v62 = vld [vmem:[%s1247_s2 + $0x38] sm:$0xff] }
  0x16   :  { %884 = vmatprep.subr.bf16.mxu1 %v970_v22  ;;  %136 = vperm.xlu1 %948, %v114_v54   ;;  %v1011_v63 = vld [vmem:[%s1246_s0 + $0x38] ss:$20 sps:$4 sm:$0xff]   ;;  %v1012_v0 = vld [vmem:[%s1246_s0 + $0x88] ss:$20 sps:$4 sm:$0xff]  }
  0x17   :  { %126 = vperm.xlu0 %947, %v112_v53  }
  0x18   :  { %845 = vmatpush3.bf16.msra.mxu0 %v971_v23 }
  0x19   :  { %885 = vmatpush3.bf16.msra.mxu1 %v972_v24  ;;  %846 = vmatprep.subr.bf16.mxu0 %v973_v25 }
  0x1a   :  { %886 = vmatprep.subr.bf16.mxu1 %v974_v26  ;;  %146 = vperm.xlu1 %948, %v116_v60  }
  0x1b   :  { %141 = vperm.xlu0 %947, %v115_v58  }
  0x1c   :  { %847 = vmatpush3.bf16.msra.mxu0 %v975_v27 }
  0x1d   :  { %887 = vmatpush3.bf16.msra.mxu1 %v976_v28  ;;  %848 = vmatprep.subr.bf16.mxu0 %v977_v29 }
  0x1e   :  { %888 = vmatprep.subr.bf16.mxu1 %v978_v30  ;;  %156 = vperm.xlu1 %948, %v118_v62  }
  0x1f   :  { %151 = vperm.xlu0 %947, %v117_v61  }
  0x20   :  { %849 = vmatpush3.bf16.msra.mxu0 %v979_v31 }
  0x21   :  { %889 = vmatpush3.bf16.msra.mxu1 %v980_v32  ;;  %922 = vmatprep.subr.bf16.mxu0 %v987_v37 }
  0x22   :  { %938 = vmatprep.subr.bf16.mxu1 %v987_v37 }
  0x23   :  { %521 = vmatmul.mubr.bf16.vlgmr.msra.gmra.mxu0 %v981_v33 }
  0x24   :  { %586 = vmatmul.mubr.bf16.vlgmr.msra.gmra.mxu1 %v984_v35  ;;  %923 = vmatpush3.bf16.msra.mxu0 %v987_v37 }
  0x25   :  { %942 = vmatpush3.bf16.msra.mxu1 %v987_v37  ;;  %528 = vmatprep.mubr.bf16.mxu0 %v988_v38 }
  0x26   :  { %593 = vmatprep.mubr.bf16.mxu1 %v990_v39  ;;  %924 = vmatprep.subr.bf16.mxu0 %v994_v40 }
  0x27   :  { %939 = vmatprep.subr.bf16.mxu1 %v994_v40 }
  0x28   :  { %925 = vmatpush3.bf16.msra.mxu0 %v994_v40 }
  0x29   :  { %943 = vmatpush3.bf16.msra.mxu1 %v994_v40  ;;  %926 = vmatprep.subr.bf16.mxu0 %v1001_v45 }
  0x2a   :  { %940 = vmatprep.subr.bf16.mxu1 %v1001_v45 }
  0x2b   :  { %529 = vmatmul.mubr.bf16.gmra.mxu0 %v992_v41 }
  0x2c   :  { %594 = vmatmul.mubr.bf16.gmra.mxu1 %v993_v42  ;;  %536 = vmatprep.mubr.bf16.mxu0 %v995_v43 }
  0x2d   :  { %601 = vmatprep.mubr.bf16.mxu1 %v997_v44  ;;  %927 = vmatpush3.bf16.msra.mxu0 %v1001_v45 }
  0x2e   :  { %944 = vmatpush3.bf16.msra.mxu1 %v1001_v45  ;;  %928 = vmatprep.subr.bf16.mxu0 %v1008_v46 }
  0x2f   :  { %941 = vmatprep.subr.bf16.mxu1 %v1008_v46 }
  0x31   :  { %929 = vmatpush3.bf16.msra.mxu0 %v1008_v46 }
  0x32   :  { %945 = vmatpush3.bf16.msra.mxu1 %v1008_v46 }
  0x33   :  { %537 = vmatmul.mubr.bf16.gmra.mxu0 %v999_v47 }
  0x34   :  { %602 = vmatmul.mubr.bf16.gmra.mxu1 %v1000_v48  ;;  %544 = vmatprep.mubr.bf16.mxu0 %v1002_v49 }
  0x35   :  { %609 = vmatprep.mubr.bf16.mxu1 %v1004_v50 }
  0x3b   :  { %545 = vmatmul.mubr.bf16.gmra.mxu0 %v1006_v55 }
  0x3c   :  { %610 = vmatmul.mubr.bf16.gmra.mxu1 %v1007_v56  ;;  %930 = vmatprep.mubr.msk.bf16.mxu0 %vm475_vm0, %v1009_v57 }
  0x3d   :  { %934 = vmatprep.mubr.msk.bf16.mxu1 %vm475_vm0, %v1010_v59 }
  0x43   :  { %931 = vmatmul.mubr.msk.bf16.vlgmr.msra.gmra.mxu0 %vm475_vm0, %v1011_v63 }
  0x44   :  { %935 = vmatmul.mubr.msk.bf16.vlgmr.msra.gmra.mxu1 %vm475_vm0, %v1012_v0 }
  0x8d   :  { %v132_v16 = vpop.permute.xlu1 %131 }
  0x8e   :  { %v122_v13 = vpop.permute.xlu0 %121 }
  0x91   :  { %v137_v24 = vpop.permute.xlu1 %136 }
  0x92   :  { %v127_v21 = vpop.permute.xlu0 %126 }
  0x95   :  { %v147_v34 = vpop.permute.xlu1 %146 }
  0x96   :  { %v142_v27 = vpop.permute.xlu0 %141 }
  0x99   :  { %v157_v57 = vpop.permute.xlu1 %156 }
  0x9a   :  { %v152_v41 = vpop.permute.xlu0 %151 }
  0xe3   :  { %v850_v1 = vpop.f32.mrf.mxu0 }
  0xe4   :  { %v890_v2 = vpop.f32.mrf.mxu1 }
  0xe5   :  { %v851_v3 = vpop.f32.mrf.mxu0 }
  0xe6   :  { %v891_v4 = vpop.f32.mrf.mxu1  ;;  %v852_v33 = vadd.f32 %v851_v3, %v850_v1 }
  0xe7   :  { %v853_v5 = vpop.f32.mrf.mxu0  ;;  %v892_v54 = vadd.f32 %v891_v4, %v890_v2 }
  0xe8   :  { %v1230_v6 = vpop.f32.mrf.mxu1  ;;  %v523_v46 = vadd.f32 %v852_v33, %v122_v13 }
  0xe9   :  { %v854_v7 = vpop.f32.mrf.mxu0 }
  0xea   :  { %v894_v8 = vpop.f32.mrf.mxu1  ;;  %v855_v39 = vadd.f32 %v854_v7, %v853_v5  ;;  %v588_v5 = vadd.f32 %v892_v54, %v523_v46 }
  0xeb   :  { %v856_v9 = vpop.f32.mrf.mxu0 }
  0xec   :  { %v896_v10 = vpop.f32.mrf.mxu1  ;;  %v526_v55 = vadd.f32 %v855_v39, %v127_v21 }
  0xed   :  { %v857_v11 = vpop.f32.mrf.mxu0 }
  0xee   :  { %v897_v12 = vpop.f32.mrf.mxu1  ;;  %v858_v31 = vadd.f32 %v857_v11, %v856_v9  ;;  %v895_v9 = vadd.f32 %v894_v8, %v1230_v6 }
  0xef   :  { %v859_v14 = vpop.f32.mrf.mxu0  ;;  %v898_v50 = vadd.f32 %v897_v12, %v896_v10 }
  0xf0   :  { %v899_v15 = vpop.f32.mrf.mxu1  ;;  %v531_v43 = vadd.f32 %v858_v31, %v132_v16 }
  0xf1   :  { %v860_v17 = vpop.f32.mrf.mxu0 }
  0xf2   :  { %v900_v18 = vpop.f32.mrf.mxu1  ;;  %v861_v36 = vadd.f32 %v860_v17, %v859_v14  ;;  %v596_v63 = vadd.f32 %v898_v50, %v531_v43 }
  0xf3   :  { %v862_v19 = vpop.f32.mrf.mxu0  ;;  %v901_v60 = vadd.f32 %v900_v18, %v899_v15 }
  0xf4   :  { %v902_v20 = vpop.f32.mrf.mxu1  ;;  %v534_v51 = vadd.f32 %v861_v36, %v137_v24 }
  0xf5   :  { %v863_v22 = vpop.f32.mrf.mxu0 }
  0xf6   :  { %v903_v23 = vpop.f32.mrf.mxu1  ;;  %v864_v40 = vadd.f32 %v863_v22, %v862_v19  ;;  %v599_v12 = vadd.f32 %v901_v60, %v534_v51  ;;  %v591_v19 = vadd.f32 %v895_v9, %v526_v55 }
  0xf7   :  { %v865_v25 = vpop.f32.mrf.mxu0  ;;  %v904_v1 = vadd.f32 %v903_v23, %v902_v20 }
  0xf8   :  { %v905_v26 = vpop.f32.mrf.mxu1  ;;  %v539_v56 = vadd.f32 %v864_v40, %v142_v27 }
  0xf9   :  { %v866_v28 = vpop.f32.mrf.mxu0 }
  0xfa   :  { %v906_v29 = vpop.f32.mrf.mxu1  ;;  %v867_v47 = vadd.f32 %v866_v28, %v865_v25  ;;  %v604_v14 = vadd.f32 %v904_v1, %v539_v56 }
  0xfb   :  { %v868_v30 = vpop.f32.mrf.mxu0  ;;  %v907_v4 = vadd.f32 %v906_v29, %v905_v26 }
  0xfc   :  { %v908_v32 = vpop.f32.mrf.mxu1  ;;  %v542_v3 = vadd.f32 %v867_v47, %v147_v34 }
  0xfd   :  { %v869_v35 = vpop.f32.mrf.mxu0 }
  0xfe   :  { %v870_v37 = vadd.f32 %v869_v35, %v868_v30  ;;  %v909_v38 = vpop.f32.mrf.mxu1  ;;  %v607_v23 = vadd.f32 %v907_v4, %v542_v3 }
  0xff   :  { %v871_v42 = vpop.f32.mrf.mxu0  ;;  %v910_v48 = vadd.f32 %v909_v38, %v908_v32 }
 0x100   :  { %v547_v44 = vadd.f32 %v870_v37, %v152_v41  ;;  %v911_v45 = vpop.f32.mrf.mxu1 }
 0x101   :  { %v872_v49 = vpop.f32.mrf.mxu0 }
 0x102   :  { %v873_v52 = vadd.f32 %v872_v49, %v871_v42  ;;  %v912_v53 = vpop.f32.mrf.mxu1  ;;  %v612_v59 = vadd.f32 %v910_v48, %v547_v44 }
 0x103   :  { %v932_v58 = vpop.f32.mrf.mxu0  ;;  %v913_v62 = vadd.f32 %v912_v53, %v911_v45 }
 0x104   :  { %v550_v61 = vadd.f32 %v873_v52, %v157_v57  ;;  %v936_v0 = vpop.f32.mrf.mxu1  ;;  %v661_v10 = vadd.f32 %v932_v58, %v596_v63 }
 0x105   :  { %v652_v7 = vpop.f32.mrf.mxu0  ;;  %v677_v13 = vadd.f32 %v936_v0, %v612_v59 }
 0x106   :  { %v668_v11 = vpop.f32.mrf.mxu1  ;;  %v615_v2 = vadd.f32 %v913_v62, %v550_v61  ;;  %v653_v17 = vadd.f32 %v652_v7, %v588_v5  ;;  %v685_v24 = vmax.f32 %v661_v10, 0.0 }
 0x107   :  { %v933_v16 = vpop.f32.mrf.mxu0  ;;  %v669_v21 = vadd.f32 %v668_v11, %v604_v14  ;;  %v689_v8 = vmax.f32 %v677_v13, 0.0 }
 0x108   :  { %v664_v15 = vadd.f32 %v933_v16, %v599_v12  ;;  %v937_v18 = vpop.f32.mrf.mxu1  ;;  %v683_v31 = vmax.f32 %v653_v17, 0.0 }
 0x109   :  { %v680_v22 = vadd.f32 %v937_v18, %v615_v2  ;;  %v655_v20 = vpop.f32.mrf.mxu0  ;;  %v687_v32 = vmax.f32 %v669_v21, 0.0 }
 0x10a   :  { %v686_v25 = vmax.f32 %v664_v15, 0.0  ;;  %v656_v27 = vadd.f32 %v655_v20, %v591_v19  ;;  %v671_v6 = vpop.f32.mrf.mxu1 }
 0x10b   :  { %v690_v28 = vmax.f32 %v680_v22, 0.0  ;;  %v672_v30 = vadd.f32 %v671_v6, %v607_v23 }
 0x10c   :  { %v819_v26 = vpack.c.bf16 %v686_v25, %v685_v24  ;;  %v684_v29 = vmax.f32 %v656_v27, 0.0 }
 0x10d   :  { %v829_v33 = vpack.c.bf16 %v690_v28, %v689_v8  ;;  %v688_v34 = vmax.f32 %v672_v30, 0.0 }
 0x10e   :  { %831 = vst [vmem:[%s1248_s3 + $0x8] sm:$0xff] %v819_v26   ;;  %v814_v35 = vpack.c.bf16 %v684_v29, %v683_v31 }
 0x10f   :  { %833 = vst [vmem:[%s1248_s3 + $0x18] sm:$0xff] %v829_v33   ;;  %v824_v36 = vpack.c.bf16 %v688_v34, %v687_v32 }
 0x110   :  { %815 = vst [vmem:[%s1248_s3] sm:$0xff] %v814_v35  }
 0x111   :  { %832 = vst [vmem:[%s1248_s3 + $0x10] sm:$0xff] %v824_v36  }

// kernel: forward.43
= control target key start
LH: loop header
LB: loop body
LE: loop exit
PB: predicated region body
PF: predicated region fallthrough
CT: control target
= control target key end

     0   :  { %v267_v0 = vlaneseq  ;;  %v1410_v1 = vmov 0   ;;  %v1411_v4 = vmov 1983009808   ;;  %vm1162_vm0 = vcmask 1041409   ;;  %s1840_s0 = inlined_call_operand.vmem [shape: bf16[64,2,1], index: 0, kind: input, shape index: {}]   ;;  %s1841_s1 = inlined_call_operand.vmem [shape: f32[64,2], index: 1, kind: output, shape index: {}]  }
   0x1   :  { %1259 = vset.pattern.permute.xlu1 %v1410_v1  ;;  %1248 = vset.pattern.permute.xlu0 %v1410_v1  ;;  %v12_v2 = vld [vmem:[%s1840_s0 + $0x4] sm:$0x1]  ;;  %v13_v3 = vld [vmem:[%s1840_s0 + $0x5] sm:$0x1]  ;;  %v265_v5 = vunpack.c.l.s4 %v1411_v4  ;;  %v8_v6 = vld [vmem:[%s1840_s0] sm:$0x1] }
   0x2   :  { %v76_v7 = vunpack.c.l.bf16 %v12_v2  ;;  %v1432_v8 = vshrl.u32 %v267_v0, 7  ;;  %v9_v9 = vld [vmem:[%s1840_s0 + $0x1] sm:$0x1]  ;;  %v14_v10 = vld [vmem:[%s1840_s0 + $0x6] sm:$0x1]  ;;  %v77_v11 = vunpack.c.l.bf16 %v13_v3  ;;  %v72_v13 = vunpack.c.l.bf16 %v8_v6 }
   0x3   :  { %v266_v12 = vunpack.c.0.s8 %v265_v5  ;;  %v73_v14 = vunpack.c.l.bf16 %v9_v9  ;;  %v15_v15 = vld [vmem:[%s1840_s0 + $0x7] sm:$0x1]  ;;  %v10_v16 = vld [vmem:[%s1840_s0 + $0x2] sm:$0x1]  ;;  %v11_v17 = vld [vmem:[%s1840_s0 + $0x3] sm:$0x1]  ;;  %v78_v18 = vunpack.c.l.bf16 %v14_v10 }
   0x4   :  { %v79_v19 = vunpack.c.l.bf16 %v15_v15  ;;  %v74_v20 = vunpack.c.l.bf16 %v10_v16  ;;  %v75_v21 = vunpack.c.l.bf16 %v11_v17  ;;  %v18_v22 = vld [vmem:[%s1840_s0 + $0xa] sm:$0x1]  ;;  %v19_v23 = vld [vmem:[%s1840_s0 + $0xb] sm:$0x1]  ;;  %v16_v24 = vld [vmem:[%s1840_s0 + $0x8] sm:$0x1] }
   0x5   :  { %v1459_v25 = vsub.s32 %v266_v12, %v1432_v8  ;;  %v17_v26 = vld [vmem:[%s1840_s0 + $0x9] sm:$0x1]  ;;  %v82_v27 = vunpack.c.l.bf16 %v18_v22  ;;  %v83_v28 = vunpack.c.l.bf16 %v19_v23  ;;  %v80_v29 = vunpack.c.l.bf16 %v16_v24  ;;  %v22_v31 = vld [vmem:[%s1840_s0 + $0xe] sm:$0x1]  ;;  %v23_v36 = vld [vmem:[%s1840_s0 + $0xf] sm:$0x1] }
   0x6   :  { %v81_v30 = vunpack.c.l.bf16 %v17_v26  ;;  %v20_v41 = vld [vmem:[%s1840_s0 + $0xc] sm:$0x1]  ;;  %v86_v44 = vunpack.c.l.bf16 %v22_v31  ;;  %v21_v45 = vld [vmem:[%s1840_s0 + $0xd] sm:$0x1]  ;;  %v26_v46 = vld [vmem:[%s1840_s0 + $0x12] sm:$0x1]  ;;  %v87_v50 = vunpack.c.l.bf16 %v23_v36 }
   0x7   :  { %v298_v32 = vrot.slane %v76_v7, %v1459_v25  ;;  %v305_v33 = vrot.slane %v77_v11, %v1459_v25  ;;  %v270_v34 = vrot.slane %v72_v13, %v1459_v25  ;;  %v277_v35 = vrot.slane %v73_v14, %v1459_v25  ;;  %v27_v51 = vld [vmem:[%s1840_s0 + $0x13] sm:$0x1]  ;;  %v24_v52 = vld [vmem:[%s1840_s0 + $0x10] sm:$0x1]  ;;  %v25_v53 = vld [vmem:[%s1840_s0 + $0x11] sm:$0x1] }
   0x8   :  { %v312_v37 = vrot.slane %v78_v18, %v1459_v25  ;;  %v319_v38 = vrot.slane %v79_v19, %v1459_v25  ;;  %v284_v39 = vrot.slane %v74_v20, %v1459_v25  ;;  %v291_v40 = vrot.slane %v75_v21, %v1459_v25  ;;  %v30_v3 = vld [vmem:[%s1840_s0 + $0x16] sm:$0x1]  ;;  %v31_v9 = vld [vmem:[%s1840_s0 + $0x17] sm:$0x1]  ;;  %v28_v10 = vld [vmem:[%s1840_s0 + $0x14] sm:$0x1] }
   0x9   :  { %v1260_v42 = vpack.i.bf16 %v305_v33, %v298_v32  ;;  %v1249_v43 = vpack.i.bf16 %v277_v35, %v270_v34  ;;  %v340_v48 = vrot.slane %v82_v27, %v1459_v25  ;;  %v347_v49 = vrot.slane %v83_v28, %v1459_v25  ;;  %v29_v11 = vld [vmem:[%s1840_s0 + $0x15] sm:$0x1]  ;;  %v34_v17 = vld [vmem:[%s1840_s0 + $0x1a] sm:$0x1]  ;;  %v35_v22 = vld [vmem:[%s1840_s0 + $0x1b] sm:$0x1] }
   0xa   :  { %v1265_v47 = vpack.i.bf16 %v319_v38, %v312_v37  ;;  %v1254_v54 = vpack.i.bf16 %v291_v40, %v284_v39  ;;  %v326_v55 = vrot.slane %v80_v29, %v1459_v25  ;;  %v333_v56 = vrot.slane %v81_v30, %v1459_v25  ;;  %v32_v23 = vld [vmem:[%s1840_s0 + $0x18] sm:$0x1]  ;;  %v33_v24 = vld [vmem:[%s1840_s0 + $0x19] sm:$0x1]  ;;  %v38_v33 = vld [vmem:[%s1840_s0 + $0x1e] sm:$0x1] }
   0xb   :  { %1261 = vperm.xlu1 %1259, %v1260_v42   ;;  %1250 = vperm.xlu0 %1248, %v1249_v43   ;;  %v84_v57 = vunpack.c.l.bf16 %v20_v41  ;;  %v85_v58 = vunpack.c.l.bf16 %v21_v45  ;;  %v90_v59 = vunpack.c.l.bf16 %v26_v46  ;;  %v91_v60 = vunpack.c.l.bf16 %v27_v51  ;;  %v39_v34 = vld [vmem:[%s1840_s0 + $0x1f] sm:$0x1]  ;;  %v36_v38 = vld [vmem:[%s1840_s0 + $0x1c] sm:$0x1]  ;;  %v37_v39 = vld [vmem:[%s1840_s0 + $0x1d] sm:$0x1] }
   0xc   :  { %v88_v61 = vunpack.c.l.bf16 %v24_v52  ;;  %v89_v62 = vunpack.c.l.bf16 %v25_v53  ;;  %v1275_v63 = vpack.i.bf16 %v347_v49, %v340_v48  ;;  %v368_v1 = vrot.slane %v86_v44, %v1459_v25  ;;  %v43_v51 = vld [vmem:[%s1840_s0 + $0x23] sm:$0x1]  ;;  %v40_v52 = vld [vmem:[%s1840_s0 + $0x20] sm:$0x1]  ;;  %v41_v53 = vld [vmem:[%s1840_s0 + $0x21] sm:$0x1] }
   0xd   :  { %v375_v2 = vrot.slane %v87_v50, %v1459_v25  ;;  %v1270_v4 = vpack.i.bf16 %v333_v56, %v326_v55  ;;  %v354_v5 = vrot.slane %v84_v57, %v1459_v25  ;;  %v361_v6 = vrot.slane %v85_v58, %v1459_v25  ;;  %v42_v50 = vld [vmem:[%s1840_s0 + $0x22] sm:$0x1] }
   0xe   :  { %v396_v7 = vrot.slane %v90_v59, %v1459_v25  ;;  %v403_v12 = vrot.slane %v91_v60, %v1459_v25  ;;  %v382_v13 = vrot.slane %v88_v61, %v1459_v25  ;;  %v389_v14 = vrot.slane %v89_v62, %v1459_v25  ;;  %v46_v60 = vld [vmem:[%s1840_s0 + $0x26] sm:$0x1]  ;;  %v47_v61 = vld [vmem:[%s1840_s0 + $0x27] sm:$0x1] }
   0xf   :  { %1266 = vperm.xlu1 %1259, %v1265_v47   ;;  %1255 = vperm.xlu0 %1248, %v1254_v54   ;;  %v94_v15 = vunpack.c.l.bf16 %v30_v3  ;;  %v1285_v16 = vpack.i.bf16 %v375_v2, %v368_v1  ;;  %v1280_v18 = vpack.i.bf16 %v361_v6, %v354_v5  ;;  %v95_v19 = vunpack.c.l.bf16 %v31_v9  ;;  %v44_v3 = vld [vmem:[%s1840_s0 + $0x24] sm:$0x1] }
  0x10   :  { %v92_v20 = vunpack.c.l.bf16 %v28_v10  ;;  %v93_v21 = vunpack.c.l.bf16 %v29_v11  ;;  %v1295_v26 = vpack.i.bf16 %v403_v12, %v396_v7  ;;  %v1290_v27 = vpack.i.bf16 %v389_v14, %v382_v13  ;;  %v50_v12 = vld [vmem:[%s1840_s0 + $0x2a] sm:$0x1] }
  0x11   :  { %v424_v28 = vrot.slane %v94_v15, %v1459_v25  ;;  %v98_v29 = vunpack.c.l.bf16 %v34_v17  ;;  %v99_v30 = vunpack.c.l.bf16 %v35_v22  ;;  %v96_v31 = vunpack.c.l.bf16 %v32_v23  ;;  %v51_v17 = vld [vmem:[%s1840_s0 + $0x2b] sm:$0x1] }
  0x12   :  { %v97_v32 = vunpack.c.l.bf16 %v33_v24  ;;  %v431_v35 = vrot.slane %v95_v19, %v1459_v25  ;;  %v410_v36 = vrot.slane %v92_v20, %v1459_v25  ;;  %v417_v37 = vrot.slane %v93_v21, %v1459_v25  ;;  %v49_v19 = vld [vmem:[%s1840_s0 + $0x29] sm:$0x1] }
  0x13   :  { %1276 = vperm.xlu1 %1259, %v1275_v63   ;;  %1271 = vperm.xlu0 %1248, %v1270_v4   ;;  %v102_v40 = vunpack.c.l.bf16 %v38_v33  ;;  %v103_v41 = vunpack.c.l.bf16 %v39_v34  ;;  %v452_v42 = vrot.slane %v98_v29, %v1459_v25  ;;  %v459_v43 = vrot.slane %v99_v30, %v1459_v25  ;;  %v45_v4 = vld [vmem:[%s1840_s0 + $0x25] sm:$0x1]  ;;  %v52_v33 = vld [vmem:[%s1840_s0 + $0x2c] sm:$0x1]  ;;  %v53_v34 = vld [vmem:[%s1840_s0 + $0x2d] sm:$0x1] }
  0x14   :  { %v438_v44 = vrot.slane %v96_v31, %v1459_v25  ;;  %v445_v45 = vrot.slane %v97_v32, %v1459_v25  ;;  %v1305_v46 = vpack.i.bf16 %v431_v35, %v424_v28  ;;  %v1300_v47 = vpack.i.bf16 %v417_v37, %v410_v36  ;;  %v57_v28 = vld [vmem:[%s1840_s0 + $0x31] sm:$0x1] }
  0x15   :  { %v100_v48 = vunpack.c.l.bf16 %v36_v38  ;;  %v101_v49 = vunpack.c.l.bf16 %v37_v39  ;;  %v480_v54 = vrot.slane %v102_v40, %v1459_v25  ;;  %v487_v55 = vrot.slane %v103_v41, %v1459_v25 }
  0x16   :  { %v1315_v56 = vpack.i.bf16 %v459_v43, %v452_v42  ;;  %v1310_v57 = vpack.i.bf16 %v445_v45, %v438_v44  ;;  %v106_v58 = vunpack.c.l.bf16 %v42_v50  ;;  %v107_v59 = vunpack.c.l.bf16 %v43_v51 }
  0x17   :  { %1286 = vperm.xlu1 %1259, %v1285_v16   ;;  %1281 = vperm.xlu0 %1248, %v1280_v18   ;;  %v466_v62 = vrot.slane %v100_v48, %v1459_v25  ;;  %v473_v63 = vrot.slane %v101_v49, %v1459_v25  ;;  %v104_v1 = vunpack.c.l.bf16 %v40_v52  ;;  %v105_v2 = vunpack.c.l.bf16 %v41_v53  ;;  %v48_v18 = vld [vmem:[%s1840_s0 + $0x28] sm:$0x1]  ;;  %v64_v48 = vld [vmem:[%s1840_s0 + $0x38] sm:$0x1] }
  0x18   :  { %v110_v5 = vunpack.c.l.bf16 %v46_v60  ;;  %v111_v6 = vunpack.c.l.bf16 %v47_v61  ;;  %v1325_v7 = vpack.i.bf16 %v487_v55, %v480_v54  ;;  %v508_v9 = vrot.slane %v106_v58, %v1459_v25  ;;  %v59_v61 = vld [vmem:[%s1840_s0 + $0x33] sm:$0x1] }
  0x19   :  { %v515_v10 = vrot.slane %v107_v59, %v1459_v25  ;;  %v108_v11 = vunpack.c.l.bf16 %v44_v3  ;;  %v1320_v13 = vpack.i.bf16 %v473_v63, %v466_v62  ;;  %v494_v14 = vrot.slane %v104_v1, %v1459_v25  ;;  %v67_v62 = vld [vmem:[%s1840_s0 + $0x3b] sm:$0x1] }
  0x1a   :  { %v501_v15 = vrot.slane %v105_v2, %v1459_v25  ;;  %v109_v16 = vunpack.c.l.bf16 %v45_v4  ;;  %v536_v20 = vrot.slane %v110_v5, %v1459_v25  ;;  %v543_v21 = vrot.slane %v111_v6, %v1459_v25  ;;  %v54_v6 = vld [vmem:[%s1840_s0 + $0x2e] sm:$0x1] }
  0x1b   :  { %1296 = vperm.xlu1 %1259, %v1295_v26   ;;  %1291 = vperm.xlu0 %1248, %v1290_v27   ;;  %v114_v22 = vunpack.c.l.bf16 %v50_v12  ;;  %v1335_v23 = vpack.i.bf16 %v515_v10, %v508_v9  ;;  %v522_v24 = vrot.slane %v108_v11, %v1459_v25  ;;  %v115_v26 = vunpack.c.l.bf16 %v51_v17  ;;  %v56_v27 = vld [vmem:[%s1840_s0 + $0x30] sm:$0x1]  ;;  %v62_v12 = vld [vmem:[%s1840_s0 + $0x36] sm:$0x1] }
  0x1c   :  { %v1330_v29 = vpack.i.bf16 %v501_v15, %v494_v14  ;;  %v529_v30 = vrot.slane %v109_v16, %v1459_v25  ;;  %v112_v31 = vunpack.c.l.bf16 %v48_v18  ;;  %v113_v32 = vunpack.c.l.bf16 %v49_v19  ;;  %v69_v14 = vld [vmem:[%s1840_s0 + $0x3d] sm:$0x1] }
  0x1d   :  { %v1345_v35 = vpack.i.bf16 %v543_v21, %v536_v20  ;;  %v564_v36 = vrot.slane %v114_v22, %v1459_v25  ;;  %v120_v37 = vunpack.c.l.bf16 %v56_v27  ;;  %v121_v38 = vunpack.c.l.bf16 %v57_v28  ;;  %v71_v27 = vld [vmem:[%s1840_s0 + $0x3f] sm:$0x1]  ;;  %v55_v28 = vld [vmem:[%s1840_s0 + $0x2f] sm:$0x1] }
  0x1e   :  { %v571_v39 = vrot.slane %v115_v26, %v1459_v25  ;;  %v116_v40 = vunpack.c.l.bf16 %v52_v33  ;;  %v117_v41 = vunpack.c.l.bf16 %v53_v34  ;;  %v905_v42 = vand.u32 127, %v267_v0  ;;  %v65_v0 = vld [vmem:[%s1840_s0 + $0x39] sm:$0x1]  ;;  %v63_v26 = vld [vmem:[%s1840_s0 + $0x37] sm:$0x1] }
  0x1f   :  { %1306 = vperm.xlu1 %1259, %v1305_v46   ;;  %1301 = vperm.xlu0 %1248, %v1300_v47   ;;  %v1340_v43 = vpack.i.bf16 %v529_v30, %v522_v24  ;;  %v550_v44 = vrot.slane %v112_v31, %v1459_v25  ;;  %v557_v45 = vrot.slane %v113_v32, %v1459_v25  ;;  %v58_v46 = vld [vmem:[%s1840_s0 + $0x32] sm:$0x1]  ;;  %v66_v47 = vld [vmem:[%s1840_s0 + $0x3a] sm:$0x1]  ;;  %v128_v59 = vunpack.c.l.bf16 %v64_v48 }
  0x20   :  { %v1630_v49 = vsub.s32 %v905_v42, %v1432_v8  ;;  %v606_v50 = vrot.slane %v120_v37, %v1459_v25  ;;  %v613_v51 = vrot.slane %v121_v38, %v1459_v25  ;;  %v578_v52 = vrot.slane %v116_v40, %v1459_v25 }
  0x21   :  { %v585_v53 = vrot.slane %v117_v41, %v1459_v25  ;;  %v122_v54 = vunpack.c.l.bf16 %v58_v46  ;;  %v130_v55 = vunpack.c.l.bf16 %v66_v47  ;;  %v1355_v8 = vpack.i.bf16 %v571_v39, %v564_v36 }
  0x22   :  { %v1350_v58 = vpack.i.bf16 %v557_v45, %v550_v44  ;;  %v129_v60 = vunpack.c.l.bf16 %v65_v0  ;;  %v1365_v2 = vpack.i.bf16 %v613_v51, %v606_v50  ;;  %v123_v10 = vunpack.c.l.bf16 %v59_v61 }
  0x23   :  { %1316 = vperm.xlu1 %1259, %v1315_v56   ;;  %1311 = vperm.xlu0 %1248, %v1310_v57   ;;  %v60_v56 = vld [vmem:[%s1840_s0 + $0x34] sm:$0x1]  ;;  %v68_v57 = vld [vmem:[%s1840_s0 + $0x3c] sm:$0x1]  ;;  %v1360_v3 = vpack.i.bf16 %v585_v53, %v578_v52  ;;  %v620_v4 = vrot.slane %v122_v54, %v1459_v25  ;;  %v676_v5 = vrot.slane %v130_v55, %v1459_v25  ;;  %v131_v11 = vunpack.c.l.bf16 %v67_v62 }
  0x24   :  { %v124_v63 = vunpack.c.l.bf16 %v60_v56  ;;  %v132_v1 = vunpack.c.l.bf16 %v68_v57  ;;  %v669_v9 = vrot.slane %v129_v60, %v1459_v25  ;;  %v118_v17 = vunpack.c.l.bf16 %v54_v6 }
  0x25   :  { %v1375_v18 = vpack.i.bf16 %v676_v5, %v620_v4  ;;  %v126_v19 = vunpack.c.l.bf16 %v62_v12  ;;  %v133_v21 = vunpack.c.l.bf16 %v69_v14  ;;  %v683_v24 = vrot.slane %v131_v11, %v1459_v25 }
  0x26   :  { %v634_v15 = vrot.slane %v124_v63, %v1459_v25  ;;  %v690_v16 = vrot.slane %v132_v1, %v1459_v25  ;;  %v592_v31 = vrot.slane %v118_v17, %v1459_v25  ;;  %v135_v37 = vunpack.c.l.bf16 %v71_v27 }
  0x27   :  { %1326 = vperm.xlu1 %1259, %v1325_v7   ;;  %1321 = vperm.xlu0 %1248, %v1320_v13   ;;  %v662_v7 = vrot.slane %v128_v59, %v1459_v25  ;;  %v61_v13 = vld [vmem:[%s1840_s0 + $0x35] sm:$0x1]  ;;  %v648_v32 = vrot.slane %v126_v19, %v1459_v25  ;;  %v697_v34 = vrot.slane %v133_v21, %v1459_v25  ;;  %v119_v38 = vunpack.c.l.bf16 %v55_v28 }
  0x28   :  { %v125_v20 = vunpack.c.l.bf16 %v61_v13  ;;  %v1385_v30 = vpack.i.bf16 %v690_v16, %v634_v15  ;;  %vm1164_vm1 = vcmask 1042434   ;;  %vm1166_vm2 = vcmask 1043459  }
  0x29   :  { %v1370_v22 = vpack.i.bf16 %v669_v9, %v662_v7  ;;  %v1395_v40 = vpack.i.bf16 %v648_v32, %v592_v31  ;;  %v599_v44 = vrot.slane %v119_v38, %v1459_v25  ;;  %vm1168_vm3 = vcmask 1044484  }
  0x2a   :  { %v641_v33 = vrot.slane %v125_v20, %v1459_v25  ;;  %vm1170_vm4 = vcmask 1045509   ;;  %vm1172_vm5 = vcmask 1046534   ;;  %vm1174_vm6 = vcmask 1047559  }
  0x2b   :  { %1336 = vperm.xlu1 %1259, %v1335_v23   ;;  %1331 = vperm.xlu0 %1248, %v1330_v29   ;;  %v627_v23 = vrot.slane %v123_v10, %v1459_v25  ;;  %v70_v29 = vld [vmem:[%s1840_s0 + $0x3e] sm:$0x1]  ;;  %vm1233_vm7 = vcmask 15360  }
  0x2c   :  { %v134_v39 = vunpack.c.l.bf16 %v70_v29  ;;  %v1390_v41 = vpack.i.bf16 %v697_v34, %v641_v33 }
  0x2d   :  { %v1380_v36 = vpack.i.bf16 %v683_v24, %v627_v23 }
  0x2e   :  { %v704_v45 = vrot.slane %v134_v39, %v1459_v25 }
  0x2f   :  { %1346 = vperm.xlu1 %1259, %v1345_v35   ;;  %1341 = vperm.xlu0 %1248, %v1340_v43   ;;  %v127_v35 = vunpack.c.l.bf16 %v63_v26  ;;  %v711_v43 = vrot.slane %v135_v37, %v1459_v25 }
  0x30   :  { %v1400_v47 = vpack.i.bf16 %v599_v44, %v704_v45 }
  0x31   :  { %v655_v42 = vrot.slane %v127_v35, %v1459_v25 }
  0x33   :  { %1356 = vperm.xlu1 %1259, %v1355_v8   ;;  %1351 = vperm.xlu0 %1248, %v1350_v58   ;;  %v1405_v46 = vpack.i.bf16 %v711_v43, %v655_v42 }
  0x37   :  { %1366 = vperm.xlu1 %1259, %v1365_v2   ;;  %1361 = vperm.xlu0 %1248, %v1360_v3  }
  0x3b   :  { %1376 = vperm.xlu1 %1259, %v1375_v18   ;;  %1371 = vperm.xlu0 %1248, %v1370_v22  }
  0x3f   :  { %1386 = vperm.xlu1 %1259, %v1385_v30   ;;  %1381 = vperm.xlu0 %1248, %v1380_v36  }
  0x43   :  { %1396 = vperm.xlu1 %1259, %v1395_v40   ;;  %1391 = vperm.xlu0 %1248, %v1390_v41  }
  0x47   :  { %1406 = vperm.xlu1 %1259, %v1405_v46   ;;  %1401 = vperm.xlu0 %1248, %v1400_v47  }
  0x86   :  { %v1262_v48 = vpop.permute.xlu1 %1261  ;;  %v1251_v0 = vpop.permute.xlu0 %1250 }
  0x87   :  { %v1253_v50 = vunpack.i.h.bf16 %v1251_v0  ;;  %v1252_v51 = vunpack.i.l.bf16 %v1251_v0  ;;  %v1263_v57 = vunpack.i.l.bf16 %v1262_v48  ;;  %v1264_v8 = vunpack.i.h.bf16 %v1262_v48 }
  0x89   :  { %v913_v52 = vrot.slane %v1253_v50, %v1630_v49  ;;  %v909_v53 = vrot.slane %v1252_v51, %v1630_v49  ;;  %v925_v6 = vrot.slane %v1263_v57, %v1630_v49  ;;  %v929_v9 = vrot.slane %v1264_v8, %v1630_v49 }
  0x8a   :  { %v1267_v54 = vpop.permute.xlu1 %1266  ;;  %v1256_v55 = vpop.permute.xlu0 %1255 }
  0x8b   :  { %v1258_v56 = vunpack.i.h.bf16 %v1256_v55  ;;  %v1257_v25 = vunpack.i.l.bf16 %v1256_v55  ;;  %v1163_v59 = vsel %vm1162_vm0, %v913_v52, %v909_v53  ;;  %v1269_v60 = vunpack.i.h.bf16 %v1267_v54 }
  0x8c   :  { %v1268_v61 = vunpack.i.l.bf16 %v1267_v54 }
  0x8d   :  { %v921_v58 = vrot.slane %v1258_v56, %v1630_v49  ;;  %v917_v62 = vrot.slane %v1257_v25, %v1630_v49  ;;  %v937_v18 = vrot.slane %v1269_v60, %v1630_v49 }
  0x8e   :  { %v1277_v63 = vpop.permute.xlu1 %1276  ;;  %v1272_v1 = vpop.permute.xlu0 %1271  ;;  %v933_v13 = vrot.slane %v1268_v61, %v1630_v49 }
  0x8f   :  { %v1279_v2 = vunpack.i.h.bf16 %v1277_v63  ;;  %v1278_v3 = vunpack.i.l.bf16 %v1277_v63  ;;  %v1274_v4 = vunpack.i.h.bf16 %v1272_v1  ;;  %v1273_v5 = vunpack.i.l.bf16 %v1272_v1 }
  0x90   :  { %v1165_v7 = vsel %vm1164_vm1, %v917_v62, %v1163_v59 }
  0x91   :  { %v1167_v10 = vsel %vm1166_vm2, %v921_v58, %v1165_v7  ;;  %v949_v11 = vrot.slane %v1278_v3, %v1630_v49  ;;  %v945_v12 = vrot.slane %v1274_v4, %v1630_v49  ;;  %v941_v15 = vrot.slane %v1273_v5, %v1630_v49 }
  0x92   :  { %v1169_v14 = vsel %vm1168_vm3, %v925_v6, %v1167_v10  ;;  %v1287_v16 = vpop.permute.xlu1 %1286  ;;  %v1282_v17 = vpop.permute.xlu0 %1281  ;;  %v953_v20 = vrot.slane %v1279_v2, %v1630_v49 }
  0x93   :  { %v1171_v19 = vsel %vm1170_vm4, %v929_v9, %v1169_v14  ;;  %v1284_v21 = vunpack.i.h.bf16 %v1282_v17  ;;  %v1176_v23 = vsel %vm1162_vm0, %v945_v12, %v941_v15  ;;  %v1288_v24 = vunpack.i.l.bf16 %v1287_v16 }
  0x94   :  { %v1173_v22 = vsel %vm1172_vm5, %v933_v13, %v1171_v19  ;;  %v1283_v26 = vunpack.i.l.bf16 %v1282_v17  ;;  %v1177_v28 = vsel %vm1164_vm1, %v949_v11, %v1176_v23  ;;  %v1289_v29 = vunpack.i.h.bf16 %v1287_v16 }
  0x95   :  { %v1175_v27 = vsel %vm1174_vm6, %v937_v18, %v1173_v22  ;;  %v961_v30 = vrot.slane %v1284_v21, %v1630_v49  ;;  %v1178_v32 = vsel %vm1166_vm2, %v953_v20, %v1177_v28  ;;  %v965_v38 = vrot.slane %v1288_v24, %v1630_v49 }
  0x96   :  { %1234 = vst.msk [vmem:[%s1841_s1] sm:$0xff] %vm1233_vm7, %v1175_v27  ;;  %v957_v31 = vrot.slane %v1283_v26, %v1630_v49  ;;  %v1297_v33 = vpop.permute.xlu1 %1296  ;;  %v1292_v34 = vpop.permute.xlu0 %1291  ;;  %v969_v41 = vrot.slane %v1289_v29, %v1630_v49 }
  0x97   :  { %v1298_v35 = vunpack.i.l.bf16 %v1297_v33  ;;  %v1294_v36 = vunpack.i.h.bf16 %v1292_v34  ;;  %v1293_v37 = vunpack.i.l.bf16 %v1292_v34  ;;  %v1299_v40 = vunpack.i.h.bf16 %v1297_v33 }
  0x98   :  { %v1179_v39 = vsel %vm1168_vm3, %v957_v31, %v1178_v32 }
  0x99   :  { %v1180_v42 = vsel %vm1170_vm4, %v961_v30, %v1179_v39  ;;  %v981_v43 = vrot.slane %v1298_v35, %v1630_v49  ;;  %v977_v44 = vrot.slane %v1294_v36, %v1630_v49  ;;  %v973_v46 = vrot.slane %v1293_v37, %v1630_v49 }
  0x9a   :  { %v1181_v45 = vsel %vm1172_vm5, %v965_v38, %v1180_v42  ;;  %v1307_v47 = vpop.permute.xlu1 %1306  ;;  %v1302_v48 = vpop.permute.xlu0 %1301  ;;  %v985_v51 = vrot.slane %v1299_v40, %v1630_v49 }
  0x9b   :  { %v1182_v0 = vsel %vm1174_vm6, %v969_v41, %v1181_v45  ;;  %v1304_v50 = vunpack.i.h.bf16 %v1302_v48  ;;  %v1183_v52 = vsel %vm1162_vm0, %v977_v44, %v973_v46  ;;  %v1308_v53 = vunpack.i.l.bf16 %v1307_v47 }
  0x9c   :  { %1235 = vst.msk [vmem:[%s1841_s1 + $0x8] sm:$0xff] %vm1233_vm7, %v1182_v0  ;;  %v1303_v54 = vunpack.i.l.bf16 %v1302_v48  ;;  %v1184_v55 = vsel %vm1164_vm1, %v981_v43, %v1183_v52  ;;  %v1309_v56 = vunpack.i.h.bf16 %v1307_v47 }
  0x9d   :  { %v993_v57 = vrot.slane %v1304_v50, %v1630_v49  ;;  %v1185_v8 = vsel %vm1166_vm2, %v985_v51, %v1184_v55  ;;  %v997_v63 = vrot.slane %v1308_v53, %v1630_v49 }
  0x9e   :  { %v989_v25 = vrot.slane %v1303_v54, %v1630_v49  ;;  %v1317_v58 = vpop.permute.xlu1 %1316  ;;  %v1312_v59 = vpop.permute.xlu0 %1311  ;;  %v1001_v3 = vrot.slane %v1309_v56, %v1630_v49 }
  0x9f   :  { %v1318_v60 = vunpack.i.l.bf16 %v1317_v58  ;;  %v1314_v61 = vunpack.i.h.bf16 %v1312_v59  ;;  %v1313_v62 = vunpack.i.l.bf16 %v1312_v59  ;;  %v1319_v2 = vunpack.i.h.bf16 %v1317_v58 }
  0xa0   :  { %v1186_v1 = vsel %vm1168_vm3, %v989_v25, %v1185_v8 }
  0xa1   :  { %v1187_v4 = vsel %vm1170_vm4, %v993_v57, %v1186_v1  ;;  %v1013_v5 = vrot.slane %v1318_v60, %v1630_v49  ;;  %v1009_v6 = vrot.slane %v1314_v61, %v1630_v49  ;;  %v1005_v9 = vrot.slane %v1313_v62, %v1630_v49 }
  0xa2   :  { %v1188_v7 = vsel %vm1172_vm5, %v997_v63, %v1187_v4  ;;  %v1327_v10 = vpop.permute.xlu1 %1326  ;;  %v1322_v11 = vpop.permute.xlu0 %1321  ;;  %v1017_v14 = vrot.slane %v1319_v2, %v1630_v49 }
  0xa3   :  { %v1189_v12 = vsel %vm1174_vm6, %v1001_v3, %v1188_v7  ;;  %v1324_v13 = vunpack.i.h.bf16 %v1322_v11  ;;  %v1190_v15 = vsel %vm1162_vm0, %v1009_v6, %v1005_v9  ;;  %v1328_v16 = vunpack.i.l.bf16 %v1327_v10 }
  0xa4   :  { %1236 = vst.msk [vmem:[%s1841_s1 + $0x10] sm:$0xff] %vm1233_vm7, %v1189_v12  ;;  %v1323_v17 = vunpack.i.l.bf16 %v1322_v11  ;;  %v1191_v18 = vsel %vm1164_vm1, %v1013_v5, %v1190_v15  ;;  %v1329_v19 = vunpack.i.h.bf16 %v1327_v10 }
  0xa5   :  { %v1025_v20 = vrot.slane %v1324_v13, %v1630_v49  ;;  %v1192_v22 = vsel %vm1166_vm2, %v1017_v14, %v1191_v18  ;;  %v1029_v29 = vrot.slane %v1328_v16, %v1630_v49 }
  0xa6   :  { %v1021_v21 = vrot.slane %v1323_v17, %v1630_v49  ;;  %v1337_v23 = vpop.permute.xlu1 %1336  ;;  %v1332_v24 = vpop.permute.xlu0 %1331  ;;  %v1033_v32 = vrot.slane %v1329_v19, %v1630_v49 }
  0xa7   :  { %v1338_v26 = vunpack.i.l.bf16 %v1337_v23  ;;  %v1334_v27 = vunpack.i.h.bf16 %v1332_v24  ;;  %v1333_v28 = vunpack.i.l.bf16 %v1332_v24  ;;  %v1339_v31 = vunpack.i.h.bf16 %v1337_v23 }
  0xa8   :  { %v1193_v30 = vsel %vm1168_vm3, %v1021_v21, %v1192_v22 }
  0xa9   :  { %v1194_v33 = vsel %vm1170_vm4, %v1025_v20, %v1193_v30  ;;  %v1045_v34 = vrot.slane %v1338_v26, %v1630_v49  ;;  %v1041_v35 = vrot.slane %v1334_v27, %v1630_v49  ;;  %v1037_v37 = vrot.slane %v1333_v28, %v1630_v49 }
  0xaa   :  { %v1195_v36 = vsel %vm1172_vm5, %v1029_v29, %v1194_v33  ;;  %v1347_v38 = vpop.permute.xlu1 %1346  ;;  %v1342_v39 = vpop.permute.xlu0 %1341  ;;  %v1049_v42 = vrot.slane %v1339_v31, %v1630_v49 }
  0xab   :  { %v1196_v40 = vsel %vm1174_vm6, %v1033_v32, %v1195_v36  ;;  %v1344_v41 = vunpack.i.h.bf16 %v1342_v39  ;;  %v1197_v43 = vsel %vm1162_vm0, %v1041_v35, %v1037_v37  ;;  %v1348_v44 = vunpack.i.l.bf16 %v1347_v38 }
  0xac   :  { %1237 = vst.msk [vmem:[%s1841_s1 + $0x18] sm:$0xff] %vm1233_vm7, %v1196_v40  ;;  %v1343_v45 = vunpack.i.l.bf16 %v1342_v39  ;;  %v1198_v46 = vsel %vm1164_vm1, %v1045_v34, %v1197_v43  ;;  %v1349_v47 = vunpack.i.h.bf16 %v1347_v38 }
  0xad   :  { %v1057_v48 = vrot.slane %v1344_v41, %v1630_v49  ;;  %v1199_v50 = vsel %vm1166_vm2, %v1049_v42, %v1198_v46  ;;  %v1061_v55 = vrot.slane %v1348_v44, %v1630_v49 }
  0xae   :  { %v1053_v0 = vrot.slane %v1343_v45, %v1630_v49  ;;  %v1357_v51 = vpop.permute.xlu1 %1356  ;;  %v1352_v52 = vpop.permute.xlu0 %1351  ;;  %v1065_v57 = vrot.slane %v1349_v47, %v1630_v49 }
  0xaf   :  { %v1354_v53 = vunpack.i.h.bf16 %v1352_v52  ;;  %v1353_v54 = vunpack.i.l.bf16 %v1352_v52  ;;  %v1358_v58 = vunpack.i.l.bf16 %v1357_v51  ;;  %v1359_v6 = vunpack.i.h.bf16 %v1357_v51 }
  0xb0   :  { %v1200_v56 = vsel %vm1168_vm3, %v1053_v0, %v1199_v50 }
  0xb1   :  { %v1201_v25 = vsel %vm1170_vm4, %v1057_v48, %v1200_v56  ;;  %v1073_v62 = vrot.slane %v1354_v53, %v1630_v49  ;;  %v1069_v63 = vrot.slane %v1353_v54, %v1630_v49  ;;  %v1077_v3 = vrot.slane %v1358_v58, %v1630_v49 }
  0xb2   :  { %v1202_v8 = vsel %vm1172_vm5, %v1061_v55, %v1201_v25  ;;  %v1367_v59 = vpop.permute.xlu1 %1366  ;;  %v1362_v60 = vpop.permute.xlu0 %1361  ;;  %v1081_v22 = vrot.slane %v1359_v6, %v1630_v49 }
  0xb3   :  { %v1203_v61 = vsel %vm1174_vm6, %v1065_v57, %v1202_v8  ;;  %v1369_v1 = vunpack.i.h.bf16 %v1367_v59  ;;  %v1368_v2 = vunpack.i.l.bf16 %v1367_v59  ;;  %v1204_v7 = vsel %vm1162_vm0, %v1073_v62, %v1069_v63 }
  0xb4   :  { %1238 = vst.msk [vmem:[%s1841_s1 + $0x20] sm:$0xff] %vm1233_vm7, %v1203_v61  ;;  %v1363_v11 = vunpack.i.l.bf16 %v1362_v60  ;;  %v1205_v16 = vsel %vm1164_vm1, %v1077_v3, %v1204_v7  ;;  %v1364_v26 = vunpack.i.h.bf16 %v1362_v60 }
  0xb5   :  { %v1105_v13 = vrot.slane %v1369_v1, %v1630_v49  ;;  %v1101_v14 = vrot.slane %v1368_v2, %v1630_v49  ;;  %v1206_v30 = vsel %vm1166_vm2, %v1081_v22, %v1205_v16 }
  0xb6   :  { %v1377_v4 = vpop.permute.xlu1 %1376  ;;  %v1372_v5 = vpop.permute.xlu0 %1371  ;;  %v1085_v27 = vrot.slane %v1363_v11, %v1630_v49  ;;  %v1089_v45 = vrot.slane %v1364_v26, %v1630_v49 }
  0xb7   :  { %v1378_v9 = vunpack.i.l.bf16 %v1377_v4  ;;  %v1374_v10 = vunpack.i.h.bf16 %v1372_v5  ;;  %v1373_v12 = vunpack.i.l.bf16 %v1372_v5  ;;  %v1379_v15 = vunpack.i.h.bf16 %v1377_v4 }
  0xb8   :  { %v1211_v29 = vsel %vm1162_vm0, %v1105_v13, %v1101_v14  ;;  %v1207_v46 = vsel %vm1168_vm3, %v1085_v27, %v1206_v30 }
  0xb9   :  { %v1109_v17 = vrot.slane %v1378_v9, %v1630_v49  ;;  %v1137_v18 = vrot.slane %v1374_v10, %v1630_v49  ;;  %v1133_v19 = vrot.slane %v1373_v12, %v1630_v49  ;;  %v1141_v31 = vrot.slane %v1379_v15, %v1630_v49 }
  0xba   :  { %v1387_v20 = vpop.permute.xlu1 %1386  ;;  %v1382_v21 = vpop.permute.xlu0 %1381  ;;  %v1208_v60 = vsel %vm1170_vm4, %v1089_v45, %v1207_v46 }
  0xbb   :  { %v1388_v23 = vunpack.i.l.bf16 %v1387_v20  ;;  %v1384_v24 = vunpack.i.h.bf16 %v1382_v21  ;;  %v1383_v28 = vunpack.i.l.bf16 %v1382_v21  ;;  %v1389_v32 = vunpack.i.h.bf16 %v1387_v20 }
  0xbc   :  { %v1212_v33 = vsel %vm1164_vm1, %v1109_v17, %v1211_v29  ;;  %v1218_v34 = vsel %vm1162_vm0, %v1137_v18, %v1133_v19 }
  0xbd   :  { %v1145_v35 = vrot.slane %v1384_v24, %v1630_v49  ;;  %v1113_v36 = vrot.slane %v1383_v28, %v1630_v49  ;;  %v1117_v39 = vrot.slane %v1388_v23, %v1630_v49  ;;  %v1149_v47 = vrot.slane %v1389_v32, %v1630_v49 }
  0xbe   :  { %v1397_v37 = vpop.permute.xlu1 %1396  ;;  %v1392_v38 = vpop.permute.xlu0 %1391  ;;  %v1219_v48 = vsel %vm1164_vm1, %v1141_v31, %v1218_v34 }
  0xbf   :  { %v1399_v40 = vunpack.i.h.bf16 %v1397_v37  ;;  %v1398_v41 = vunpack.i.l.bf16 %v1397_v37  ;;  %v1394_v42 = vunpack.i.h.bf16 %v1392_v38  ;;  %v1213_v43 = vsel %vm1166_vm2, %v1113_v36, %v1212_v33 }
  0xc0   :  { %v1393_v44 = vunpack.i.l.bf16 %v1392_v38  ;;  %v1220_v0 = vsel %vm1166_vm2, %v1145_v35, %v1219_v48  ;;  %v1214_v56 = vsel %vm1168_vm3, %v1117_v39, %v1213_v43 }
  0xc1   :  { %v1125_v50 = vrot.slane %v1399_v40, %v1630_v49  ;;  %v1093_v51 = vrot.slane %v1398_v41, %v1630_v49  ;;  %v1153_v55 = vrot.slane %v1394_v42, %v1630_v49  ;;  %v1221_v63 = vsel %vm1168_vm3, %v1149_v47, %v1220_v0 }
  0xc2   :  { %v1121_v52 = vrot.slane %v1393_v44, %v1630_v49  ;;  %v1407_v53 = vpop.permute.xlu1 %1406  ;;  %v1402_v54 = vpop.permute.xlu0 %1401 }
  0xc3   :  { %v1409_v57 = vunpack.i.h.bf16 %v1407_v53  ;;  %v1408_v25 = vunpack.i.l.bf16 %v1407_v53  ;;  %v1404_v58 = vunpack.i.h.bf16 %v1402_v54  ;;  %v1403_v59 = vunpack.i.l.bf16 %v1402_v54 }
  0xc4   :  { %v1215_v8 = vsel %vm1170_vm4, %v1121_v52, %v1214_v56  ;;  %v1209_v4 = vsel %vm1172_vm5, %v1093_v51, %v1208_v60  ;;  %v1222_v5 = vsel %vm1170_vm4, %v1153_v55, %v1221_v63 }
  0xc5   :  { %v1161_v61 = vrot.slane %v1409_v57, %v1630_v49  ;;  %v1129_v62 = vrot.slane %v1408_v25, %v1630_v49  ;;  %v1216_v1 = vsel %vm1172_vm5, %v1125_v50, %v1215_v8  ;;  %v1097_v2 = vrot.slane %v1404_v58, %v1630_v49 }
  0xc6   :  { %v1157_v3 = vrot.slane %v1403_v59, %v1630_v49 }
  0xc7   :  { %v1217_v6 = vsel %vm1174_vm6, %v1129_v62, %v1216_v1  ;;  %v1210_v7 = vsel %vm1174_vm6, %v1097_v2, %v1209_v4 }
  0xc8   :  { %1240 = vst.msk [vmem:[%s1841_s1 + $0x30] sm:$0xff] %vm1233_vm7, %v1217_v6  ;;  %v1223_v9 = vsel %vm1172_vm5, %v1157_v3, %v1222_v5  ;;  %1239 = vst.msk [vmem:[%s1841_s1 + $0x28] sm:$0xff] %vm1233_vm7, %v1210_v7 }
  0xc9   :  { %v1224_v10 = vsel %vm1174_vm6, %v1161_v61, %v1223_v9 }
  0xca   :  { %1241 = vst.msk [vmem:[%s1841_s1 + $0x38] sm:$0xff] %vm1233_vm7, %v1224_v10 }

</bundles_post_ra>
